<compile_context>
chip_gen: v7x
topology: tpu7x:2x2x1
jax: 0.10.0
libtpu: 0.0.40
codegen_flags: <defaults>
</compile_context>

<pallas_src>
import jax
import jax.numpy as jnp
from jax import lax
from jax.experimental import pallas as pl
from jax.experimental.pallas import tpu as pltpu

SIGMOID_SCALE = 5.0
BN_EPS = 1e-5
LANES = 128


def _round_up(x, m):
    return (x + m - 1) // m * m


def _pick_row_tile(h, w, cout_p, target_bytes=2 * 1024 * 1024):
    """Largest divisor th of h with a ~target_bytes bf16 z tile (th*w, cout_p)."""
    target_rows = max(1, target_bytes // (cout_p * 2))
    best = 1
    for th in range(1, h + 1):
        if h % th == 0 and th * w <= target_rows:
            best = th
    return best


def _pick_hw_tile(hw, cout_p, target_bytes=2 * 1024 * 1024):
    """Phase-2 row tile: full HW if small, else a 128-multiple near target_bytes."""
    rows = max(128, target_bytes // (cout_p * 2))
    if hw <= rows:
        return hw
    return (rows // 128) * 128


# ---------------------------------------------------------------------------
# Phase 1: in-VMEM im2col -> single K_p-deep MXU matmul + per-tile BN partials.
# ---------------------------------------------------------------------------
def conv_stats_kernel(xp_ref, w_ref, z_ref, sum_ref, sq_ref):
    # xp_ref:  (1, th+2, W+2, Cin_p)  bf16   spatially padded row-tile (halo rows)
    # w_ref:   (K_p, Cout_p)          bf16   flattened 3x3 weights, K_p = 128-pad
    # z_ref:   (1, th*W, Cout_p)      bf16   conv output (bias-free)
    # sum_ref: (1, 1, Cout_p)         f32    per-tile channel sum
    # sq_ref:  (1, 1, Cout_p)         f32    per-tile channel sum of squares
    th = xp_ref.shape[1] - 2
    wd = xp_ref.shape[2] - 2
    cin_p = xp_ref.shape[3]
    thw = th * wd
    k_p = w_ref.shape[0]

    # Build the im2col tile once in VMEM (relayout happens here, not per-matmul).
    pieces = []
    for kh in range(3):
        for kw in range(3):
            xs = xp_ref[0, kh:kh + th, kw:kw + wd, :]      # (th, W, Cin_p) bf16
            pieces.append(xs.reshape(thw, cin_p))
    pad_k = k_p - 9 * cin_p
    if pad_k > 0:
        pieces.append(jnp.zeros((thw, pad_k), dtype=jnp.bfloat16))
    col = jnp.concatenate(pieces, axis=-1)                  # (thw, K_p) bf16

    # Single deep-contraction matmul (f32 accumulation).
    acc = jnp.dot(col, w_ref[...], preferred_element_type=jnp.float32)

    z_ref[0] = acc.astype(z_ref.dtype)                      # bf16 store
    sum_ref[0] = jnp.sum(acc, axis=0, keepdims=True)        # (1, Cout_p) f32
    sq_ref[0] = jnp.sum(acc * acc, axis=0, keepdims=True)   # (1, Cout_p) f32


# ---------------------------------------------------------------------------
# Phase 2: y = relu(z*a + c), transposed in-kernel straight into NCHW layout.
# ---------------------------------------------------------------------------
def bn_apply_kernel(z_ref, a_ref, c_ref, o_ref):
    # z_ref: (1, thw2, Cout_p) bf16; a/c: (Cout_p, 1) f32; o_ref: (1, Cout, thw2) f32
    cout = o_ref.shape[1]
    zt = jnp.transpose(z_ref[0].astype(jnp.float32))        # (Cout_p, thw2)
    a = a_ref[...]
    c = c_ref[...]
    y = zt[:cout] * a[:cout] + c[:cout]
    o_ref[0] = jnp.maximum(y, 0.0)


def convbr_forward(x_nchw, weight, bias, gamma, beta, channel_scale):
    """ConvBR forward.  x: (N, Cin, H, W); weight: (Cout, Cin, 3, 3).  Returns NCHW."""
    n, cin, h, w = x_nchw.shape
    cout = weight.shape[0]
    hw = h * w
    cin_p = _round_up(cin, 8)
    cout_p = _round_up(cout, LANES)
    k = 9 * cin_p
    k_p = _round_up(k, LANES)

    # NCHW -> NHWC, spatial zero-pad for 'same' 3x3, channel pad, bf16 MXU operands.
    x_nhwc = jnp.transpose(x_nchw, (0, 2, 3, 1))
    xp = jnp.pad(x_nhwc, ((0, 0), (1, 1), (1, 1), (0, cin_p - cin))).astype(jnp.bfloat16)

    # Row tiling with a 1-row halo (duplicated on the host so BlockSpecs don't overlap).
    th = _pick_row_tile(h, w, cout_p)
    n_t = h // th
    thw = th * w
    if n_t == 1:
        xc = xp                                               # (N, H+2, W+2, Cin_p)
    else:
        xc = jnp.stack([xp[:, t * th:t * th + th + 2] for t in range(n_t)], axis=1)
        xc = xc.reshape(n * n_t, th + 2, w + 2, cin_p)

    # (Cout, Cin, 3, 3) -> single (K_p, Cout_p) bf16 contraction matrix.
    w_taps = jnp.transpose(weight, (2, 3, 1, 0))              # (3, 3, Cin, Cout)
    w_taps = jnp.pad(w_taps, ((0, 0), (0, 0), (0, cin_p - cin), (0, cout_p - cout)))
    w_mat = w_taps.reshape(k, cout_p)
    w_mat = jnp.pad(w_mat, ((0, k_p - k), (0, 0))).astype(jnp.bfloat16)

    # Conv bias cancels exactly under training-mode BatchNorm (kept for API parity).
    del bias

    # ---- phase 1 -----------------------------------------------------------
    z, s_part, q_part = pl.pallas_call(
        conv_stats_kernel,
        out_shape=(
            jax.ShapeDtypeStruct((n * n_t, thw, cout_p), jnp.bfloat16),
            jax.ShapeDtypeStruct((n * n_t, 1, cout_p), jnp.float32),
            jax.ShapeDtypeStruct((n * n_t, 1, cout_p), jnp.float32),
        ),
        grid_spec=pltpu.PrefetchScalarGridSpec(
            num_scalar_prefetch=0,
            grid=(n * n_t,),
            in_specs=[
                pl.BlockSpec((1, th + 2, w + 2, cin_p), lambda i: (i, 0, 0, 0)),
                pl.BlockSpec((k_p, cout_p), lambda i: (0, 0)),
            ],
            out_specs=(
                pl.BlockSpec((1, thw, cout_p), lambda i: (i, 0, 0)),
                pl.BlockSpec((1, 1, cout_p), lambda i: (i, 0, 0)),
                pl.BlockSpec((1, 1, cout_p), lambda i: (i, 0, 0)),
            ),
        ),
        compiler_params=pltpu.CompilerParams(
            dimension_semantics=("parallel",)),
    )(xc, w_mat)

    # ---- merge per-tile stats (equal counts -> exact Chan merge) -------------
    cnt = float(thw)
    sums = s_part[:, 0, :]                                    # (N*n_t, Cout_p)
    sqs = q_part[:, 0, :]
    mean_i = sums / cnt
    m2_i = sqs - cnt * mean_i * mean_i                        # per-tile, f32
    mean = jnp.mean(mean_i, axis=0)
    m2 = jnp.sum(m2_i, axis=0) + cnt * jnp.sum((mean_i - mean) ** 2, axis=0)
    var = jnp.maximum(m2 / float(n * hw), 0.0)                # biased (PyTorch BN norm)
    inv_std = lax.rsqrt(var + BN_EPS)

    # Fold BN affine + sigmoid(sigmoid_scale * channel_scale) gate into (a, c).
    gamma_p = jnp.pad(gamma, (0, cout_p - cout))
    beta_p = jnp.pad(beta, (0, cout_p - cout))
    cs_p = jnp.pad(channel_scale, (0, cout_p - cout))
    ws = jax.nn.sigmoid(SIGMOID_SCALE * cs_p)
    a_vec = (gamma_p * inv_std * ws).reshape(cout_p, 1).astype(jnp.float32)
    c_vec = ((beta_p - gamma_p * mean * inv_std) * ws).reshape(cout_p, 1).astype(jnp.float32)

    # ---- phase 2: lane-dense apply, fused transpose to NCHW -----------------
    z2 = z.reshape(n, hw, cout_p)                             # contiguous, no copy
    thw2 = _pick_hw_tile(hw, cout_p)
    out_flat = pl.pallas_call(
        bn_apply_kernel,
        out_shape=jax.ShapeDtypeStruct((n, cout, hw), jnp.float32),
        grid_spec=pltpu.PrefetchScalarGridSpec(
            num_scalar_prefetch=0,
            grid=(n, pl.cdiv(hw, thw2)),
            in_specs=[
                pl.BlockSpec((1, thw2, cout_p), lambda i, t: (i, t, 0)),
                pl.BlockSpec((cout_p, 1), lambda i, t: (0, 0)),
                pl.BlockSpec((cout_p, 1), lambda i, t: (0, 0)),
            ],
            out_specs=pl.BlockSpec((1, cout, thw2), lambda i, t: (i, 0, t)),
        ),
        compiler_params=pltpu.CompilerParams(
            dimension_semantics=("parallel", "parallel")),
    )(z2, a_vec, c_vec)

    return out_flat.reshape(n, cout, h, w)


def reference_forward(x_nchw, weight, bias, gamma, beta, channel_scale):
    """Pure-JAX f32 reference mirroring the PyTorch forward (training-mode BN)."""
    y = lax.conv_general_dilated(
        x_nchw, weight, window_strides=(1, 1), padding=((1, 1), (1, 1)),
        dimension_numbers=("NCHW", "OIHW", "NCHW"))
    y = y + bias[None, :, None, None]
    mean = jnp.mean(y, axis=(0, 2, 3), keepdims=True)
    var = jnp.mean((y - mean) ** 2, axis=(0, 2, 3), keepdims=True)
    y = (y - mean) / jnp.sqrt(var + BN_EPS)
    y = y * gamma[None, :, None, None] + beta[None, :, None, None]
    ws = jax.nn.sigmoid(SIGMOID_SCALE * channel_scale)[None, :, None, None]
    y = y * ws
    return jnp.maximum(y, 0.0)


if __name__ == "__main__":
    key = jax.random.PRNGKey(0)
    k_x, k_w, k_b = jax.random.split(key, 3)

    N, C_IN, C_OUT, H, W = 2, 4, 8, 16, 16

    x = jax.random.normal(k_x, (N, C_IN, H, W), dtype=jnp.float32)

    # Deterministic parameter init mirroring ConvBR._initialize_weights:
    #   conv.weight ~ kaiming_normal(fan_out, relu): std = sqrt(2 / (C_out*KH*KW))
    fan_out = C_OUT * 3 * 3
    w_std = (2.0 / fan_out) ** 0.5
    weight = w_std * jax.random.normal(k_w, (C_OUT, C_IN, 3, 3), dtype=jnp.float32)
    #   conv.bias: PyTorch default uniform(-1/sqrt(fan_in), 1/sqrt(fan_in))
    fan_in = C_IN * 3 * 3
    bound = 1.0 / (fan_in ** 0.5)
    bias = jax.random.uniform(k_b, (C_OUT,), minval=-bound, maxval=bound,
                              dtype=jnp.float32)
    #   batchnorm weight=1, bias=0; channel_scale = ones
    gamma = jnp.ones((C_OUT,), dtype=jnp.float32)
    beta = jnp.zeros((C_OUT,), dtype=jnp.float32)
    channel_scale = jnp.ones((C_OUT,), dtype=jnp.float32)

    out = convbr_forward(x, weight, bias, gamma, beta, channel_scale)
    out = jax.block_until_ready(out)

    ref = reference_forward(x, weight, bias, gamma, beta, channel_scale)
    assert out.shape == (N, C_OUT, H, W)
    # bf16 MXU operands (f32 accumulation) vs a pure-f32 reference -> bf16-level tolerance.
    assert jnp.allclose(out, ref, rtol=2e-2, atol=2e-2), "mismatch vs reference"

    print("KERNEL_OK")
</pallas_src>

<mosaic_0001>
module attributes {stable_mosaic.version = 11 : i64} {
  func.func @conv_stats_kernel(%arg0: i32, %arg1: memref<1x18x18x8xbf16, #tpu.memory_space<vmem>>, %arg2: memref<128x128xbf16, #tpu.memory_space<vmem>>, %arg3: memref<1x256x128xbf16, #tpu.memory_space<vmem>>, %arg4: memref<1x1x128xf32, #tpu.memory_space<vmem>>, %arg5: memref<1x1x128xf32, #tpu.memory_space<vmem>>) attributes {dimension_semantics = [#tpu.dimension_semantics<parallel>], iteration_bounds = array<i64: 2>, scalar_prefetch = 0 : i64, scratch_operands = 0 : i64, tpu.core_type = #tpu.core_type<tc>, window_params = [{transform_indices = @transform_0, window_bounds = array<i64: 1, 18, 18, 8>}, {pipeline_mode = #tpu.pipeline_mode<synchronous>, transform_indices = @transform_1, window_bounds = array<i64: 128, 128>}, {transform_indices = @transform_2, window_bounds = array<i64: 1, 256, 128>}, {transform_indices = @transform_3, window_bounds = array<i64: 1, 1, 128>}, {transform_indices = @transform_4, window_bounds = array<i64: 1, 1, 128>}]} {
    %c0 = arith.constant 0 : index
    %c0_0 = arith.constant 0 : index
    %c0_1 = arith.constant 0 : index
    %c0_2 = arith.constant 0 : index
    %0 = vector.load %arg1[%c0, %c0_0, %c0_1, %c0_2] : memref<1x18x18x8xbf16, #tpu.memory_space<vmem>>, vector<1x16x16x8xbf16>
    %1 = vector.shape_cast %0 : vector<1x16x16x8xbf16> to vector<16x16x8xbf16>
    %2 = vector.shape_cast %1 : vector<16x16x8xbf16> to vector<256x8xbf16>
    %c0_3 = arith.constant 0 : index
    %c0_4 = arith.constant 0 : index
    %c1 = arith.constant 1 : index
    %c0_5 = arith.constant 0 : index
    %3 = vector.load %arg1[%c0_3, %c0_4, %c1, %c0_5] : memref<1x18x18x8xbf16, #tpu.memory_space<vmem>>, vector<1x16x16x8xbf16>
    %4 = vector.shape_cast %3 : vector<1x16x16x8xbf16> to vector<16x16x8xbf16>
    %5 = vector.shape_cast %4 : vector<16x16x8xbf16> to vector<256x8xbf16>
    %c0_6 = arith.constant 0 : index
    %c0_7 = arith.constant 0 : index
    %c2 = arith.constant 2 : index
    %c0_8 = arith.constant 0 : index
    %6 = vector.load %arg1[%c0_6, %c0_7, %c2, %c0_8] : memref<1x18x18x8xbf16, #tpu.memory_space<vmem>>, vector<1x16x16x8xbf16>
    %7 = vector.shape_cast %6 : vector<1x16x16x8xbf16> to vector<16x16x8xbf16>
    %8 = vector.shape_cast %7 : vector<16x16x8xbf16> to vector<256x8xbf16>
    %c0_9 = arith.constant 0 : index
    %c1_10 = arith.constant 1 : index
    %c0_11 = arith.constant 0 : index
    %c0_12 = arith.constant 0 : index
    %9 = vector.load %arg1[%c0_9, %c1_10, %c0_11, %c0_12] : memref<1x18x18x8xbf16, #tpu.memory_space<vmem>>, vector<1x16x16x8xbf16>
    %10 = vector.shape_cast %9 : vector<1x16x16x8xbf16> to vector<16x16x8xbf16>
    %11 = vector.shape_cast %10 : vector<16x16x8xbf16> to vector<256x8xbf16>
    %c0_13 = arith.constant 0 : index
    %c1_14 = arith.constant 1 : index
    %c1_15 = arith.constant 1 : index
    %c0_16 = arith.constant 0 : index
    %12 = vector.load %arg1[%c0_13, %c1_14, %c1_15, %c0_16] : memref<1x18x18x8xbf16, #tpu.memory_space<vmem>>, vector<1x16x16x8xbf16>
    %13 = vector.shape_cast %12 : vector<1x16x16x8xbf16> to vector<16x16x8xbf16>
    %14 = vector.shape_cast %13 : vector<16x16x8xbf16> to vector<256x8xbf16>
    %c0_17 = arith.constant 0 : index
    %c1_18 = arith.constant 1 : index
    %c2_19 = arith.constant 2 : index
    %c0_20 = arith.constant 0 : index
    %15 = vector.load %arg1[%c0_17, %c1_18, %c2_19, %c0_20] : memref<1x18x18x8xbf16, #tpu.memory_space<vmem>>, vector<1x16x16x8xbf16>
    %16 = vector.shape_cast %15 : vector<1x16x16x8xbf16> to vector<16x16x8xbf16>
    %17 = vector.shape_cast %16 : vector<16x16x8xbf16> to vector<256x8xbf16>
    %c0_21 = arith.constant 0 : index
    %c2_22 = arith.constant 2 : index
    %c0_23 = arith.constant 0 : index
    %c0_24 = arith.constant 0 : index
    %18 = vector.load %arg1[%c0_21, %c2_22, %c0_23, %c0_24] : memref<1x18x18x8xbf16, #tpu.memory_space<vmem>>, vector<1x16x16x8xbf16>
    %19 = vector.shape_cast %18 : vector<1x16x16x8xbf16> to vector<16x16x8xbf16>
    %20 = vector.shape_cast %19 : vector<16x16x8xbf16> to vector<256x8xbf16>
    %c0_25 = arith.constant 0 : index
    %c2_26 = arith.constant 2 : index
    %c1_27 = arith.constant 1 : index
    %c0_28 = arith.constant 0 : index
    %21 = vector.load %arg1[%c0_25, %c2_26, %c1_27, %c0_28] : memref<1x18x18x8xbf16, #tpu.memory_space<vmem>>, vector<1x16x16x8xbf16>
    %22 = vector.shape_cast %21 : vector<1x16x16x8xbf16> to vector<16x16x8xbf16>
    %23 = vector.shape_cast %22 : vector<16x16x8xbf16> to vector<256x8xbf16>
    %c0_29 = arith.constant 0 : index
    %c2_30 = arith.constant 2 : index
    %c2_31 = arith.constant 2 : index
    %c0_32 = arith.constant 0 : index
    %24 = vector.load %arg1[%c0_29, %c2_30, %c2_31, %c0_32] : memref<1x18x18x8xbf16, #tpu.memory_space<vmem>>, vector<1x16x16x8xbf16>
    %25 = vector.shape_cast %24 : vector<1x16x16x8xbf16> to vector<16x16x8xbf16>
    %26 = vector.shape_cast %25 : vector<16x16x8xbf16> to vector<256x8xbf16>
    %cst = arith.constant 0.000000e+00 : bf16
    %27 = vector.broadcast %cst : bf16 to vector<256x56xbf16>
    %28 = tpu.concatenate %2, %5, %8, %11, %14, %17, %20, %23, %26, %27 in 1 : vector<256x8xbf16>, vector<256x8xbf16>, vector<256x8xbf16>, vector<256x8xbf16>, vector<256x8xbf16>, vector<256x8xbf16>, vector<256x8xbf16>, vector<256x8xbf16>, vector<256x8xbf16>, vector<256x56xbf16> -> vector<256x128xbf16>
    %c0_33 = arith.constant 0 : index
    %c0_34 = arith.constant 0 : index
    %29 = vector.load %arg2[%c0_33, %c0_34] : memref<128x128xbf16, #tpu.memory_space<vmem>>, vector<128x128xbf16>
    %cst_35 = arith.constant dense<0.000000e+00> : vector<256x128xf32>
    %30 = tpu.matmul %28, %29, %cst_35 {dimension_numbers = #tpu.dot_dimension_numbers<[1], [0], [0], [1], [0, 0, 1, 1], [], []>} : vector<256x128xbf16>, vector<128x128xbf16>, vector<256x128xf32> -> vector<256x128xf32>
    %31 = arith.truncf %30 : vector<256x128xf32> to vector<256x128xbf16>
    %c0_36 = arith.constant 0 : index
    %c0_37 = arith.constant 0 : index
    %c0_38 = arith.constant 0 : index
    %32 = vector.load %arg3[%c0_36, %c0_37, %c0_38] : memref<1x256x128xbf16, #tpu.memory_space<vmem>>, vector<1x256x128xbf16>
    %33 = vector.shape_cast %32 : vector<1x256x128xbf16> to vector<256x128xbf16>
    %34 = vector.shape_cast %31 : vector<256x128xbf16> to vector<1x256x128xbf16>
    tpu.vector_store %arg3[%c0_36, %c0_37, %c0_38], %34 {strides = array<i32>} : memref<1x256x128xbf16, #tpu.memory_space<vmem>>, vector<1x256x128xbf16>,
    %cst_39 = arith.constant dense<0.000000e+00> : vector<128xf32>
    %35 = vector.multi_reduction <add>, %30, %cst_39 [0] : vector<256x128xf32> to vector<128xf32>
    %36 = vector.shape_cast %35 : vector<128xf32> to vector<1x128xf32>
    %c0_40 = arith.constant 0 : index
    %c0_41 = arith.constant 0 : index
    %c0_42 = arith.constant 0 : index
    %37 = vector.load %arg4[%c0_40, %c0_41, %c0_42] : memref<1x1x128xf32, #tpu.memory_space<vmem>>, vector<1x1x128xf32>
    %38 = vector.shape_cast %37 : vector<1x1x128xf32> to vector<1x128xf32>
    %39 = vector.shape_cast %36 : vector<1x128xf32> to vector<1x1x128xf32>
    tpu.vector_store %arg4[%c0_40, %c0_41, %c0_42], %39 {strides = array<i32>} : memref<1x1x128xf32, #tpu.memory_space<vmem>>, vector<1x1x128xf32>,
    %40 = arith.mulf %30, %30 : vector<256x128xf32>
    %cst_43 = arith.constant dense<0.000000e+00> : vector<128xf32>
    %41 = vector.multi_reduction <add>, %40, %cst_43 [0] : vector<256x128xf32> to vector<128xf32>
    %42 = vector.shape_cast %41 : vector<128xf32> to vector<1x128xf32>
    %c0_44 = arith.constant 0 : index
    %c0_45 = arith.constant 0 : index
    %c0_46 = arith.constant 0 : index
    %43 = vector.load %arg5[%c0_44, %c0_45, %c0_46] : memref<1x1x128xf32, #tpu.memory_space<vmem>>, vector<1x1x128xf32>
    %44 = vector.shape_cast %43 : vector<1x1x128xf32> to vector<1x128xf32>
    %45 = vector.shape_cast %42 : vector<1x128xf32> to vector<1x1x128xf32>
    tpu.vector_store %arg5[%c0_44, %c0_45, %c0_46], %45 {strides = array<i32>} : memref<1x1x128xf32, #tpu.memory_space<vmem>>, vector<1x1x128xf32>,
    return
  }
  func.func @transform_0(%arg0: i32) -> (i32, i32, i32, i32) {
    %c0_i32 = arith.constant 0 : i32
    %c0_i32_0 = arith.constant 0 : i32
    %c0_i32_1 = arith.constant 0 : i32
    %c0_i32_2 = arith.constant 0 : i32
    return %arg0, %c0_i32, %c0_i32_0, %c0_i32_1 : i32, i32, i32, i32
  }
  func.func @transform_1(%arg0: i32) -> (i32, i32) {
    %c0_i32 = arith.constant 0 : i32
    %c0_i32_0 = arith.constant 0 : i32
    %c0_i32_1 = arith.constant 0 : i32
    return %c0_i32, %c0_i32_0 : i32, i32
  }
  func.func @transform_2(%arg0: i32) -> (i32, i32, i32) {
    %c0_i32 = arith.constant 0 : i32
    %c0_i32_0 = arith.constant 0 : i32
    %c0_i32_1 = arith.constant 0 : i32
    return %arg0, %c0_i32, %c0_i32_0 : i32, i32, i32
  }
  func.func @transform_3(%arg0: i32) -> (i32, i32, i32) {
    %c0_i32 = arith.constant 0 : i32
    %c0_i32_0 = arith.constant 0 : i32
    %c0_i32_1 = arith.constant 0 : i32
    return %arg0, %c0_i32, %c0_i32_0 : i32, i32, i32
  }
  func.func @transform_4(%arg0: i32) -> (i32, i32, i32) {
    %c0_i32 = arith.constant 0 : i32
    %c0_i32_0 = arith.constant 0 : i32
    %c0_i32_1 = arith.constant 0 : i32
    return %arg0, %c0_i32, %c0_i32_0 : i32, i32, i32
  }
}

</mosaic_0001>

<bundles_post_ra>
// kernel: tpu_custom_call.1
= control target key start
LH: loop header
LB: loop body
LE: loop exit
PB: predicated region body
PF: predicated region fallthrough
CT: control target
= control target key end

     0   :  { %10 = vsyncpa [#allocation3], 0  ;;  %s6474_s0 = inlined_call_operand.vmem [shape: bf16[2,18,18,8], index: 0, kind: input, shape index: {}]   ;;  %s6475_s1 = inlined_call_operand.vmem [shape: bf16[128,128], index: 1, kind: input, shape index: {}]   ;;  %s6476_s2 = inlined_call_operand.hbm [shape: bf16[2,256,128], index: 2, kind: output, shape index: {0}]   ;;  %s6477_s3 = inlined_call_operand.hbm [shape: f32[2,1,128], index: 3, kind: output, shape index: {1}]   ;;  %s6478_s4 = inlined_call_operand.hbm [shape: f32[2,1,128], index: 4, kind: output, shape index: {2}]  }
   0x1   :  { %12 = vsyncpa [#allocation3 + $0x1], 0 }
   0x2   :  { %13 = vsyncpa [#allocation5], 0 }
   0x3   :  { %15 = vsyncpa [#allocation5 + $0x1], 0  ;;  %s4660_s15 = smov 0   ;;  %s4662_s16 = smov 0  }
   0x4   :  { %s4664_s17 = smov 0   ;;  %s4666_s18 = smov 0  }
   0x5 LB: > { %s4681_s19 = sadd.s32 4294967295, %s4621_s18   ;;  %s3751_s20 = sadd.s32 4294967294, %s4621_s18   ;;  %s4621_s18 = sphi %s4666_s18, %s6488_s18   ;;  %s4617_s17 = sphi %s4664_s17, %s6487_s17   ;;  %s4613_s16 = sphi %s4662_s16, %s6486_s16   ;;  %s4609_s15 = sphi %s4660_s15, %s6485_s15  }
   0x6   : > { %s4685_s21 = sadd.s32 1, %s4621_s18   ;;  %s75_s22 = sadd.s32 1, %s4617_s17 }
   0x7   : > { %s72_s23 = ssub.s32 %s4621_s18, %s4685_s21  ;;  %p85_p0 = scmp.ne.s32.totalorder %s4617_s17, %s4613_s16 }
   0x8   : > { %p73_p1 = scmp.eq.s32.totalorder %s72_s23, 0  ;;  %p86_p2 = scmp.eq.s32.totalorder %s4681_s19, 1 }
   0x9   : > { %p91_p3 = scmp.ne.s32.totalorder %s4613_s16, %s4609_s15  ;;  %p92_p4 = scmp.eq.s32.totalorder %s3751_s20, 1 }
   0xa   : > { %s4698_s24 = scalar_select %p73_p1, %s4617_s17, %s75_s22  }
   0xb   : > { %p4700_p5 = por %p86_p2, %p85_p0  ;;  %p4704_p6 = por %p92_p4, %p91_p3 }
   0xc   : > { %p3754_p7 = scmp.ge.s32.totalorder %s4621_s18, 1  ;;  %p173_p8 = scmp.lt.s32.totalorder %s4621_s18, 3 }
   0xe   : > { %p174_p9 = pnand %p3754_p7, %p173_p8 }
   0xf   : > { %p207_p10 = scmp.lt.s32.totalorder (!%p174_p9), %s4681_s19, 1  ;;  %vm712_vm0 = vcmask (!%p174_p9), 1042432   ;;  %vm713_vm1 = vcmask (!%p174_p9), 1046532   ;;  %s4623_s6 = smov (!%p174_p9), 24   ;;  %vm261_vm3 = vsmask.f32 (!%p174_p9), 3328 }
  0x10   : > { %177 = sbr.rel (%p174_p9) target bundleno = 748 (0x2ec), region = 28  ;;  %vm4739_vm2 = vmor (!%p174_p9), %vm712_vm0, %vm713_vm1  ;;  %vm262_vm4 = vsmask.f32 (!%p174_p9), 7440  ;;  %s4624_s7 = smov (!%p174_p9), 40   ;;  %vm2781_vm6 = vcmask (!%p174_p9), 64512   ;;  %vm2830_vm7 = vcmask (!%p174_p9), 130048  }
  0x11   : > { %s4625_s8 = smov (!%p174_p9), 16   ;;  %vm4789_vm5 = vmor (!%p174_p9), %vm261_vm3, %vm262_vm4  ;;  %s4626_s13 = smov (!%p174_p9), 8   ;;  %vm2863_vm8 = vcmask (!%p174_p9), 195584   ;;  %vm2896_vm9 = vcmask (!%p174_p9), 261120   ;;  %vm2929_vm10 = vcmask (!%p174_p9), 326656   ;;  %vm2962_vm11 = vcmask (!%p174_p9), 392192  }
  0x12   : > { %s4627_s23 = smov (!%p174_p9), 32   ;;  %s4628_s29 = smov (!%p174_p9), 48   ;;  %vm2995_vm12 = vcmask (!%p174_p9), 457728   ;;  %vm3028_vm13 = vcmask (!%p174_p9), 523264   ;;  %vm3061_vm14 = vcmask (!%p174_p9), 588800  }
  0x13   : > { %s4629_s30 = smov (!%p174_p9), 56   ;;  %s4630_s14 = smov (!%p174_p9), 64  }
  0x14   : > { %s4631_s12 = smov (!%p174_p9), [#allocation2]  }
  0x15   : > { %s4503_s22 = sshll.u32 (!%p174_p9), %s4631_s12, 4  ;;  %s4504_s22 = int_to_ptr.vmem [resolvable:$false] %s4503_s22 }
  0x17   : > { %s208_s27 = scalar_select %p207_p10, %s4681_s19, 1 }
  0x19   : > { %s4356_s28 = smul.u32 216, %s208_s27  ;;  %s4505_s27 = scalar_lea.vmem %s4504_s22, 4096 }
  0x1b   : > { %s4715_s5 = scalar_lea.vmem %s6474_s0, %s4356_s28 }
  0x1c   : > { %v3775_v0 = vld [vmem:[%s4715_s5 + $0x18] sm:$0xf]  ;;  %v4719_v1 = vld [vmem:[%s4715_s5 + $0x1c] sm:$0xf]  ;;  %v3773_v2 = vld [vmem:[%s4715_s5 + $0xc] sm:$0xf] }
  0x1d   : > { %v910_v3 = vshll.u32 %v4719_v1, 16  ;;  %v914_v4 = vshrl.u32 %v4719_v1, 16  ;;  %v3982_v5 = vcombine.low %v3775_v0, %v4719_v1  ;;  %v901_v6 = vshrl.u32 %v3775_v0, 16  ;;  %v4726_v7 = vld [vmem:[%s4715_s5 + $0x10] sm:$0xf] }
  0x1e   : > { %v904_v8 = vshll.u32 %v3775_v0, 16  ;;  %v886_v9 = vshll.u32 %v4726_v7, 16  ;;  %v890_v10 = vshrl.u32 %v4726_v7, 16  ;;  %v3981_v11 = vcombine.low %v3773_v2, %v4726_v7  ;;  %v4732_v12 = vld [vmem:[%s4715_s5 + $0x14] sm:$0x1] }
  0x1f   : > { %v4734_v13 = vrot.slane %v914_v4, 4  ;;  %2335 = vrot.lane.b32.xlu1 %v3982_v5, %s4623_s6  ;;  %v903_v14 = vrot.slane %v901_v6, 4  ;;  %v877_v15 = vshrl.u32 %v3773_v2, 16  ;;  %v880_v16 = vshll.u32 %v3773_v2, 16  ;;  %v3821_v18 = vld [vmem:[%s4715_s5 + $0xc] sm:$0xe] }
  0x20   : > { %v906_v19 = vrot.slane %v904_v8, 5  ;;  %v4744_v20 = vrot.slane %v890_v10, 4  ;;  %2333 = vrot.lane.b32.xlu0 %v3981_v11, %s4623_s6  ;;  %v3837_v21 = vrot.slane %v3821_v18, 9  ;;  %v1326_v22 = vrot.slane %v4726_v7, 5  ;;  %v214_v23 = vld [vmem:[%s4715_s5 + $0x4] sm:$0xf] }
  0x21   : > { %v879_v24 = vrot.slane %v877_v15, 4  ;;  %v882_v25 = vrot.slane %v880_v16, 5  ;;  %v1329_v26 = vrot.slane %v4732_v12, 5  ;;  %v245_v27 = vld [vmem:[%s4715_s5 + $0x8] sm:$0x1]  ;;  %v717_v28 = vrot.slane %v214_v23, 5 }
  0x22   : > { %v907_v29 = vor.u32 %v906_v19, %v903_v14  ;;  %v1327_v30 = vsel %vm4739_vm2, %v3837_v21, %v1326_v22  ;;  %v1328_v31 = vrot.slane %v1326_v22, 4  ;;  %v648_v32 = vld [vmem:[%s4715_s5] sm:$0xe]  ;;  %v720_v33 = vrot.slane %v245_v27, 5  ;;  %v216_v34 = vld [vmem:[%s4715_s5 + $0x10] sm:$0xf] }
  0x23   : > { %v883_v35 = vor.u32 %v882_v25, %v879_v24  ;;  %v3757_v36 = vrot.slane %v648_v32, 9  ;;  %v719_v37 = vrot.slane %v717_v28, 4  ;;  %v4756_v38 = vld [vmem:[%s4715_s5 + $0x14] sm:$0x1]  ;;  %v649_v39 = vld [vmem:[%s4715_s5 + $0xc] sm:$0xe] }
  0x24   : > { %v4759_v40 = vrot.slane %v907_v29, 4  ;;  %v1330_v41 = vsel %vm4739_vm2, %v1328_v31, %v1329_v26  ;;  %v3758_v42 = vrot.slane %v649_v39, 9  ;;  %v724_v43 = vrot.slane %v216_v34, 5  ;;  %v213_v44 = vld [vmem:[%s4715_s5] sm:$0xf] }
  0x25   : > { %v4764_v45 = vrot.slane %v883_v35, 4  ;;  %v4013_v46 = vcombine.low %v1327_v30, %v1330_v41  ;;  %v718_v47 = vsel %vm4739_vm2, %v3757_v36, %v717_v28  ;;  %v721_v48 = vsel %vm4739_vm2, %v719_v37, %v720_v33  ;;  %v3822_v49 = vld [vmem:[%s4715_s5 + $0x18] sm:$0xe]  ;;  %v3806_v58 = vld [vmem:[%s4715_s5 + $0x20] sm:$0x1] }
  0x26   : > { %v3965_v50 = vcombine.low %v718_v47, %v721_v48  ;;  %v725_v51 = vsel %vm4739_vm2, %v3758_v42, %v724_v43  ;;  %v726_v52 = vrot.slane %v724_v43, 4  ;;  %v727_v53 = vrot.slane %v4756_v38, 5  ;;  %v215_v63 = vld [vmem:[%s4715_s5 + $0xc] sm:$0xf]  ;;  %v4429_v19 = vld [vmem:[%s6475_s1] sm:$0xff]  }
  0x27   : > { %2493 = vrot.lane.b32.xlu0 %v4013_v46, %s4624_s7  ;;  %v265_v54 = vshrl.u32 %v213_v44, 16  ;;  %v268_v55 = vshll.u32 %v213_v44, 16  ;;  %v274_v56 = vshll.u32 %v214_v23, 16  ;;  %v278_v57 = vshrl.u32 %v214_v23, 16  ;;  %4292 = vmatprep.subr.bf16.mxu0 %v4429_v19  ;;  %v4806_v43 = vld [vmem:[%s4715_s5 + $0x24] sm:$0xf] }
  0x28   : > { %2237 = vrot.lane.b32.xlu1 %v3965_v50, %s4625_s8  ;;  %v728_v59 = vsel %vm4739_vm2, %v726_v52, %v727_v53  ;;  %v284_v60 = vshll.u32 %v245_v27, 16  ;;  %v3838_v61 = vrot.slane %v3822_v49, 9  ;;  %v1333_v62 = vrot.slane %v4719_v1, 5  ;;  %4340 = vmatprep.subr.bf16.mxu1 %v4429_v19  ;;  %v4813_v47 = vld [vmem:[%s4715_s5 + $0x28] sm:$0xf] }
  0x29   : > { %v3966_v0 = vcombine.low %v725_v51, %v728_v59  ;;  %v267_v2 = vrot.slane %v265_v54, 4  ;;  %v270_v4 = vrot.slane %v268_v55, 5  ;;  %v276_v5 = vrot.slane %v274_v56, 5  ;;  %4293 = vmatpush3.bf16.msra.mxu0 %v4429_v19  ;;  %4348 = vmatpush3.bf16.msra.mxu1 %v4429_v19  ;;  %v4432_v48 = vld [vmem:[%s6475_s1 + $0x8] sm:$0xff]   ;;  %v4828_v53 = vld [vmem:[%s4715_s5 + $0x18] sm:$0xf] }
  0x2a   : > { %v280_v6 = vrot.slane %v278_v57, 4  ;;  %v286_v8 = vrot.slane %v284_v60, 5  ;;  %v1334_v10 = vsel %vm4739_vm2, %v3838_v61, %v1333_v62  ;;  %v1335_v11 = vrot.slane %v1333_v62, 4  ;;  %4294 = vmatprep.subr.bf16.mxu0 %v4432_v48  ;;  %v4838_v57 = vld [vmem:[%s4715_s5 + $0x1c] sm:$0xf]  ;;  %4341 = vmatprep.subr.bf16.mxu1 %v4432_v48 }
  0x2b   : > { %v271_v14 = vor.u32 %v270_v4, %v267_v2  ;;  %v1336_v15 = vrot.slane %v3806_v58, 5  ;;  %v289_v16 = vshrl.u32 %v215_v63, 16  ;;  %v292_v18 = vshll.u32 %v215_v63, 16  ;;  %v4846_v2 = vld [vmem:[%s4715_s5 + $0x2c] sm:$0x1] }
  0x2c   : > { %2239 = vrot.lane.b32.xlu1 %v3966_v0, %s4625_s8  ;;  %v281_v22 = vor.u32 %v280_v6, %v276_v5  ;;  %v298_v23 = vshll.u32 %v216_v34, 16  ;;  %v302_v24 = vshrl.u32 %v216_v34, 16  ;;  %v308_v25 = vshll.u32 %v4756_v38, 16 }
  0x2d   : > { %v272_v26 = vrot.slane %v271_v14, 4  ;;  %v1337_v27 = vsel %vm4739_vm2, %v1335_v11, %v1336_v15  ;;  %v291_v28 = vrot.slane %v289_v16, 4  ;;  %v294_v29 = vrot.slane %v292_v18, 5  ;;  %4295 = vmatpush3.bf16.msra.mxu0 %v4432_v48  ;;  %4349 = vmatpush3.bf16.msra.mxu1 %v4432_v48  ;;  %v217_v18 = vld [vmem:[%s4715_s5 + $0x18] sm:$0xf] }
  0x2e   : > { %v282_v30 = vrot.slane %v281_v22, 4  ;;  %v4014_v31 = vcombine.low %v1334_v10, %v1337_v27  ;;  %v300_v32 = vrot.slane %v298_v23, 5  ;;  %v304_v33 = vrot.slane %v302_v24, 4  ;;  %v4856_v10 = vld [vmem:[%s4715_s5 + $0x20] sm:$0x1] }
  0x2f   : > { %v277_v34 = vsel %vm4789_vm5, %v272_v26, %v276_v5  ;;  %v295_v35 = vor.u32 %v294_v29, %v291_v28  ;;  %v310_v36 = vrot.slane %v308_v25, 5  ;;  %v912_v37 = vrot.slane %v910_v3, 5  ;;  %v4865_v29 = vld [vmem:[%s4715_s5 + $0x1c] sm:$0xf] }
  0x30   : > { %v287_v38 = vsel %vm4789_vm5, %v282_v30, %v286_v8  ;;  %2495 = vrot.lane.b32.xlu1 %v4014_v31, %s4624_s7  ;;  %v305_v39 = vor.u32 %v304_v33, %v300_v32  ;;  %v920_v41 = vshll.u32 %v3806_v58, 16  ;;  %v888_v42 = vrot.slane %v886_v9, 5  ;;  %v4869_v33 = vld [vmem:[%s4715_s5 + $0x20] sm:$0x1] }
  0x31   : > { %v3949_v44 = vcombine.low %v277_v34, %v287_v38  ;;  %v296_v46 = vrot.slane %v295_v35, 4  ;;  %v913_v1 = vsel %vm4789_vm5, %v4759_v40, %v912_v37  ;;  %v917_v3 = vor.u32 %v4734_v13, %v912_v37  ;;  %v4436_v35 = vld [vmem:[%s6475_s1 + $0x18] sm:$0xff]  }
  0x32   : > { %v306_v49 = vrot.slane %v305_v39, 4  ;;  %v922_v7 = vrot.slane %v920_v41, 5  ;;  %v889_v9 = vsel %vm4789_vm5, %v4764_v45, %v888_v42  ;;  %v893_v50 = vor.u32 %v4744_v20, %v888_v42  ;;  %v4434_v45 = vld [vmem:[%s6475_s1 + $0x10] sm:$0xff]   ;;  %v3901_v41 = vld [vmem:[%s4715_s5 + $0x18] sm:$0xe] }
  0x33   : > { %2157 = vrot.lane.b32.xlu0 %v3949_v44, %s4626_s13  ;;  %v301_v13 = vsel %vm4789_vm5, %v296_v46, %v300_v32  ;;  %v918_v40 = vrot.slane %v917_v3, 4  ;;  %v896_v51 = vshll.u32 %v4732_v12, 16  ;;  %v1510_v52 = vshrl.u32 %v4806_v43, 16  ;;  %4296 = vmatprep.subr.bf16.mxu0 %v4434_v45 }
  0x34   : > { %v311_v20 = vsel %vm4789_vm5, %v306_v49, %v310_v36  ;;  %v894_v54 = vrot.slane %v893_v50, 4  ;;  %v1513_v55 = vshll.u32 %v4806_v43, 16  ;;  %v1523_v56 = vshrl.u32 %v4813_v47, 16  ;;  %4342 = vmatprep.subr.bf16.mxu1 %v4434_v45  ;;  %4297 = vmatpush3.bf16.msra.mxu0 %v4434_v45 }
  0x35   : > { %v3950_v12 = vcombine.low %v301_v13, %v311_v20  ;;  %v923_v58 = vsel %vm4789_vm5, %v918_v40, %v922_v7  ;;  %v898_v59 = vrot.slane %v896_v51, 5  ;;  %v1512_v60 = vrot.slane %v1510_v52, 4  ;;  %4350 = vmatpush3.bf16.msra.mxu1 %v4434_v45  ;;  %4298 = vmatprep.subr.bf16.mxu0 %v4436_v35  ;;  %v219_v40 = vld [vmem:[%s4715_s5 + $0x24] sm:$0xf]  ;;  %v220_v20 = vld [vmem:[%s4715_s5 + $0x28] sm:$0xf] }
  0x36   : > { %v3998_v61 = vcombine.low %v913_v1, %v923_v58  ;;  %v1515_v62 = vrot.slane %v1513_v55, 5  ;;  %v4030_v63 = vcombine.low %v4806_v43, %v4813_v47  ;;  %v1486_v0 = vshrl.u32 %v4828_v53, 16  ;;  %4343 = vmatprep.subr.bf16.mxu1 %v4436_v35 }
  0x37   : > { %2159 = vrot.lane.b32.xlu0 %v3950_v12, %s4626_s13  ;;  %v899_v4 = vsel %vm4789_vm5, %v894_v54, %v898_v59  ;;  %v1489_v5 = vshll.u32 %v4828_v53, 16  ;;  %v1499_v6 = vshrl.u32 %v4838_v57, 16  ;;  %v4029_v8 = vcombine.low %v4828_v53, %v4838_v57 }
  0x38   : > { %2415 = vrot.lane.b32.xlu1 %v3998_v61, %s4627_s23  ;;  %v3997_v11 = vcombine.low %v889_v9, %v899_v4  ;;  %v1488_v14 = vrot.slane %v1486_v0, 4  ;;  %v1516_v15 = vor.u32 %v1515_v62, %v1512_v60  ;;  %v1519_v16 = vshll.u32 %v4813_v47, 16  ;;  %4299 = vmatpush3.bf16.msra.mxu0 %v4436_v35  ;;  %v4893_v61 = vld [vmem:[%s4715_s5 + $0x2c] sm:$0x1] }
  0x39   : > { %v1491_v19 = vrot.slane %v1489_v5, 5  ;;  %v1525_v22 = vrot.slane %v1523_v56, 4  ;;  %v1529_v23 = vshll.u32 %v4846_v2, 16  ;;  %v1495_v24 = vshll.u32 %v4838_v57, 16  ;;  %4351 = vmatpush3.bf16.msra.mxu1 %v4436_v35 }
  0x3a   : > { %v1517_v25 = vrot.slane %v1516_v15, 4  ;;  %v1521_v26 = vrot.slane %v1519_v16, 5  ;;  %v1501_v27 = vrot.slane %v1499_v6, 4  ;;  %v1505_v28 = vshll.u32 %v4856_v10, 16  ;;  %v3902_v6 = vld [vmem:[%s4715_s5 + $0x24] sm:$0xe] }
  0x3b   : > { %2413 = vrot.lane.b32.xlu0 %v3997_v11, %s4627_s23  ;;  %v1531_v30 = vrot.slane %v1529_v23, 5  ;;  %v1492_v31 = vor.u32 %v1491_v19, %v1488_v14  ;;  %v1497_v32 = vrot.slane %v1495_v24, 5  ;;  %v313_v34 = vshrl.u32 %v217_v18, 16  ;;  %v4438_v23 = vld [vmem:[%s6475_s1 + $0x28] sm:$0xff]  }
  0x3c   : > { %2591 = vrot.lane.b32.xlu1 %v4030_v63, %s4628_s29  ;;  %v1522_v36 = vsel %vm4789_vm5, %v1517_v25, %v1521_v26  ;;  %v1526_v37 = vor.u32 %v1525_v22, %v1521_v26  ;;  %v1507_v38 = vrot.slane %v1505_v28, 5  ;;  %v316_v39 = vshll.u32 %v217_v18, 16  ;;  %v651_v22 = vld [vmem:[%s4715_s5 + $0x24] sm:$0xe] }
  0x3d   : > { %v1493_v42 = vrot.slane %v1492_v31, 4  ;;  %v1502_v43 = vor.u32 %v1501_v27, %v1497_v32  ;;  %v315_v44 = vrot.slane %v313_v34, 4  ;;  %v322_v46 = vshll.u32 %v4865_v29, 16  ;;  %v650_v34 = vld [vmem:[%s4715_s5 + $0x18] sm:$0xe] }
  0x3e   : > { %v1527_v1 = vrot.slane %v1526_v37, 4  ;;  %v318_v3 = vrot.slane %v316_v39, 5  ;;  %v326_v48 = vshrl.u32 %v4865_v29, 16  ;;  %v332_v49 = vshll.u32 %v4869_v33, 16 }
  0x3f   : > { %2589 = vrot.lane.b32.xlu0 %v4029_v8, %s4628_s29  ;;  %v1498_v7 = vsel %vm4789_vm5, %v1493_v42, %v1497_v32  ;;  %v1503_v9 = vrot.slane %v1502_v43, 4  ;;  %v324_v50 = vrot.slane %v322_v46, 5  ;;  %v3917_v13 = vrot.slane %v3901_v41, 9  ;;  %v4923_v43 = vld [vmem:[%s4715_s5 + $0x30] sm:$0xf] }
  0x40   : > { %v1532_v51 = vsel %vm4789_vm5, %v1527_v1, %v1531_v30  ;;  %v319_v52 = vor.u32 %v318_v3, %v315_v44  ;;  %v328_v53 = vrot.slane %v326_v48, 4  ;;  %v334_v45 = vrot.slane %v332_v49, 5  ;;  %v4441_v44 = vld [vmem:[%s6475_s1 + $0x30] sm:$0xff]  }
  0x41   : > { %v4046_v54 = vcombine.low %v1522_v36, %v1532_v51  ;;  %v1508_v55 = vsel %vm4789_vm5, %v1503_v9, %v1507_v38  ;;  %v1935_v56 = vrot.slane %v4838_v57, 5  ;;  %v1938_v12 = vrot.slane %v4856_v10, 5  ;;  %v4437_v57 = vld [vmem:[%s6475_s1 + $0x20] sm:$0xff]  }
  0x42   : > { %v4045_v58 = vcombine.low %v1498_v7, %v1508_v55  ;;  %v320_v59 = vrot.slane %v319_v52, 4  ;;  %v329_v60 = vor.u32 %v328_v53, %v324_v50  ;;  %v337_v62 = vshrl.u32 %v219_v40, 16  ;;  %4300 = vmatprep.subr.bf16.mxu0 %v4437_v57  ;;  %4344 = vmatprep.subr.bf16.mxu1 %v4437_v57  ;;  %v3777_v53 = vld [vmem:[%s4715_s5 + $0x24] sm:$0xf] }
  0x43   : > { %2671 = vrot.lane.b32.xlu1 %v4046_v54, %s4629_s30  ;;  %v1936_v63 = vsel %vm4739_vm2, %v3917_v13, %v1935_v56  ;;  %v1937_v0 = vrot.slane %v1935_v56, 4  ;;  %v340_v4 = vshll.u32 %v219_v40, 16  ;;  %v346_v5 = vshll.u32 %v220_v20, 16  ;;  %4301 = vmatpush3.bf16.msra.mxu0 %v4437_v57 }
  0x44   : > { %2669 = vrot.lane.b32.xlu0 %v4045_v58, %s4629_s30  ;;  %v325_v8 = vsel %vm4789_vm5, %v320_v59, %v324_v50  ;;  %v330_v10 = vrot.slane %v329_v60, 4  ;;  %v339_v11 = vrot.slane %v337_v62, 4  ;;  %v350_v14 = vshrl.u32 %v220_v20, 16  ;;  %4352 = vmatpush3.bf16.msra.mxu1 %v4437_v57  ;;  %v4937_v50 = vld [vmem:[%s4715_s5 + $0x34] sm:$0xf] }
  0x45   : > { %v1939_v15 = vsel %vm4739_vm2, %v1937_v0, %v1938_v12  ;;  %v342_v16 = vrot.slane %v340_v4, 5  ;;  %v348_v18 = vrot.slane %v346_v5, 5  ;;  %v356_v19 = vshll.u32 %v4893_v61, 16  ;;  %4302 = vmatprep.subr.bf16.mxu0 %v4438_v23  ;;  %4345 = vmatprep.subr.bf16.mxu1 %v4438_v23  ;;  %v3808_v59 = vld [vmem:[%s4715_s5 + $0x38] sm:$0x1] }
  0x46   : > { %v335_v24 = vsel %vm4789_vm5, %v330_v10, %v334_v45  ;;  %v4061_v25 = vcombine.low %v1936_v63, %v1939_v15  ;;  %v352_v26 = vrot.slane %v350_v14, 4  ;;  %v3918_v27 = vrot.slane %v3902_v6, 9  ;;  %v4946_v45 = vld [vmem:[%s4715_s5 + $0x28] sm:$0xf]  ;;  %v3807_v57 = vld [vmem:[%s4715_s5 + $0x2c] sm:$0x1] }
  0x47   : > { %v3951_v28 = vcombine.low %v325_v8, %v335_v24  ;;  %v343_v30 = vor.u32 %v342_v16, %v339_v11  ;;  %v358_v31 = vrot.slane %v356_v19, 5  ;;  %v1942_v32 = vrot.slane %v4813_v47, 5  ;;  %4303 = vmatpush3.bf16.msra.mxu0 %v4438_v23  ;;  %v3824_v8 = vld [vmem:[%s4715_s5 + $0x30] sm:$0xe]  ;;  %v4443_v24 = vld [vmem:[%s6475_s1 + $0x38] sm:$0xff]  }
  0x48   : > { %2749 = vrot.lane.b32.xlu0 %v4061_v25, %s4630_s14  ;;  %v353_v35 = vor.u32 %v352_v26, %v348_v18  ;;  %v1945_v36 = vrot.slane %v4846_v2, 5  ;;  %v3760_v37 = vrot.slane %v651_v22, 9  ;;  %v738_v38 = vrot.slane %v220_v20, 5  ;;  %4353 = vmatpush3.bf16.msra.mxu1 %v4438_v23  ;;  %v3823_v23 = vld [vmem:[%s4715_s5 + $0x24] sm:$0xe] }
  0x49   : > { %2161 = vrot.lane.b32.xlu1 %v3951_v28, %s4626_s13  ;;  %v344_v39 = vrot.slane %v343_v30, 4  ;;  %v1943_v41 = vsel %vm4739_vm2, %v3918_v27, %v1942_v32  ;;  %v1944_v42 = vrot.slane %v1942_v32, 4  ;;  %v741_v47 = vrot.slane %v4893_v61, 5  ;;  %4304 = vmatprep.subr.bf16.mxu0 %v4441_v44 }
  0x4a   : > { %v354_v46 = vrot.slane %v353_v35, 4  ;;  %v739_v2 = vsel %vm4739_vm2, %v3760_v37, %v738_v38  ;;  %v740_v1 = vrot.slane %v738_v38, 4  ;;  %v3759_v3 = vrot.slane %v650_v34, 9  ;;  %4346 = vmatprep.subr.bf16.mxu1 %v4441_v44 }
  0x4b   : > { %v349_v48 = vsel %vm4789_vm5, %v344_v39, %v348_v18  ;;  %v1946_v49 = vsel %vm4739_vm2, %v1944_v42, %v1945_v36  ;;  %v731_v7 = vrot.slane %v4865_v29, 5  ;;  %v734_v9 = vrot.slane %v4869_v33, 5  ;;  %4305 = vmatpush3.bf16.msra.mxu0 %v4441_v44  ;;  %v4973_v39 = vld [vmem:[%s4715_s5 + $0x3c] sm:$0xf] }
  0x4c   : > { %v359_v13 = vsel %vm4789_vm5, %v354_v46, %v358_v31  ;;  %v4062_v40 = vcombine.low %v1943_v41, %v1946_v49  ;;  %v742_v51 = vsel %vm4739_vm2, %v740_v1, %v741_v47  ;;  %v949_v52 = vshrl.u32 %v4923_v43, 16  ;;  %4354 = vmatpush3.bf16.msra.mxu1 %v4441_v44  ;;  %4306 = vmatprep.subr.bf16.mxu0 %v4443_v24  ;;  %v4987_v49 = vld [vmem:[%s4715_s5 + $0x40] sm:$0xf] }
  0x4d   : > { %v3952_v29 = vcombine.low %v349_v48, %v359_v13  ;;  %v3968_v20 = vcombine.low %v739_v2, %v742_v51  ;;  %v732_v33 = vsel %vm4739_vm2, %v3759_v3, %v731_v7  ;;  %v733_v54 = vrot.slane %v731_v7, 4  ;;  %4347 = vmatprep.subr.bf16.mxu1 %v4443_v24 }
  0x4e   : > { %2751 = vrot.lane.b32.xlu0 %v4062_v40, %s4630_s14  ;;  %v951_v55 = vrot.slane %v949_v52, 4  ;;  %v952_v56 = vshll.u32 %v4923_v43, 16  ;;  %v962_v12 = vshrl.u32 %v4937_v50, 16  ;;  %v3984_v58 = vcombine.low %v4923_v43, %v4937_v50  ;;  %v3857_v52 = vld [vmem:[%s4715_s5 + $0x30] sm:$0xf] }
  0x4f   : > { %2163 = vrot.lane.b32.xlu1 %v3952_v29, %s4626_s13  ;;  %v735_v60 = vsel %vm4739_vm2, %v733_v54, %v734_v9  ;;  %v925_v61 = vshrl.u32 %v3777_v53, 16  ;;  %v928_v62 = vshll.u32 %v3777_v53, 16  ;;  %v938_v63 = vshrl.u32 %v4946_v45, 16  ;;  %4307 = vmatpush3.bf16.msra.mxu0 %v4443_v24 }
  0x50   : > { %v3967_v0 = vcombine.low %v732_v33, %v735_v60  ;;  %v954_v4 = vrot.slane %v952_v56, 5  ;;  %v3983_v5 = vcombine.low %v3777_v53, %v4946_v45  ;;  %v958_v6 = vshll.u32 %v4937_v50, 16  ;;  %4355 = vmatpush3.bf16.msra.mxu1 %v4443_v24  ;;  %v4997_v53 = vld [vmem:[%s4715_s5 + $0x34] sm:$0xf] }
  0x51   : > { %v927_v10 = vrot.slane %v925_v61, 4  ;;  %v930_v11 = vrot.slane %v928_v62, 5  ;;  %v964_v14 = vrot.slane %v962_v12, 4  ;;  %v968_v15 = vshll.u32 %v3808_v59, 16 }
  0x52   : > { %2241 = vrot.lane.b32.xlu0 %v3967_v0, %s4625_s8  ;;  %v955_v16 = vor.u32 %v954_v4, %v951_v55  ;;  %v960_v18 = vrot.slane %v958_v6, 5  ;;  %v934_v19 = vshll.u32 %v4946_v45, 16  ;;  %v940_v22 = vrot.slane %v938_v63, 4  ;;  %v5012_v63 = vld [vmem:[%s4715_s5 + $0x38] sm:$0x1] }
  0x53   : > { %2243 = vrot.lane.b32.xlu1 %v3968_v20, %s4625_s8  ;;  %v970_v25 = vrot.slane %v968_v15, 5  ;;  %v931_v26 = vor.u32 %v930_v11, %v927_v10  ;;  %v944_v27 = vshll.u32 %v3807_v57, 16  ;;  %v3840_v28 = vrot.slane %v3824_v8, 9 }
  0x54   : > { %v956_v30 = vrot.slane %v955_v16, 4  ;;  %v965_v31 = vor.u32 %v964_v14, %v960_v18  ;;  %v936_v32 = vrot.slane %v934_v19, 5  ;;  %v1347_v34 = vrot.slane %v4937_v50, 5 }
  0x55   : > { %v932_v35 = vrot.slane %v931_v26, 4  ;;  %v946_v36 = vrot.slane %v944_v27, 5  ;;  %v1350_v37 = vrot.slane %v3808_v59, 5  ;;  %v3839_v38 = vrot.slane %v3823_v23, 9  ;;  %v5026_v26 = vld [vmem:[%s4715_s5 + $0x38] sm:$0x1] }
  0x56   : > { %2337 = vrot.lane.b32.xlu0 %v3983_v5, %s4623_s6  ;;  %v961_v41 = vsel %vm4789_vm5, %v956_v30, %v960_v18  ;;  %v966_v42 = vrot.slane %v965_v31, 4  ;;  %v941_v47 = vor.u32 %v940_v22, %v936_v32  ;;  %v1348_v43 = vsel %vm4739_vm2, %v3840_v28, %v1347_v34  ;;  %v5023_v22 = vld [vmem:[%s4715_s5 + $0x34] sm:$0xf] }
  0x57   : > { %2339 = vrot.lane.b32.xlu1 %v3984_v58, %s4623_s6  ;;  %v937_v44 = vsel %vm4789_vm5, %v932_v35, %v936_v32  ;;  %v1349_v46 = vrot.slane %v1347_v34, 4  ;;  %v1340_v2 = vrot.slane %v4946_v45, 5  ;;  %v1343_v1 = vrot.slane %v3807_v57, 5  ;;  %v5008_v58 = vld [vmem:[%s4715_s5 + $0x44] sm:$0x1] }
  0x58   : > { %v971_v3 = vsel %vm4789_vm5, %v966_v42, %v970_v25  ;;  %v942_v48 = vrot.slane %v941_v47, 4  ;;  %v1558_v7 = vshrl.u32 %v4973_v39, 16  ;;  %v1561_v9 = vshll.u32 %v4973_v39, 16  ;;  %v221_v57 = vld [vmem:[%s4715_s5 + $0x30] sm:$0xf] }
  0x59   : > { %v4000_v50 = vcombine.low %v961_v41, %v971_v3  ;;  %v1351_v13 = vsel %vm4739_vm2, %v1349_v46, %v1350_v37  ;;  %v1341_v40 = vsel %vm4739_vm2, %v3839_v38, %v1340_v2  ;;  %v1342_v51 = vrot.slane %v1340_v2, 4  ;;  %v3903_v34 = vld [vmem:[%s4715_s5 + $0x30] sm:$0xe] }
  0x5a   : > { %v947_v45 = vsel %vm4789_vm5, %v942_v48, %v946_v36  ;;  %v4016_v29 = vcombine.low %v1348_v43, %v1351_v13  ;;  %v1560_v20 = vrot.slane %v1558_v7, 4  ;;  %v1563_v33 = vrot.slane %v1561_v9, 5 }
  0x5b   : > { %2419 = vrot.lane.b32.xlu1 %v4000_v50, %s4627_s23  ;;  %v3999_v54 = vcombine.low %v937_v44, %v947_v45  ;;  %v1344_v55 = vsel %vm4739_vm2, %v1342_v51, %v1343_v1  ;;  %v1571_v56 = vshrl.u32 %v4987_v49, 16  ;;  %v4032_v12 = vcombine.low %v4973_v39, %v4987_v49  ;;  %v223_v1 = vld [vmem:[%s4715_s5 + $0x3c] sm:$0xf]  ;;  %v224_v50 = vld [vmem:[%s4715_s5 + $0x40] sm:$0xf] }
  0x5c   : > { %v4015_v59 = vcombine.low %v1341_v40, %v1344_v55  ;;  %v1534_v60 = vshrl.u32 %v3857_v52, 16  ;;  %v1537_v61 = vshll.u32 %v3857_v52, 16  ;;  %v1547_v62 = vshrl.u32 %v4997_v53, 16  ;;  %v250_v45 = vld [vmem:[%s4715_s5 + $0x44] sm:$0x1] }
  0x5d   : > { %2417 = vrot.lane.b32.xlu0 %v3999_v54, %s4627_s23  ;;  %v4031_v0 = vcombine.low %v3857_v52, %v4997_v53  ;;  %v1564_v4 = vor.u32 %v1563_v33, %v1560_v20  ;;  %v1567_v5 = vshll.u32 %v4987_v49, 16  ;;  %v1573_v6 = vrot.slane %v1571_v56, 4  ;;  %v3904_v55 = vld [vmem:[%s4715_s5 + $0x3c] sm:$0xe] }
  0x5e   : > { %v1536_v8 = vrot.slane %v1534_v60, 4  ;;  %v1539_v10 = vrot.slane %v1537_v61, 5  ;;  %v1577_v11 = vshll.u32 %v5008_v58, 16  ;;  %v1543_v14 = vshll.u32 %v4997_v53, 16 }
  0x5f   : > { %2499 = vrot.lane.b32.xlu1 %v4016_v29, %s4624_s7  ;;  %v1565_v15 = vrot.slane %v1564_v4, 4  ;;  %v1569_v16 = vrot.slane %v1567_v5, 5  ;;  %v1549_v18 = vrot.slane %v1547_v62, 4  ;;  %v1553_v19 = vshll.u32 %v5012_v63, 16 }
  0x60   : > { %v1579_v23 = vrot.slane %v1577_v11, 5  ;;  %v1540_v24 = vor.u32 %v1539_v10, %v1536_v8  ;;  %v1545_v25 = vrot.slane %v1543_v14, 5  ;;  %v361_v27 = vshrl.u32 %v221_v57, 16 }
  0x61   : > { %2497 = vrot.lane.b32.xlu0 %v4015_v59, %s4624_s7  ;;  %v1570_v28 = vsel %vm4789_vm5, %v1565_v15, %v1569_v16  ;;  %v1574_v30 = vor.u32 %v1573_v6, %v1569_v16  ;;  %v1555_v31 = vrot.slane %v1553_v19, 5  ;;  %v364_v32 = vshll.u32 %v221_v57, 16  ;;  %v653_v57 = vld [vmem:[%s4715_s5 + $0x3c] sm:$0xe] }
  0x62   : > { %v1541_v35 = vrot.slane %v1540_v24, 4  ;;  %v1550_v36 = vor.u32 %v1549_v18, %v1545_v25  ;;  %v363_v37 = vrot.slane %v361_v27, 4  ;;  %v370_v38 = vshll.u32 %v5023_v22, 16 }
  0x63   : > { %2595 = vrot.lane.b32.xlu1 %v4032_v12, %s4628_s29  ;;  %v1575_v39 = vrot.slane %v1574_v30, 4  ;;  %v366_v41 = vrot.slane %v364_v32, 5  ;;  %v374_v42 = vshrl.u32 %v5023_v22, 16  ;;  %v380_v47 = vshll.u32 %v5026_v26, 16 }
  0x64   : > { %v1546_v43 = vsel %vm4789_vm5, %v1541_v35, %v1545_v25  ;;  %v1551_v44 = vrot.slane %v1550_v36, 4  ;;  %v372_v46 = vrot.slane %v370_v38, 5  ;;  %v3919_v2 = vrot.slane %v3903_v34, 9 }
  0x65   : > { %2593 = vrot.lane.b32.xlu0 %v4031_v0, %s4628_s29  ;;  %v1580_v3 = vsel %vm4789_vm5, %v1575_v39, %v1579_v23  ;;  %v367_v48 = vor.u32 %v366_v41, %v363_v37  ;;  %v376_v7 = vrot.slane %v374_v42, 4  ;;  %v382_v9 = vrot.slane %v380_v47, 5  ;;  %v652_v23 = vld [vmem:[%s4715_s5 + $0x30] sm:$0xe]  ;;  %v3784_v47 = vld [vmem:[%s4715_s5 + $0x4c] sm:$0xf] }
  0x66   : > { %v4048_v13 = vcombine.low %v1570_v28, %v1580_v3  ;;  %v1556_v40 = vsel %vm4789_vm5, %v1551_v44, %v1555_v31  ;;  %v1949_v51 = vrot.slane %v4997_v53, 5  ;;  %v1952_v52 = vrot.slane %v5012_v63, 5  ;;  %v5086_v3 = vld [vmem:[%s4715_s5 + $0x40] sm:$0xf] }
  0x67   : > { %v4047_v29 = vcombine.low %v1546_v43, %v1556_v40  ;;  %v368_v20 = vrot.slane %v367_v48, 4  ;;  %v377_v33 = vor.u32 %v376_v7, %v372_v46  ;;  %v385_v54 = vshrl.u32 %v223_v1, 16 }
  0x68   : > { %2675 = vrot.lane.b32.xlu1 %v4048_v13, %s4629_s30  ;;  %v1950_v56 = vsel %vm4739_vm2, %v3919_v2, %v1949_v51  ;;  %v1951_v12 = vrot.slane %v1949_v51, 4  ;;  %v388_v59 = vshll.u32 %v223_v1, 16  ;;  %v394_v60 = vshll.u32 %v224_v50, 16  ;;  %v3781_v1 = vld [vmem:[%s4715_s5 + $0x3c] sm:$0xf] }
  0x69   : > { %2673 = vrot.lane.b32.xlu0 %v4047_v29, %s4629_s30  ;;  %v373_v53 = vsel %vm4789_vm5, %v368_v20, %v372_v46  ;;  %v378_v61 = vrot.slane %v377_v33, 4  ;;  %v387_v62 = vrot.slane %v385_v54, 4  ;;  %v398_v63 = vshrl.u32 %v224_v50, 16  ;;  %v3810_v51 = vld [vmem:[%s4715_s5 + $0x50] sm:$0x1] }
  0x6a   : > { %v1953_v0 = vsel %vm4739_vm2, %v1951_v12, %v1952_v52  ;;  %v390_v4 = vrot.slane %v388_v59, 5  ;;  %v396_v5 = vrot.slane %v394_v60, 5  ;;  %v404_v6 = vshll.u32 %v250_v45, 16  ;;  %v3809_v12 = vld [vmem:[%s4715_s5 + $0x44] sm:$0x1] }
  0x6b   : > { %v383_v8 = vsel %vm4789_vm5, %v378_v61, %v382_v9  ;;  %v4063_v10 = vcombine.low %v1950_v56, %v1953_v0  ;;  %v400_v11 = vrot.slane %v398_v63, 4  ;;  %v3920_v14 = vrot.slane %v3904_v55, 9  ;;  %v3826_v59 = vld [vmem:[%s4715_s5 + $0x48] sm:$0xe] }
  0x6c   : > { %v3953_v15 = vcombine.low %v373_v53, %v383_v8  ;;  %v391_v16 = vor.u32 %v390_v4, %v387_v62  ;;  %v406_v18 = vrot.slane %v404_v6, 5  ;;  %v1956_v19 = vrot.slane %v4987_v49, 5  ;;  %v5068_v49 = vld [vmem:[%s4715_s5 + $0x48] sm:$0xf]  ;;  %v3825_v6 = vld [vmem:[%s4715_s5 + $0x3c] sm:$0xe] }
  0x6d   : > { %2753 = vrot.lane.b32.xlu0 %v4063_v10, %s4630_s14  ;;  %v401_v24 = vor.u32 %v400_v11, %v396_v5  ;;  %v1959_v25 = vrot.slane %v5008_v58, 5  ;;  %v3762_v27 = vrot.slane %v653_v57, 9  ;;  %v752_v28 = vrot.slane %v224_v50, 5 }
  0x6e   : > { %2165 = vrot.lane.b32.xlu1 %v3953_v15, %s4626_s13  ;;  %v392_v30 = vrot.slane %v391_v16, 4  ;;  %v1957_v31 = vsel %vm4739_vm2, %v3920_v14, %v1956_v19  ;;  %v1958_v32 = vrot.slane %v1956_v19, 4  ;;  %v755_v34 = vrot.slane %v250_v45, 5 }
  0x6f   : > { %v402_v35 = vrot.slane %v401_v24, 4  ;;  %v753_v36 = vsel %vm4739_vm2, %v3762_v27, %v752_v28  ;;  %v754_v58 = vrot.slane %v752_v28, 4  ;;  %v3761_v37 = vrot.slane %v652_v23, 9  ;;  %v5106_v27 = vld [vmem:[%s4715_s5 + $0x54] sm:$0xf] }
  0x70   : > { %v397_v38 = vsel %vm4789_vm5, %v392_v30, %v396_v5  ;;  %v1960_v39 = vsel %vm4739_vm2, %v1958_v32, %v1959_v25  ;;  %v745_v41 = vrot.slane %v5023_v22, 5  ;;  %v748_v42 = vrot.slane %v5026_v26, 5 }
  0x71   : > { %v407_v43 = vsel %vm4789_vm5, %v402_v35, %v406_v18  ;;  %v4064_v44 = vcombine.low %v1957_v31, %v1960_v39  ;;  %v756_v46 = vsel %vm4739_vm2, %v754_v58, %v755_v34  ;;  %v997_v2 = vshrl.u32 %v5068_v49, 16 }
  0x72   : > { %v3954_v48 = vcombine.low %v397_v38, %v407_v43  ;;  %v3970_v7 = vcombine.low %v753_v36, %v756_v46  ;;  %v746_v22 = vsel %vm4739_vm2, %v3761_v37, %v745_v41  ;;  %v747_v26 = vrot.slane %v745_v41, 4  ;;  %v5120_v38 = vld [vmem:[%s4715_s5 + $0x58] sm:$0xf]  ;;  %v3861_v46 = vld [vmem:[%s4715_s5 + $0x48] sm:$0xf] }
  0x73   : > { %2755 = vrot.lane.b32.xlu0 %v4064_v44, %s4630_s14  ;;  %v999_v9 = vrot.slane %v997_v2, 4  ;;  %v1000_v50 = vshll.u32 %v5068_v49, 16  ;;  %v1010_v13 = vshrl.u32 %v3784_v47, 16  ;;  %v3986_v40 = vcombine.low %v5068_v49, %v3784_v47  ;;  %v5130_v2 = vld [vmem:[%s4715_s5 + $0x4c] sm:$0xf] }
  0x74   : > { %2167 = vrot.lane.b32.xlu1 %v3954_v48, %s4626_s13  ;;  %v749_v52 = vsel %vm4739_vm2, %v747_v26, %v748_v42  ;;  %v973_v45 = vshrl.u32 %v3781_v1, 16  ;;  %v976_v29 = vshll.u32 %v3781_v1, 16  ;;  %v986_v20 = vshrl.u32 %v5086_v3, 16 }
  0x75   : > { %v3969_v33 = vcombine.low %v746_v22, %v749_v52  ;;  %v1002_v54 = vrot.slane %v1000_v50, 5  ;;  %v3985_v55 = vcombine.low %v3781_v1, %v5086_v3  ;;  %v1006_v56 = vshll.u32 %v3784_v47, 16 }
  0x76   : > { %v975_v60 = vrot.slane %v973_v45, 4  ;;  %v978_v53 = vrot.slane %v976_v29, 5  ;;  %v1012_v61 = vrot.slane %v1010_v13, 4  ;;  %v1016_v62 = vshll.u32 %v3810_v51, 16  ;;  %v5141_v13 = vld [vmem:[%s4715_s5 + $0x5c] sm:$0x1] }
  0x77   : > { %2245 = vrot.lane.b32.xlu0 %v3969_v33, %s4625_s8  ;;  %v1003_v63 = vor.u32 %v1002_v54, %v999_v9  ;;  %v1008_v0 = vrot.slane %v1006_v56, 5  ;;  %v982_v4 = vshll.u32 %v5086_v3, 16  ;;  %v988_v5 = vrot.slane %v986_v20, 4  ;;  %v5145_v29 = vld [vmem:[%s4715_s5 + $0x50] sm:$0x1] }
  0x78   : > { %2247 = vrot.lane.b32.xlu1 %v3970_v7, %s4625_s8  ;;  %v1018_v57 = vrot.slane %v1016_v62, 5  ;;  %v979_v8 = vor.u32 %v978_v53, %v975_v60  ;;  %v992_v10 = vshll.u32 %v3809_v12, 16  ;;  %v3842_v11 = vrot.slane %v3826_v59, 9  ;;  %v225_v56 = vld [vmem:[%s4715_s5 + $0x48] sm:$0xf] }
  0x79   : > { %v1004_v14 = vrot.slane %v1003_v63, 4  ;;  %v1013_v15 = vor.u32 %v1012_v61, %v1008_v0  ;;  %v984_v16 = vrot.slane %v982_v4, 5  ;;  %v1361_v18 = vrot.slane %v3784_v47, 5  ;;  %v5156_v4 = vld [vmem:[%s4715_s5 + $0x4c] sm:$0xf] }
  0x7a   : > { %v980_v19 = vrot.slane %v979_v8, 4  ;;  %v994_v23 = vrot.slane %v992_v10, 5  ;;  %v1364_v24 = vrot.slane %v3810_v51, 5  ;;  %v3841_v25 = vrot.slane %v3825_v6, 9  ;;  %v5159_v8 = vld [vmem:[%s4715_s5 + $0x50] sm:$0x1] }
  0x7b   : > { %2341 = vrot.lane.b32.xlu0 %v3985_v55, %s4623_s6  ;;  %v1009_v28 = vsel %vm4789_vm5, %v1004_v14, %v1008_v0  ;;  %v1014_v30 = vrot.slane %v1013_v15, 4  ;;  %v989_v31 = vor.u32 %v988_v5, %v984_v16  ;;  %v1362_v32 = vsel %vm4739_vm2, %v3842_v11, %v1361_v18 }
  0x7c   : > { %2343 = vrot.lane.b32.xlu1 %v3986_v40, %s4623_s6  ;;  %v985_v34 = vsel %vm4789_vm5, %v980_v19, %v984_v16  ;;  %v1363_v49 = vrot.slane %v1361_v18, 4  ;;  %v1354_v35 = vrot.slane %v5086_v3, 5  ;;  %v1357_v36 = vrot.slane %v3809_v12, 5  ;;  %v3905_v18 = vld [vmem:[%s4715_s5 + $0x48] sm:$0xe] }
  0x7d   : > { %v1019_v58 = vsel %vm4789_vm5, %v1014_v30, %v1018_v57  ;;  %v990_v37 = vrot.slane %v989_v31, 4  ;;  %v1606_v39 = vshrl.u32 %v5106_v27, 16  ;;  %v1609_v41 = vshll.u32 %v5106_v27, 16 }
  0x7e   : > { %v4002_v42 = vcombine.low %v1009_v28, %v1019_v58  ;;  %v1365_v47 = vsel %vm4739_vm2, %v1363_v49, %v1364_v24  ;;  %v1355_v43 = vsel %vm4739_vm2, %v3841_v25, %v1354_v35  ;;  %v1356_v44 = vrot.slane %v1354_v35, 4 }
  0x7f   : > { %v995_v1 = vsel %vm4789_vm5, %v990_v37, %v994_v23  ;;  %v4018_v3 = vcombine.low %v1362_v32, %v1365_v47  ;;  %v1608_v48 = vrot.slane %v1606_v39, 4  ;;  %v1611_v7 = vrot.slane %v1609_v41, 5 }
  0x80   : > { %2423 = vrot.lane.b32.xlu1 %v4002_v42, %s4627_s23  ;;  %v4001_v22 = vcombine.low %v985_v34, %v995_v1  ;;  %v1358_v26 = vsel %vm4739_vm2, %v1356_v44, %v1357_v36  ;;  %v1619_v9 = vshrl.u32 %v5120_v38, 16  ;;  %v4034_v50 = vcombine.low %v5106_v27, %v5120_v38  ;;  %v227_v36 = vld [vmem:[%s4715_s5 + $0x54] sm:$0xf]  ;;  %v228_v42 = vld [vmem:[%s4715_s5 + $0x58] sm:$0xf] }
  0x81   : > { %v4017_v40 = vcombine.low %v1355_v43, %v1358_v26  ;;  %v1582_v51 = vshrl.u32 %v3861_v46, 16  ;;  %v1585_v52 = vshll.u32 %v3861_v46, 16  ;;  %v1595_v45 = vshrl.u32 %v5130_v2, 16 }
  0x82   : > { %2421 = vrot.lane.b32.xlu0 %v4001_v22, %s4627_s23  ;;  %v4033_v20 = vcombine.low %v3861_v46, %v5130_v2  ;;  %v1612_v33 = vor.u32 %v1611_v7, %v1608_v48  ;;  %v1615_v54 = vshll.u32 %v5120_v38, 16  ;;  %v1621_v55 = vrot.slane %v1619_v9, 4  ;;  %v252_v7 = vld [vmem:[%s4715_s5 + $0x5c] sm:$0x1] }
  0x83   : > { %v1584_v12 = vrot.slane %v1582_v51, 4  ;;  %v1587_v59 = vrot.slane %v1585_v52, 5  ;;  %v1625_v60 = vshll.u32 %v5141_v13, 16  ;;  %v1591_v53 = vshll.u32 %v5130_v2, 16  ;;  %v3906_v51 = vld [vmem:[%s4715_s5 + $0x54] sm:$0xe] }
  0x84   : > { %2503 = vrot.lane.b32.xlu1 %v4018_v3, %s4624_s7  ;;  %v1613_v61 = vrot.slane %v1612_v33, 4  ;;  %v1617_v62 = vrot.slane %v1615_v54, 5  ;;  %v1597_v63 = vrot.slane %v1595_v45, 4  ;;  %v1601_v0 = vshll.u32 %v5145_v29, 16 }
  0x85   : > { %v1627_v5 = vrot.slane %v1625_v60, 5  ;;  %v1588_v6 = vor.u32 %v1587_v59, %v1584_v12  ;;  %v1593_v57 = vrot.slane %v1591_v53, 5  ;;  %v409_v10 = vshrl.u32 %v225_v56, 16 }
  0x86   : > { %2501 = vrot.lane.b32.xlu0 %v4017_v40, %s4624_s7  ;;  %v1618_v11 = vsel %vm4789_vm5, %v1613_v61, %v1617_v62  ;;  %v1622_v14 = vor.u32 %v1621_v55, %v1617_v62  ;;  %v1603_v15 = vrot.slane %v1601_v0, 5  ;;  %v412_v16 = vshll.u32 %v225_v56, 16  ;;  %v655_v56 = vld [vmem:[%s4715_s5 + $0x54] sm:$0xe] }
  0x87   : > { %v1589_v19 = vrot.slane %v1588_v6, 4  ;;  %v1598_v23 = vor.u32 %v1597_v63, %v1593_v57  ;;  %v411_v24 = vrot.slane %v409_v10, 4  ;;  %v418_v25 = vshll.u32 %v5156_v4, 16 }
  0x88   : > { %2599 = vrot.lane.b32.xlu1 %v4034_v50, %s4628_s29  ;;  %v1623_v27 = vrot.slane %v1622_v14, 4  ;;  %v414_v28 = vrot.slane %v412_v16, 5  ;;  %v422_v30 = vshrl.u32 %v5156_v4, 16  ;;  %v428_v31 = vshll.u32 %v5159_v8, 16 }
  0x89   : > { %v1594_v32 = vsel %vm4789_vm5, %v1589_v19, %v1593_v57  ;;  %v1599_v34 = vrot.slane %v1598_v23, 4  ;;  %v420_v49 = vrot.slane %v418_v25, 5  ;;  %v3921_v35 = vrot.slane %v3905_v18, 9  ;;  %v5201_v19 = vld [vmem:[%s4715_s5 + $0x60] sm:$0xf] }
  0x8a   : > { %2597 = vrot.lane.b32.xlu0 %v4033_v20, %s4628_s29  ;;  %v1628_v58 = vsel %vm4789_vm5, %v1623_v27, %v1627_v5  ;;  %v415_v37 = vor.u32 %v414_v28, %v411_v24  ;;  %v424_v39 = vrot.slane %v422_v30, 4  ;;  %v430_v41 = vrot.slane %v428_v31, 5  ;;  %v654_v5 = vld [vmem:[%s4715_s5 + $0x48] sm:$0xe] }
  0x8b   : > { %v4050_v47 = vcombine.low %v1618_v11, %v1628_v58  ;;  %v1604_v43 = vsel %vm4789_vm5, %v1599_v34, %v1603_v15  ;;  %v1963_v44 = vrot.slane %v5130_v2, 5  ;;  %v1966_v46 = vrot.slane %v5145_v29, 5  ;;  %v3785_v58 = vld [vmem:[%s4715_s5 + $0x54] sm:$0xf] }
  0x8c   : > { %v4049_v1 = vcombine.low %v1594_v32, %v1604_v43  ;;  %v416_v3 = vrot.slane %v415_v37, 4  ;;  %v425_v48 = vor.u32 %v424_v39, %v420_v49  ;;  %v433_v22 = vshrl.u32 %v227_v36, 16  ;;  %v5214_v32 = vld [vmem:[%s4715_s5 + $0x64] sm:$0xf]  ;;  %v5223_v37 = vld [vmem:[%s4715_s5 + $0x58] sm:$0xf] }
  0x8d   : > { %2679 = vrot.lane.b32.xlu1 %v4050_v47, %s4629_s30  ;;  %v1964_v26 = vsel %vm4739_vm2, %v3921_v35, %v1963_v44  ;;  %v1965_v9 = vrot.slane %v1963_v44, 4  ;;  %v436_v50 = vshll.u32 %v227_v36, 16  ;;  %v442_v40 = vshll.u32 %v228_v42, 16 }
  0x8e   : > { %2677 = vrot.lane.b32.xlu0 %v4049_v1, %s4629_s30  ;;  %v421_v2 = vsel %vm4789_vm5, %v416_v3, %v420_v49  ;;  %v426_v52 = vrot.slane %v425_v48, 4  ;;  %v435_v45 = vrot.slane %v433_v22, 4  ;;  %v446_v29 = vshrl.u32 %v228_v42, 16 }
  0x8f   : > { %v1967_v20 = vsel %vm4739_vm2, %v1965_v9, %v1966_v46  ;;  %v438_v33 = vrot.slane %v436_v50, 5  ;;  %v444_v54 = vrot.slane %v442_v40, 5  ;;  %v452_v55 = vshll.u32 %v252_v7, 16  ;;  %v3812_v46 = vld [vmem:[%s4715_s5 + $0x68] sm:$0x1] }
  0x90   : > { %v431_v12 = vsel %vm4789_vm5, %v426_v52, %v430_v41  ;;  %v4065_v59 = vcombine.low %v1964_v26, %v1967_v20  ;;  %v448_v60 = vrot.slane %v446_v29, 4  ;;  %v3922_v53 = vrot.slane %v3906_v51, 9  ;;  %v3811_v51 = vld [vmem:[%s4715_s5 + $0x5c] sm:$0x1] }
  0x91   : > { %v3955_v61 = vcombine.low %v421_v2, %v431_v12  ;;  %v439_v62 = vor.u32 %v438_v33, %v435_v45  ;;  %v454_v63 = vrot.slane %v452_v55, 5  ;;  %v1970_v0 = vrot.slane %v5120_v38, 5  ;;  %v5205_v25 = vpop.permute.xlu1 %2335  ;;  %v3828_v2 = vld [vmem:[%s4715_s5 + $0x60] sm:$0xe] }
  0x92   : > { %2757 = vrot.lane.b32.xlu0 %v4065_v59, %s4630_s14  ;;  %v449_v6 = vor.u32 %v448_v60, %v444_v54  ;;  %v1973_v57 = vrot.slane %v5141_v13, 5  ;;  %v3764_v10 = vrot.slane %v655_v56, 9  ;;  %v766_v11 = vrot.slane %v228_v42, 5  ;;  %v5237_v22 = vpop.permute.xlu0 %2333  ;;  %v3827_v59 = vld [vmem:[%s4715_s5 + $0x54] sm:$0xe] }
  0x93   : > { %2169 = vrot.lane.b32.xlu1 %v3955_v61, %s4626_s13  ;;  %v440_v14 = vrot.slane %v439_v62, 4  ;;  %v1971_v15 = vsel %vm4739_vm2, %v3922_v53, %v1970_v0  ;;  %v1972_v16 = vrot.slane %v1970_v0, 4  ;;  %v769_v18 = vrot.slane %v252_v7, 5 }
  0x94   : > { %v450_v38 = vrot.slane %v449_v6, 4  ;;  %v767_v23 = vsel %vm4739_vm2, %v3764_v10, %v766_v11  ;;  %v768_v13 = vrot.slane %v766_v11, 4  ;;  %v3763_v24 = vrot.slane %v654_v5, 9 }
  0x95   : > { %v445_v27 = vsel %vm4789_vm5, %v440_v14, %v444_v54  ;;  %v1974_v28 = vsel %vm4739_vm2, %v1972_v16, %v1973_v57  ;;  %v759_v30 = vrot.slane %v5156_v4, 5  ;;  %v762_v31 = vrot.slane %v5159_v8, 5  ;;  %v5253_v16 = vld [vmem:[%s4715_s5 + $0x6c] sm:$0xf] }
  0x96   : > { %v455_v34 = vsel %vm4789_vm5, %v450_v38, %v454_v63  ;;  %v4066_v49 = vcombine.low %v1971_v15, %v1974_v28  ;;  %v770_v35 = vsel %vm4739_vm2, %v768_v13, %v769_v18  ;;  %v1045_v36 = vshrl.u32 %v5201_v19, 16 }
  0x97   : > { %v3956_v39 = vcombine.low %v445_v27, %v455_v34  ;;  %v3972_v41 = vcombine.low %v767_v23, %v770_v35  ;;  %v760_v4 = vsel %vm4739_vm2, %v3763_v24, %v759_v30  ;;  %v761_v8 = vrot.slane %v759_v30, 4  ;;  %v5269_v34 = vld [vmem:[%s4715_s5 + $0x70] sm:$0xf] }
  0x98   : > { %2759 = vrot.lane.b32.xlu0 %v4066_v49, %s4630_s14  ;;  %v1047_v42 = vrot.slane %v1045_v36, 4  ;;  %v1048_v47 = vshll.u32 %v5201_v19, 16  ;;  %v1058_v43 = vshrl.u32 %v5214_v32, 16  ;;  %v3988_v44 = vcombine.low %v5201_v19, %v5214_v32 }
  0x99   : > { %2171 = vrot.lane.b32.xlu1 %v3956_v39, %s4626_s13  ;;  %v763_v1 = vsel %vm4739_vm2, %v761_v8, %v762_v31  ;;  %v1021_v3 = vshrl.u32 %v3785_v58, 16  ;;  %v1024_v48 = vshll.u32 %v3785_v58, 16  ;;  %v1034_v7 = vshrl.u32 %v5223_v37, 16  ;;  %v5255_v18 = vpop.permute.xlu0 %2493 }
  0x9a   : > { %v3971_v26 = vcombine.low %v760_v4, %v763_v1  ;;  %v1050_v9 = vrot.slane %v1048_v47, 5  ;;  %v3987_v50 = vcombine.low %v3785_v58, %v5223_v37  ;;  %v1054_v40 = vshll.u32 %v5214_v32, 16  ;;  %v5243_v52 = vpop.permute.xlu1 %2237  ;;  %v5281_v4 = vld [vmem:[%s4715_s5 + $0x64] sm:$0xf] }
  0x9b   : > { %v1023_v45 = vrot.slane %v1021_v3, 4  ;;  %v1026_v29 = vrot.slane %v1024_v48, 5  ;;  %v1060_v20 = vrot.slane %v1058_v43, 4  ;;  %v1064_v33 = vshll.u32 %v3812_v46, 16 }
  0x9c   : > { %2249 = vrot.lane.b32.xlu0 %v3971_v26, %s4625_s8  ;;  %v1051_v54 = vor.u32 %v1050_v9, %v1047_v42  ;;  %v1056_v55 = vrot.slane %v1054_v40, 5  ;;  %v1030_v56 = vshll.u32 %v5223_v37, 16  ;;  %v1036_v12 = vrot.slane %v1034_v7, 4  ;;  %v5294_v7 = vld [vmem:[%s4715_s5 + $0x74] sm:$0x1] }
  0x9d   : > { %2251 = vrot.lane.b32.xlu1 %v3972_v41, %s4625_s8  ;;  %v1066_v60 = vrot.slane %v1064_v33, 5  ;;  %v1027_v53 = vor.u32 %v1026_v29, %v1023_v45  ;;  %v1040_v61 = vshll.u32 %v3811_v51, 16  ;;  %v3844_v62 = vrot.slane %v3828_v2, 9  ;;  %v5278_v41 = vld [vmem:[%s4715_s5 + $0x60] sm:$0xf] }
  0x9e   : > { %v1052_v63 = vrot.slane %v1051_v54, 4  ;;  %v1061_v0 = vor.u32 %v1060_v20, %v1056_v55  ;;  %v1032_v5 = vrot.slane %v1030_v56, 5  ;;  %v1375_v6 = vrot.slane %v5214_v32, 5  ;;  %v5250_v57 = vpop.permute.xlu1 %2239  ;;  %v5300_v2 = vld [vmem:[%s4715_s5 + $0x68] sm:$0x1] }
  0x9f   : > { %v1028_v10 = vrot.slane %v1027_v53, 4  ;;  %v1042_v11 = vrot.slane %v1040_v61, 5  ;;  %v1378_v14 = vrot.slane %v3812_v46, 5  ;;  %v3843_v15 = vrot.slane %v3827_v59, 9 }
  0xa0   : > { %2345 = vrot.lane.b32.xlu0 %v3987_v50, %s4623_s6  ;;  %v1057_v19 = vsel %vm4789_vm5, %v1052_v63, %v1056_v55  ;;  %v1062_v38 = vrot.slane %v1061_v0, 4  ;;  %v1037_v23 = vor.u32 %v1036_v12, %v1032_v5  ;;  %v1376_v13 = vsel %vm4739_vm2, %v3844_v62, %v1375_v6 }
  0xa1   : > { %2347 = vrot.lane.b32.xlu1 %v3988_v44, %s4623_s6  ;;  %v1033_v24 = vsel %vm4789_vm5, %v1028_v10, %v1032_v5  ;;  %v1377_v27 = vrot.slane %v1375_v6, 4  ;;  %v1368_v28 = vrot.slane %v5223_v37, 5  ;;  %v1371_v30 = vrot.slane %v3811_v51, 5  ;;  %v4471_v6 = vld [vmem:[%s4715_s5 + $0x4] sm:$0xf] }
  0xa2   : > { %v1067_v31 = vsel %vm4789_vm5, %v1062_v38, %v1066_v60  ;;  %v1038_v32 = vrot.slane %v1037_v23, 4  ;;  %v1654_v49 = vshrl.u32 %v5253_v16, 16  ;;  %v1657_v35 = vshll.u32 %v5253_v16, 16  ;;  %v5285_v44 = vpop.permute.xlu1 %2495  ;;  %v4472_v10 = vld [vmem:[%s4715_s5] sm:$0xf] }
  0xa3   : > { %v4004_v36 = vcombine.low %v1057_v19, %v1067_v31  ;;  %v1379_v58 = vsel %vm4739_vm2, %v1377_v27, %v1378_v14  ;;  %v1369_v39 = vsel %vm4739_vm2, %v3843_v15, %v1368_v28  ;;  %v1370_v37 = vrot.slane %v1368_v28, 4  ;;  %v229_v14 = vld [vmem:[%s4715_s5 + $0x60] sm:$0xf]  ;;  %v5321_v23 = vld [vmem:[%s4715_s5 + $0x64] sm:$0xf] }
  0xa4   : > { %v1043_v8 = vsel %vm4789_vm5, %v1038_v32, %v1042_v11  ;;  %v4020_v42 = vcombine.low %v1376_v13, %v1379_v58  ;;  %v1656_v47 = vrot.slane %v1654_v49, 4  ;;  %v1659_v43 = vrot.slane %v1657_v35, 5  ;;  %v5325_v28 = vld [vmem:[%s4715_s5 + $0x68] sm:$0x1] }
  0xa5   : > { %2427 = vrot.lane.b32.xlu1 %v4004_v36, %s4627_s23  ;;  %v4003_v46 = vcombine.low %v1033_v24, %v1043_v8  ;;  %v1372_v1 = vsel %vm4739_vm2, %v1370_v37, %v1371_v30  ;;  %v1667_v3 = vshrl.u32 %v5269_v34, 16  ;;  %v4036_v48 = vcombine.low %v5253_v16, %v5269_v34  ;;  %v2158_v26 = vpop.permute.xlu0 %2157 }
  0xa6   : > { %v4019_v9 = vcombine.low %v1369_v39, %v1372_v1  ;;  %v1630_v50 = vshrl.u32 %v5278_v41, 16  ;;  %v1633_v40 = vshll.u32 %v5278_v41, 16  ;;  %v1643_v51 = vshrl.u32 %v5281_v4, 16 }
  0xa7   : > { %2425 = vrot.lane.b32.xlu0 %v4003_v46, %s4627_s23  ;;  %v4035_v45 = vcombine.low %v5278_v41, %v5281_v4  ;;  %v1660_v29 = vor.u32 %v1659_v43, %v1656_v47  ;;  %v1663_v20 = vshll.u32 %v5269_v34, 16  ;;  %v1669_v33 = vrot.slane %v1667_v3, 4  ;;  %v3907_v41 = vld [vmem:[%s4715_s5 + $0x60] sm:$0xe] }
  0xa8   : > { %v1632_v54 = vrot.slane %v1630_v50, 4  ;;  %v1635_v55 = vrot.slane %v1633_v40, 5  ;;  %v1673_v56 = vshll.u32 %v5294_v7, 16  ;;  %v1639_v12 = vshll.u32 %v5281_v4, 16 }
  0xa9   : > { %2507 = vrot.lane.b32.xlu1 %v4020_v42, %s4624_s7  ;;  %v1661_v59 = vrot.slane %v1660_v29, 4  ;;  %v1665_v60 = vrot.slane %v1663_v20, 5  ;;  %v1645_v53 = vrot.slane %v1643_v51, 4  ;;  %v1649_v61 = vshll.u32 %v5300_v2, 16  ;;  %v5310_v62 = vpop.permute.xlu0 %2159 }
  0xaa   : > { %v1675_v63 = vrot.slane %v1673_v56, 5  ;;  %v1636_v0 = vor.u32 %v1635_v55, %v1632_v54  ;;  %v1641_v5 = vrot.slane %v1639_v12, 5  ;;  %v3933_v11 = vcombine.low %v4472_v10, %v4471_v6  ;;  %v5315_v15 = vpop.permute.xlu1 %2415  ;;  %v4473_v55 = vld [vmem:[%s4715_s5 + $0x10] sm:$0xf]  ;;  %v4474_v56 = vld [vmem:[%s4715_s5 + $0xc] sm:$0xf] }
  0xab   : > { %2505 = vrot.lane.b32.xlu0 %v4019_v9, %s4624_s7  ;;  %v1666_v16 = vsel %vm4789_vm5, %v1661_v59, %v1665_v60  ;;  %v1670_v19 = vor.u32 %v1669_v33, %v1665_v60  ;;  %v1651_v38 = vrot.slane %v1649_v61, 5  ;;  %v457_v32 = vshrl.u32 %v229_v14, 16  ;;  %v5349_v9 = vld [vmem:[%s4715_s5 + $0x70] sm:$0xf] }
  0xac   : > { %v1637_v13 = vrot.slane %v1636_v0, 4  ;;  %v1646_v24 = vor.u32 %v1645_v53, %v1641_v5  ;;  %v2784_v27 = vsel %vm2781_vm6, %v3933_v11, %v2158_v26  ;;  %v460_v49 = vshll.u32 %v229_v14, 16  ;;  %v231_v26 = vld [vmem:[%s4715_s5 + $0x6c] sm:$0xf] }
  0xad   : > { %2603 = vrot.lane.b32.xlu1 %v4036_v48, %s4628_s29  ;;  %v1671_v30 = vrot.slane %v1670_v19, 4  ;;  %v5330_v31 = vsel %vm2830_vm7, %v2784_v27, %v5243_v52  ;;  %v5332_v35 = vpop.permute.xlu0 %2413  ;;  %v466_v39 = vshll.u32 %v5321_v23, 16  ;;  %v470_v37 = vshrl.u32 %v5321_v23, 16 }
  0xae   : > { %v1642_v36 = vsel %vm4789_vm5, %v1637_v13, %v1641_v5  ;;  %v1647_v58 = vrot.slane %v1646_v24, 4  ;;  %v459_v8 = vrot.slane %v457_v32, 4  ;;  %v462_v42 = vrot.slane %v460_v49, 5  ;;  %v5343_v43 = vpop.permute.xlu1 %2591 }
  0xaf   : > { %2601 = vrot.lane.b32.xlu0 %v4035_v45, %s4628_s29  ;;  %v1676_v52 = vsel %vm4789_vm5, %v1671_v30, %v1675_v63  ;;  %v476_v47 = vshll.u32 %v5325_v28, 16  ;;  %v468_v3 = vrot.slane %v466_v39, 5  ;;  %v472_v48 = vrot.slane %v470_v37, 4 }
  0xb0   : > { %v4052_v46 = vcombine.low %v1666_v16, %v1676_v52  ;;  %v1652_v1 = vsel %vm4789_vm5, %v1647_v58, %v1651_v38  ;;  %v463_v40 = vor.u32 %v462_v42, %v459_v8  ;;  %v3923_v45 = vrot.slane %v3907_v41, 9  ;;  %v3908_v16 = vld [vmem:[%s4715_s5 + $0x6c] sm:$0xe] }
  0xb1   : > { %v4051_v50 = vcombine.low %v1642_v36, %v1652_v1  ;;  %v478_v51 = vrot.slane %v476_v47, 5  ;;  %v5351_v29 = vpop.permute.xlu0 %2589  ;;  %v473_v20 = vor.u32 %v472_v48, %v468_v3  ;;  %v1977_v33 = vrot.slane %v5281_v4, 5  ;;  %v657_v41 = vld [vmem:[%s4715_s5 + $0x6c] sm:$0xe] }
  0xb2   : > { %2683 = vrot.lane.b32.xlu1 %v4052_v46, %s4629_s30  ;;  %v1980_v54 = vrot.slane %v5300_v2, 5  ;;  %v3934_v12 = vcombine.low %v4474_v56, %v4473_v55  ;;  %v464_v59 = vrot.slane %v463_v40, 4  ;;  %v481_v60 = vshrl.u32 %v231_v26, 16  ;;  %v254_v2 = vld [vmem:[%s4715_s5 + $0x74] sm:$0x1] }
  0xb3   : > { %2681 = vrot.lane.b32.xlu0 %v4051_v50, %s4629_s30  ;;  %v484_v53 = vshll.u32 %v231_v26, 16  ;;  %v490_v61 = vshll.u32 %v5349_v9, 16  ;;  %v474_v63 = vrot.slane %v473_v20, 4  ;;  %v1978_v0 = vsel %vm4739_vm2, %v3923_v45, %v1977_v33 }
  0xb4   : > { %v1979_v5 = vrot.slane %v1977_v33, 4  ;;  %v2787_v4 = vsel %vm2781_vm6, %v3934_v12, %v5310_v62  ;;  %v469_v6 = vsel %vm4789_vm5, %v464_v59, %v468_v3  ;;  %v483_v11 = vrot.slane %v481_v60, 4  ;;  %v3791_v60 = vld [vmem:[%s4715_s5 + $0x78] sm:$0xf] }
  0xb5   : > { %v2834_v10 = vsel %vm2830_vm7, %v2787_v4, %v5250_v57  ;;  %v486_v14 = vrot.slane %v484_v53, 5  ;;  %v5370_v19 = vpop.permute.xlu1 %2671  ;;  %v479_v38 = vsel %vm4789_vm5, %v474_v63, %v478_v51  ;;  %v492_v62 = vrot.slane %v490_v61, 5  ;;  %v3789_v63 = vld [vmem:[%s4715_s5 + $0x6c] sm:$0xf] }
  0xb6   : > { %v1981_v13 = vsel %vm4739_vm2, %v1979_v5, %v1980_v54  ;;  %v494_v24 = vshrl.u32 %v5349_v9, 16  ;;  %v5377_v27 = vpop.permute.xlu0 %2669  ;;  %v3957_v30 = vcombine.low %v469_v6, %v479_v38  ;;  %v500_v49 = vshll.u32 %v254_v2, 16 }
  0xb7   : > { %v4067_v32 = vcombine.low %v1978_v0, %v1981_v13  ;;  %v487_v57 = vor.u32 %v486_v14, %v483_v11  ;;  %v3924_v58 = vrot.slane %v3908_v16, 9  ;;  %v1984_v39 = vrot.slane %v5269_v34, 5  ;;  %v656_v34 = vld [vmem:[%s4715_s5 + $0x60] sm:$0xe] }
  0xb8   : > { %v496_v36 = vrot.slane %v494_v24, 4  ;;  %v1987_v37 = vrot.slane %v5294_v7, 5  ;;  %2173 = vrot.lane.b32.xlu1 %v3957_v30, %s4626_s13  ;;  %v502_v8 = vrot.slane %v500_v49, 5  ;;  %v2867_v1 = vsel %vm2863_vm8, %v2834_v10, %v5205_v25  ;;  %v3814_v30 = vld [vmem:[%s4715_s5 + $0x80] sm:$0x1] }
  0xb9   : > { %2761 = vrot.lane.b32.xlu0 %v4067_v32, %s4630_s14  ;;  %v488_v52 = vrot.slane %v487_v57, 4  ;;  %v1985_v47 = vsel %vm4739_vm2, %v3924_v58, %v1984_v39  ;;  %v1986_v46 = vrot.slane %v1984_v39, 4  ;;  %v2900_v48 = vsel %vm2896_vm9, %v2867_v1, %v5315_v15  ;;  %v5445_v57 = vld [vmem:[%s4715_s5 + $0x74] sm:$0x1] }
  0xba   : > { %v497_v42 = vor.u32 %v496_v36, %v492_v62  ;;  %v5389_v3 = vpop.permute.xlu0 %2749  ;;  %v2865_v26 = vsel %vm2863_vm8, %v5330_v31, %v5237_v22  ;;  %v3766_v50 = vrot.slane %v657_v41, 9  ;;  %v780_v20 = vrot.slane %v5349_v9, 5 }
  0xbb   : > { %v493_v7 = vsel %vm4789_vm5, %v488_v52, %v492_v62  ;;  %v5398_v40 = vpop.permute.xlu1 %2161  ;;  %v1988_v25 = vsel %vm4739_vm2, %v1986_v46, %v1987_v37  ;;  %v2898_v45 = vsel %vm2896_vm9, %v2865_v26, %v5332_v35  ;;  %v783_v15 = vrot.slane %v254_v2, 5 }
  0xbc   : > { %v498_v51 = vrot.slane %v497_v42, 4  ;;  %v4068_v33 = vcombine.low %v1985_v47, %v1988_v25  ;;  %v3765_v54 = vrot.slane %v656_v34, 9  ;;  %v773_v22 = vrot.slane %v5321_v23, 5  ;;  %v5416_v23 = vld [vmem:[%s4715_s5 + $0x7c] sm:$0xf] }
  0xbd   : > { %v781_v55 = vsel %vm4739_vm2, %v3766_v50, %v780_v20  ;;  %v782_v56 = vrot.slane %v780_v20, 4  ;;  %v776_v12 = vrot.slane %v5325_v28, 5  ;;  %v2933_v61 = vsel %vm2929_vm10, %v2900_v48, %v5285_v44  ;;  %v5424_v28 = vld [vmem:[%s4715_s5 + $0x70] sm:$0xf]  ;;  %v4475_v50 = vld [vmem:[%s4715_s5 + $0x18] sm:$0xf] }
  0xbe   : > { %v503_v31 = vsel %vm4789_vm5, %v498_v51, %v502_v8  ;;  %2763 = vrot.lane.b32.xlu0 %v4068_v33, %s4630_s14  ;;  %v774_v9 = vsel %vm4739_vm2, %v3765_v54, %v773_v22  ;;  %v775_v59 = vrot.slane %v773_v22, 4  ;;  %v2966_v2 = vsel %vm2962_vm11, %v2933_v61, %v5343_v43  ;;  %v4476_v51 = vld [vmem:[%s4715_s5 + $0x1c] sm:$0xf] }
  0xbf   : > { %v3958_v35 = vcombine.low %v493_v7, %v503_v31  ;;  %v784_v53 = vsel %vm4739_vm2, %v782_v56, %v783_v15  ;;  %v2931_v6 = vsel %vm2929_vm10, %v2898_v45, %v5255_v18  ;;  %v1093_v11 = vshrl.u32 %v3791_v60, 16  ;;  %v3830_v7 = vld [vmem:[%s4715_s5 + $0x78] sm:$0xe]  ;;  %v3829_v45 = vld [vmem:[%s4715_s5 + $0x6c] sm:$0xe] }
  0xc0   : > { %v5426_v0 = vpop.permute.xlu0 %2751  ;;  %v3974_v5 = vcombine.low %v781_v55, %v784_v53  ;;  %v777_v4 = vsel %vm4739_vm2, %v775_v59, %v776_v12  ;;  %v1096_v14 = vshll.u32 %v3791_v60, 16  ;;  %v1106_v16 = vshrl.u32 %v5416_v23, 16 }
  0xc1   : > { %2175 = vrot.lane.b32.xlu1 %v3958_v35, %s4626_s13  ;;  %v5435_v44 = vpop.permute.xlu1 %2163  ;;  %v3973_v10 = vcombine.low %v774_v9, %v777_v4  ;;  %v2964_v38 = vsel %vm2962_vm11, %v2931_v6, %v5351_v29  ;;  %v1069_v13 = vshrl.u32 %v3789_v63, 16  ;;  %v1072_v62 = vshll.u32 %v3789_v63, 16 }
  0xc2   : > { %v1082_v24 = vshrl.u32 %v5424_v28, 16  ;;  %v1095_v43 = vrot.slane %v1093_v11, 4  ;;  %v1098_v18 = vrot.slane %v1096_v14, 5  ;;  %v3989_v32 = vcombine.low %v3789_v63, %v5424_v28  ;;  %v3871_v11 = vld [vmem:[%s4715_s5 + $0x84] sm:$0xf] }
  0xc3   : > { %2253 = vrot.lane.b32.xlu0 %v3973_v10, %s4625_s8  ;;  %v3990_v29 = vcombine.low %v3791_v60, %v5416_v23  ;;  %v1071_v36 = vrot.slane %v1069_v13, 4  ;;  %v1074_v58 = vrot.slane %v1072_v62, 5  ;;  %v2999_v39 = vsel %vm2995_vm12, %v2966_v2, %v5370_v19  ;;  %v5491_v14 = vld [vmem:[%s4715_s5 + $0x88] sm:$0xf] }
  0xc4   : > { %v5447_v49 = vpop.permute.xlu0 %2241  ;;  %v1099_v41 = vor.u32 %v1098_v18, %v1095_v43  ;;  %v1102_v52 = vshll.u32 %v5416_v23, 16  ;;  %v1108_v8 = vrot.slane %v1106_v16, 4  ;;  %v1112_v42 = vshll.u32 %v3814_v30, 16 }
  0xc5   : > { %2255 = vrot.lane.b32.xlu1 %v3974_v5, %s4625_s8  ;;  %v5453_v37 = vpop.permute.xlu1 %2243  ;;  %v1075_v47 = vor.u32 %v1074_v58, %v1071_v36  ;;  %v1078_v46 = vshll.u32 %v5424_v28, 16  ;;  %v1084_v1 = vrot.slane %v1082_v24, 4  ;;  %v1088_v34 = vshll.u32 %v5445_v57, 16  ;;  %v3869_v24 = vld [vmem:[%s4715_s5 + $0x78] sm:$0xf] }
  0xc6   : > { %v2997_v19 = vsel %vm2995_vm12, %v2964_v38, %v5377_v27  ;;  %v1100_v48 = vrot.slane %v1099_v41, 4  ;;  %v1104_v26 = vrot.slane %v1102_v52, 5  ;;  %v3935_v25 = vcombine.low %v4475_v50, %v4476_v51  ;;  %v5510_v58 = vld [vmem:[%s4715_s5 + $0x7c] sm:$0xf] }
  0xc7   : > { %2349 = vrot.lane.b32.xlu0 %v3989_v32, %s4623_s6  ;;  %v1114_v20 = vrot.slane %v1112_v42, 5  ;;  %v1076_v33 = vrot.slane %v1075_v47, 4  ;;  %v1080_v15 = vrot.slane %v1078_v46, 5  ;;  %v1090_v54 = vrot.slane %v1088_v34, 5  ;;  %v4477_v32 = vld [vmem:[%s4715_s5 + $0x24] sm:$0xf] }
  0xc8   : > { %v5468_v31 = vpop.permute.xlu0 %2337  ;;  %v1105_v55 = vsel %vm4789_vm5, %v1100_v48, %v1104_v26  ;;  %v1109_v27 = vor.u32 %v1108_v8, %v1104_v26  ;;  %v3846_v56 = vrot.slane %v3830_v7, 9  ;;  %v1389_v12 = vrot.slane %v5416_v23, 5  ;;  %v5526_v26 = vld [vmem:[%s4715_s5 + $0x80] sm:$0x1] }
  0xc9   : > { %2351 = vrot.lane.b32.xlu1 %v3990_v29, %s4623_s6  ;;  %v5466_v22 = vpop.permute.xlu1 %2339  ;;  %v1085_v35 = vor.u32 %v1084_v1, %v1080_v15  ;;  %v5475_v9 = vsel %vm2781_vm6, %v3935_v25, %v5398_v40  ;;  %v1392_v59 = vrot.slane %v3814_v30, 5  ;;  %v3845_v60 = vrot.slane %v3829_v45, 9  ;;  %v5521_v1 = vld [vmem:[%s4715_s5 + $0x8c] sm:$0x1] }
  0xca   : > { %v1110_v53 = vrot.slane %v1109_v27, 4  ;;  %v1081_v61 = vsel %vm4789_vm5, %v1076_v33, %v1080_v15  ;;  %v1391_v63 = vrot.slane %v1389_v12, 4  ;;  %v1382_v5 = vrot.slane %v5424_v28, 5 }
  0xcb   : > { %v1086_v4 = vrot.slane %v1085_v35, 4  ;;  %v1385_v23 = vrot.slane %v5445_v57, 5  ;;  %v1390_v6 = vsel %vm4739_vm2, %v3846_v56, %v1389_v12  ;;  %v3030_v62 = vsel %vm3028_vm13, %v2997_v19, %v5389_v3  ;;  %v4478_v57 = vld [vmem:[%s4715_s5 + $0x28] sm:$0xf]  ;;  %v233_v35 = vld [vmem:[%s4715_s5 + $0x78] sm:$0xf] }
  0xcc   : > { %v1115_v40 = vsel %vm4789_vm5, %v1110_v53, %v1114_v20  ;;  %v1393_v10 = vsel %vm4739_vm2, %v1391_v63, %v1392_v59  ;;  %v1384_v28 = vrot.slane %v1382_v5, 4  ;;  %v1383_v13 = vsel %vm4739_vm2, %v3845_v60, %v1382_v5  ;;  %4308 = vmatprep.mubr.msk.bf16.mxu0 %vm3061_vm14, %v3030_v62  ;;  %v5546_v63 = vld [vmem:[%s4715_s5 + $0x7c] sm:$0xf] }
  0xcd   : > { %v5481_v2 = vpop.permute.xlu1 %2419  ;;  %v4006_v16 = vcombine.low %v1105_v55, %v1115_v40  ;;  %v1091_v38 = vsel %vm4789_vm5, %v1086_v4, %v1090_v54  ;;  %v3936_v29 = vcombine.low %v4477_v32, %v4478_v57  ;;  %v3032_v36 = vsel %vm3028_vm13, %v2999_v39, %v5426_v0 }
  0xce   : > { %v4005_v43 = vcombine.low %v1081_v61, %v1091_v38  ;;  %v1386_v18 = vsel %vm4739_vm2, %v1384_v28, %v1385_v23  ;;  %v4022_v3 = vcombine.low %v1390_v6, %v1393_v10  ;;  %v1702_v41 = vshrl.u32 %v3871_v11, 16  ;;  %4309 = vmatmul.mubr.msk.bf16.vlgmr.msra.gmra.mrb[0].mxu0 %vm3061_vm14, %v3032_v36  ;;  %v5553_v10 = vld [vmem:[%s4715_s5 + $0x80] sm:$0x1] }
  0xcf   : > { %v5500_v30 = vpop.permute.xlu0 %2417  ;;  %2431 = vrot.lane.b32.xlu1 %v4006_v16, %s4627_s23  ;;  %v1705_v52 = vshll.u32 %v3871_v11, 16  ;;  %v1715_v8 = vshrl.u32 %v5491_v14, 16  ;;  %v4021_v47 = vcombine.low %v1383_v13, %v1386_v18  ;;  %v2793_v0 = vsel %vm2781_vm6, %v3936_v29, %v5435_v44  ;;  %v3909_v16 = vld [vmem:[%s4715_s5 + $0x78] sm:$0xe] }
  0xd0   : > { %2429 = vrot.lane.b32.xlu0 %v4005_v43, %s4627_s23  ;;  %v1678_v39 = vshrl.u32 %v3869_v24, 16  ;;  %v1681_v46 = vshll.u32 %v3869_v24, 16  ;;  %v1704_v34 = vrot.slane %v1702_v41, 4  ;;  %v4038_v19 = vcombine.low %v3871_v11, %v5491_v14 }
  0xd1   : > { %v5515_v42 = vpop.permute.xlu1 %2499  ;;  %v1707_v7 = vrot.slane %v1705_v52, 5  ;;  %v1691_v48 = vshrl.u32 %v5510_v58, 16  ;;  %v4037_v45 = vcombine.low %v3869_v24, %v5510_v58  ;;  %v2838_v44 = vsel %vm2830_vm7, %v2793_v0, %v5453_v37 }
  0xd2   : > { %v1680_v51 = vrot.slane %v1678_v39, 4  ;;  %v1683_v25 = vrot.slane %v1681_v46, 5  ;;  %v1711_v33 = vshll.u32 %v5491_v14, 16  ;;  %v1717_v15 = vrot.slane %v1715_v8, 4  ;;  %v235_v46 = vld [vmem:[%s4715_s5 + $0x84] sm:$0xf] }
  0xd3   : > { %v5528_v50 = vpop.permute.xlu0 %2497  ;;  %2511 = vrot.lane.b32.xlu1 %v4022_v3, %s4624_s7  ;;  %v1708_v20 = vor.u32 %v1707_v7, %v1704_v34  ;;  %v1721_v54 = vshll.u32 %v5521_v1, 16  ;;  %v1687_v56 = vshll.u32 %v5510_v58, 16  ;;  %v1693_v12 = vrot.slane %v1691_v48, 4 }
  0xd4   : > { %2509 = vrot.lane.b32.xlu0 %v4021_v47, %s4624_s7  ;;  %v1684_v27 = vor.u32 %v1683_v25, %v1680_v51  ;;  %v1697_v37 = vshll.u32 %v5526_v26, 16  ;;  %v2836_v59 = vsel %vm2830_vm7, %v5475_v9, %v5447_v49  ;;  %v1713_v53 = vrot.slane %v1711_v33, 5  ;;  %v5577_v51 = vld [vmem:[%s4715_s5 + $0x88] sm:$0xf] }
  0xd5   : > { %v5536_v55 = vpop.permute.xlu1 %2595  ;;  %v1709_v60 = vrot.slane %v1708_v20, 4  ;;  %v1723_v61 = vrot.slane %v1721_v54, 5  ;;  %v1689_v23 = vrot.slane %v1687_v56, 5  ;;  %v2871_v6 = vsel %vm2863_vm8, %v2838_v44, %v5466_v22  ;;  %v256_v54 = vld [vmem:[%s4715_s5 + $0x8c] sm:$0x1] }
  0xd6   : > { %v1685_v4 = vrot.slane %v1684_v27, 4  ;;  %v1699_v40 = vrot.slane %v1697_v37, 5  ;;  %v1718_v9 = vor.u32 %v1717_v15, %v1713_v53  ;;  %v505_v28 = vshrl.u32 %v233_v35, 16 }
  0xd7   : > { %v5548_v5 = vpop.permute.xlu0 %2593  ;;  %2607 = vrot.lane.b32.xlu1 %v4038_v19, %s4628_s29  ;;  %v1714_v49 = vsel %vm4789_vm5, %v1709_v60, %v1713_v53  ;;  %v508_v11 = vshll.u32 %v233_v35, 16  ;;  %v1694_v13 = vor.u32 %v1693_v12, %v1689_v23  ;;  %v514_v62 = vshll.u32 %v5546_v63, 16 }
  0xd8   : > { %2605 = vrot.lane.b32.xlu0 %v4037_v45, %s4628_s29  ;;  %v1690_v38 = vsel %vm4789_vm5, %v1685_v4, %v1689_v23  ;;  %v518_v22 = vshrl.u32 %v5546_v63, 16  ;;  %v1719_v43 = vrot.slane %v1718_v9, 4  ;;  %v507_v18 = vrot.slane %v505_v28, 4 }
  0xd9   : > { %v510_v32 = vrot.slane %v508_v11, 5  ;;  %v524_v57 = vshll.u32 %v5553_v10, 16  ;;  %v1695_v36 = vrot.slane %v1694_v13, 4  ;;  %v516_v3 = vrot.slane %v514_v62, 5 }
  0xda   : > { %v5564_v24 = vpop.permute.xlu1 %2675  ;;  %v520_v41 = vrot.slane %v518_v22, 4  ;;  %v3925_v52 = vrot.slane %v3909_v16, 9  ;;  %v1724_v8 = vsel %vm4789_vm5, %v1719_v43, %v1723_v61  ;;  %v1991_v39 = vrot.slane %v5510_v58, 5 }
  0xdb   : > { %v5567_v29 = vpop.permute.xlu0 %2673  ;;  %v511_v47 = vor.u32 %v510_v32, %v507_v18  ;;  %v526_v0 = vrot.slane %v524_v57, 5  ;;  %v4054_v34 = vcombine.low %v1714_v49, %v1724_v8  ;;  %v1700_v7 = vsel %vm4789_vm5, %v1695_v36, %v1699_v40  ;;  %v659_v49 = vld [vmem:[%s4715_s5 + $0x84] sm:$0xe] }
  0xdc   : > { %v521_v19 = vor.u32 %v520_v41, %v516_v3  ;;  %v1994_v48 = vrot.slane %v5526_v26, 5  ;;  %v4053_v25 = vcombine.low %v1690_v38, %v1700_v7  ;;  %v1992_v44 = vsel %vm4739_vm2, %v3925_v52, %v1991_v39  ;;  %v658_v38 = vld [vmem:[%s4715_s5 + $0x78] sm:$0xe] }
  0xdd   : > { %v512_v45 = vrot.slane %v511_v47, 4  ;;  %v1993_v20 = vrot.slane %v1991_v39, 4  ;;  %2687 = vrot.lane.b32.xlu1 %v4054_v34, %s4629_s30  ;;  %v2869_v58 = vsel %vm2863_vm8, %v2836_v59, %v5468_v31  ;;  %v2904_v26 = vsel %vm2896_vm9, %v2871_v6, %v5481_v2  ;;  %v3910_v59 = vld [vmem:[%s4715_s5 + $0x84] sm:$0xe]  ;;  %v5623_v39 = vld [vmem:[%s4715_s5 + $0x90] sm:$0xf] }
  0xde   : > { %v522_v15 = vrot.slane %v521_v19, 4  ;;  %v529_v27 = vshrl.u32 %v235_v46, 16  ;;  %2685 = vrot.lane.b32.xlu0 %v4053_v25, %s4629_s30  ;;  %v532_v35 = vshll.u32 %v235_v46, 16  ;;  %v538_v31 = vshll.u32 %v5577_v51, 16 }
  0xdf   : > { %v5581_v33 = vpop.permute.xlu0 %2753  ;;  %v517_v12 = vsel %vm4789_vm5, %v512_v45, %v516_v3  ;;  %v1995_v37 = vsel %vm4739_vm2, %v1993_v20, %v1994_v48  ;;  %v542_v61 = vshrl.u32 %v5577_v51, 16  ;;  %v548_v6 = vshll.u32 %v256_v54, 16  ;;  %v5630_v48 = vld [vmem:[%s4715_s5 + $0x94] sm:$0xf] }
  0xe0   : > { %v5589_v56 = vpop.permute.xlu1 %2165  ;;  %v527_v2 = vsel %vm4789_vm5, %v522_v15, %v526_v0  ;;  %v4069_v60 = vcombine.low %v1992_v44, %v1995_v37  ;;  %v531_v53 = vrot.slane %v529_v27, 4  ;;  %v534_v23 = vrot.slane %v532_v35, 5  ;;  %v3793_v44 = vld [vmem:[%s4715_s5 + $0x84] sm:$0xf] }
  0xe1   : > { %v3959_v4 = vcombine.low %v517_v12, %v527_v2  ;;  %v540_v40 = vrot.slane %v538_v31, 5  ;;  %v544_v9 = vrot.slane %v542_v61, 4  ;;  %v3926_v28 = vrot.slane %v3910_v59, 9 }
  0xe2   : > { %v1998_v11 = vrot.slane %v5491_v14, 5  ;;  %v2001_v16 = vrot.slane %v5521_v1, 5  ;;  %2765 = vrot.lane.b32.xlu0 %v4069_v60, %s4630_s14  ;;  %v2902_v13 = vsel %vm2896_vm9, %v2869_v58, %v5500_v30  ;;  %v535_v62 = vor.u32 %v534_v23, %v531_v53  ;;  %v5660_v60 = vld [vmem:[%s4715_s5 + $0x98] sm:$0x1] }
  0xe3   : > { %2177 = vrot.lane.b32.xlu1 %v3959_v4, %s4626_s13  ;;  %v550_v22 = vrot.slane %v548_v6, 5  ;;  %v2937_v43 = vsel %vm2929_vm10, %v2904_v26, %v5515_v42  ;;  %v545_v32 = vor.u32 %v544_v9, %v540_v40  ;;  %v3768_v57 = vrot.slane %v659_v49, 9 }
  0xe4   : > { %v1999_v14 = vsel %vm4739_vm2, %v3926_v28, %v1998_v11  ;;  %v2000_v1 = vrot.slane %v1998_v11, 4  ;;  %v536_v3 = vrot.slane %v535_v62, 4  ;;  %v794_v30 = vrot.slane %v5577_v51, 5 }
  0xe5   : > { %v5611_v18 = vpop.permute.xlu0 %2755  ;;  %v797_v41 = vrot.slane %v256_v54, 5  ;;  %v3767_v52 = vrot.slane %v658_v38, 9  ;;  %v546_v8 = vrot.slane %v545_v32, 4  ;;  %v787_v47 = vrot.slane %v5546_v63, 5  ;;  %v5650_v54 = vld [vmem:[%s4715_s5 + $0x88] sm:$0xf] }
  0xe6   : > { %v5615_v36 = vpop.permute.xlu1 %2167  ;;  %v2002_v42 = vsel %vm4739_vm2, %v2000_v1, %v2001_v16  ;;  %v790_v0 = vrot.slane %v5553_v10, 5  ;;  %v541_v46 = vsel %vm4789_vm5, %v536_v3, %v540_v40  ;;  %v2935_v7 = vsel %vm2929_vm10, %v2902_v13, %v5528_v50  ;;  %v3832_v1 = vld [vmem:[%s4715_s5 + $0x90] sm:$0xe] }
  0xe7   : > { %v4070_v34 = vcombine.low %v1999_v14, %v2002_v42  ;;  %v796_v19 = vrot.slane %v794_v30, 4  ;;  %v551_v63 = vsel %vm4789_vm5, %v546_v8, %v550_v22  ;;  %v795_v10 = vsel %vm4739_vm2, %v3768_v57, %v794_v30  ;;  %v4479_v42 = vld [vmem:[%s4715_s5 + $0x30] sm:$0xf] }
  0xe8   : > { %v788_v25 = vsel %vm4739_vm2, %v3767_v52, %v787_v47  ;;  %v789_v45 = vrot.slane %v787_v47, 4  ;;  %v3960_v50 = vcombine.low %v541_v46, %v551_v63  ;;  %v2970_v15 = vsel %vm2962_vm11, %v2937_v43, %v5536_v55  ;;  %v4480_v47 = vld [vmem:[%s4715_s5 + $0x34] sm:$0xf]  ;;  %v3831_v46 = vld [vmem:[%s4715_s5 + $0x84] sm:$0xe] }
  0xe9   : > { %v5632_v51 = vpop.permute.xlu0 %2245  ;;  %2767 = vrot.lane.b32.xlu0 %v4070_v34, %s4630_s14  ;;  %v798_v58 = vsel %vm4739_vm2, %v796_v19, %v797_v41  ;;  %v1141_v26 = vshrl.u32 %v5623_v39, 16  ;;  %v2968_v12 = vsel %vm2962_vm11, %v2935_v7, %v5548_v5  ;;  %v1144_v37 = vshll.u32 %v5623_v39, 16  ;;  %v5666_v5 = vld [vmem:[%s4715_s5 + $0x8c] sm:$0x1] }
  0xea   : > { %v5641_v20 = vpop.permute.xlu1 %2247  ;;  %v791_v27 = vsel %vm4739_vm2, %v789_v45, %v790_v0  ;;  %v1154_v35 = vshrl.u32 %v5630_v48, 16  ;;  %2179 = vrot.lane.b32.xlu1 %v3960_v50, %s4626_s13  ;;  %v3976_v31 = vcombine.low %v795_v10, %v798_v58  ;;  %v1117_v2 = vshrl.u32 %v3793_v44, 16 }
  0xeb   : > { %v3975_v59 = vcombine.low %v788_v25, %v791_v27  ;;  %v1143_v55 = vrot.slane %v1141_v26, 4  ;;  %v1146_v53 = vrot.slane %v1144_v37, 5  ;;  %v3992_v61 = vcombine.low %v5623_v39, %v5630_v48  ;;  %v5705_v26 = vld [vmem:[%s4715_s5 + $0x9c] sm:$0xf] }
  0xec   : > { %v1120_v4 = vshll.u32 %v3793_v44, 16  ;;  %v1130_v23 = vshrl.u32 %v5650_v54, 16  ;;  %v1119_v49 = vrot.slane %v1117_v2, 4  ;;  %v3991_v9 = vcombine.low %v3793_v44, %v5650_v54  ;;  %v4482_v2 = vld [vmem:[%s4715_s5 + $0x40] sm:$0xf] }
  0xed   : > { %v5670_v6 = vpop.permute.xlu0 %2341  ;;  %2257 = vrot.lane.b32.xlu0 %v3975_v59, %s4625_s8  ;;  %v3003_v28 = vsel %vm2995_vm12, %v2970_v15, %v5564_v24  ;;  %v1150_v11 = vshll.u32 %v5630_v48, 16  ;;  %v1147_v38 = vor.u32 %v1146_v53, %v1143_v55  ;;  %v1156_v13 = vrot.slane %v1154_v35, 4  ;;  %v4481_v55 = vld [vmem:[%s4715_s5 + $0x3c] sm:$0xf]  ;;  %v5718_v53 = vld [vmem:[%s4715_s5 + $0xa0] sm:$0xf] }
  0xee   : > { %v5668_v40 = vpop.permute.xlu1 %2343  ;;  %v1122_v16 = vrot.slane %v1120_v4, 5  ;;  %v1160_v62 = vshll.u32 %v5660_v60, 16  ;;  %2259 = vrot.lane.b32.xlu1 %v3976_v31, %s4625_s8  ;;  %v1126_v43 = vshll.u32 %v5650_v54, 16  ;;  %v1132_v32 = vrot.slane %v1130_v23, 4 }
  0xef   : > { %v1152_v22 = vrot.slane %v1150_v11, 5  ;;  %v1136_v14 = vshll.u32 %v5666_v5, 16  ;;  %v3001_v24 = vsel %vm2995_vm12, %v2968_v12, %v5567_v29  ;;  %v1148_v57 = vrot.slane %v1147_v38, 4  ;;  %v5731_v11 = vld [vmem:[%s4715_s5 + $0x94] sm:$0xf] }
  0xf0   : > { %v1162_v3 = vrot.slane %v1160_v62, 5  ;;  %v1123_v30 = vor.u32 %v1122_v16, %v1119_v49  ;;  %v1128_v8 = vrot.slane %v1126_v43, 5  ;;  %v3937_v0 = vcombine.low %v4479_v42, %v4480_v47  ;;  %v5758_v42 = vld [vmem:[%s4715_s5 + $0x98] sm:$0x1] }
  0xf1   : > { %2353 = vrot.lane.b32.xlu0 %v3991_v9, %s4623_s6  ;;  %v1157_v52 = vor.u32 %v1156_v13, %v1152_v22  ;;  %v3034_v39 = vsel %vm3028_vm13, %v3001_v24, %v5581_v33  ;;  %v1153_v29 = vsel %vm4789_vm5, %v1148_v57, %v1152_v22  ;;  %v1138_v7 = vrot.slane %v1136_v14, 5  ;;  %v3873_v9 = vld [vmem:[%s4715_s5 + $0x90] sm:$0xf]  ;;  %v5748_v57 = vld [vmem:[%s4715_s5 + $0xa4] sm:$0x1] }
  0xf2   : > { %v5684_v41 = vpop.permute.xlu1 %2423  ;;  %v1124_v34 = vrot.slane %v1123_v30, 4  ;;  %v3848_v19 = vrot.slane %v3832_v1, 9  ;;  %4312 = vmatprep.mubr.msk.bf16.mxu0 %vm3061_vm14, %v3034_v39  ;;  %2355 = vrot.lane.b32.xlu1 %v3992_v61, %s4623_s6  ;;  %v1133_v25 = vor.u32 %v1132_v32, %v1128_v8  ;;  %v1403_v45 = vrot.slane %v5630_v48, 5 }
  0xf3   : > { %v1158_v10 = vrot.slane %v1157_v52, 4  ;;  %v1406_v33 = vrot.slane %v5660_v60, 5  ;;  %v3847_v50 = vrot.slane %v3831_v46, 9  ;;  %v1396_v58 = vrot.slane %v5650_v54, 5 }
  0xf4   : > { %v5695_v63 = vpop.permute.xlu0 %2421  ;;  %v1129_v44 = vsel %vm4789_vm5, %v1124_v34, %v1128_v8  ;;  %v1399_v15 = vrot.slane %v5666_v5, 5  ;;  %v1134_v48 = vrot.slane %v1133_v25, 4  ;;  %v1404_v37 = vsel %vm4739_vm2, %v3848_v19, %v1403_v45 }
  0xf5   : > { %v1163_v12 = vsel %vm4789_vm5, %v1158_v10, %v1162_v3  ;;  %v1405_v35 = vrot.slane %v1403_v45, 4  ;;  %v1397_v54 = vsel %vm4739_vm2, %v3847_v50, %v1396_v58  ;;  %v1398_v59 = vrot.slane %v1396_v58, 4  ;;  %v237_v10 = vld [vmem:[%s4715_s5 + $0x90] sm:$0xf]  ;;  %v5772_v50 = vld [vmem:[%s4715_s5 + $0x94] sm:$0xf] }
  0xf6   : > { %v5707_v27 = vpop.permute.xlu1 %2503  ;;  %v4008_v31 = vcombine.low %v1153_v29, %v1163_v12  ;;  %v3938_v60 = vcombine.low %v4481_v55, %v4482_v2  ;;  %v1139_v4 = vsel %vm4789_vm5, %v1134_v48, %v1138_v7  ;;  %v3036_v5 = vsel %vm3028_vm13, %v3003_v28, %v5611_v18 }
  0xf7   : > { %v1407_v23 = vsel %vm4739_vm2, %v1405_v35, %v1406_v33  ;;  %v1750_v49 = vshrl.u32 %v5705_v26, 16  ;;  %v4007_v16 = vcombine.low %v1129_v44, %v1139_v4  ;;  %v2796_v38 = vsel %vm2781_vm6, %v3937_v0, %v5589_v56  ;;  %4313 = vmatmul.mubr.msk.bf16.gmra.mrb[4].mxu0 %vm3061_vm14, %v3036_v5  ;;  %v3911_v4 = vld [vmem:[%s4715_s5 + $0x90] sm:$0xe] }
  0xf8   : > { %v5720_v61 = vpop.permute.xlu0 %2501  ;;  %2435 = vrot.lane.b32.xlu1 %v4008_v31, %s4627_s23  ;;  %v4024_v13 = vcombine.low %v1404_v37, %v1407_v23  ;;  %v1400_v62 = vsel %vm4739_vm2, %v1398_v59, %v1399_v15  ;;  %v2799_v18 = vsel %vm2781_vm6, %v3938_v60, %v5615_v36  ;;  %v1753_v43 = vshll.u32 %v5705_v26, 16  ;;  %v5780_v31 = vld [vmem:[%s4715_s5 + $0x98] sm:$0x1] }
  0xf9   : > { %v1752_v28 = vrot.slane %v1750_v49, 4  ;;  %v1763_v32 = vshrl.u32 %v5718_v53, 16  ;;  %2433 = vrot.lane.b32.xlu0 %v4007_v16, %s4627_s23  ;;  %v4023_v56 = vcombine.low %v1397_v54, %v1400_v62  ;;  %v1726_v14 = vshrl.u32 %v3873_v9, 16 }
  0xfa   : > { %v5738_v22 = vpop.permute.xlu1 %2599  ;;  %v1729_v1 = vshll.u32 %v3873_v9, 16  ;;  %v1739_v24 = vshrl.u32 %v5731_v11, 16  ;;  %v1755_v36 = vrot.slane %v1753_v43, 5  ;;  %v4040_v30 = vcombine.low %v5705_v26, %v5718_v53 }
  0xfb   : > { %v4039_v52 = vcombine.low %v3873_v9, %v5731_v11  ;;  %v2842_v8 = vsel %vm2830_vm7, %v2799_v18, %v5641_v20  ;;  %v1728_v47 = vrot.slane %v1726_v14, 4  ;;  %v1759_v39 = vshll.u32 %v5718_v53, 16  ;;  %v239_v14 = vld [vmem:[%s4715_s5 + $0x9c] sm:$0xf] }
  0xfc   : > { %v5750_v3 = vpop.permute.xlu0 %2597  ;;  %2515 = vrot.lane.b32.xlu1 %v4024_v13, %s4624_s7  ;;  %v1731_v0 = vrot.slane %v1729_v1, 5  ;;  %v1765_v46 = vrot.slane %v1763_v32, 4  ;;  %v1756_v29 = vor.u32 %v1755_v36, %v1752_v28  ;;  %v1769_v34 = vshll.u32 %v5748_v57, 16 }
  0xfd   : > { %v1735_v7 = vshll.u32 %v5731_v11, 16  ;;  %v1741_v19 = vrot.slane %v1739_v24, 4  ;;  %2513 = vrot.lane.b32.xlu0 %v4023_v56, %s4624_s7  ;;  %v2840_v20 = vsel %vm2830_vm7, %v2796_v38, %v5632_v51  ;;  %v1761_v45 = vrot.slane %v1759_v39, 5  ;;  %v240_v39 = vld [vmem:[%s4715_s5 + $0xa0] sm:$0xf] }
  0xfe   : > { %v1732_v33 = vor.u32 %v1731_v0, %v1728_v47  ;;  %v1745_v44 = vshll.u32 %v5758_v42, 16  ;;  %v1757_v15 = vrot.slane %v1756_v29, 4  ;;  %v1771_v26 = vrot.slane %v1769_v34, 5  ;;  %v258_v34 = vld [vmem:[%s4715_s5 + $0xa4] sm:$0x1] }
  0xff   : > { %v5765_v25 = vpop.permute.xlu1 %2679  ;;  %v1737_v12 = vrot.slane %v1735_v7, 5  ;;  %v2875_v48 = vsel %vm2863_vm8, %v2842_v8, %v5668_v40  ;;  %v1766_v37 = vor.u32 %v1765_v46, %v1761_v45  ;;  %v553_v54 = vshrl.u32 %v237_v10, 16 }
 0x100   : > { %v5774_v58 = vpop.permute.xlu0 %2677  ;;  %2611 = vrot.lane.b32.xlu1 %v4040_v30, %s4628_s29  ;;  %v1733_v35 = vrot.slane %v1732_v33, 4  ;;  %v1747_v51 = vrot.slane %v1745_v44, 5  ;;  %v1762_v59 = vsel %vm4789_vm5, %v1757_v15, %v1761_v45  ;;  %v556_v2 = vshll.u32 %v237_v10, 16 }
 0x101   : > { %v1742_v55 = vor.u32 %v1741_v19, %v1737_v12  ;;  %v562_v60 = vshll.u32 %v5772_v50, 16  ;;  %2609 = vrot.lane.b32.xlu0 %v4039_v52, %s4628_s29  ;;  %v1767_v40 = vrot.slane %v1766_v37, 4  ;;  %v555_v5 = vrot.slane %v553_v54, 4 }
 0x102   : > { %v1738_v23 = vsel %vm4789_vm5, %v1733_v35, %v1737_v12  ;;  %v566_v49 = vshrl.u32 %v5772_v50, 16  ;;  %v558_v38 = vrot.slane %v556_v2, 5  ;;  %v572_v62 = vshll.u32 %v5780_v31, 16  ;;  %v661_v2 = vld [vmem:[%s4715_s5 + $0x9c] sm:$0xe] }
 0x103   : > { %v1743_v16 = vrot.slane %v1742_v55, 4  ;;  %v564_v13 = vrot.slane %v562_v60, 5  ;;  %v1772_v28 = vsel %vm4789_vm5, %v1767_v40, %v1771_v26  ;;  %v2873_v43 = vsel %vm2863_vm8, %v2840_v20, %v5670_v6 }
 0x104   : > { %v5790_v9 = vpop.permute.xlu0 %2757  ;;  %v568_v32 = vrot.slane %v566_v49, 4  ;;  %v3927_v56 = vrot.slane %v3911_v4, 9  ;;  %v4056_v1 = vcombine.low %v1762_v59, %v1772_v28  ;;  %v559_v36 = vor.u32 %v558_v38, %v555_v5  ;;  %v660_v5 = vld [vmem:[%s4715_s5 + $0x90] sm:$0xe] }
 0x105   : > { %v5793_v18 = vpop.permute.xlu1 %2169  ;;  %v1748_v24 = vsel %vm4789_vm5, %v1743_v16, %v1747_v51  ;;  %v574_v30 = vrot.slane %v572_v62, 5  ;;  %v2005_v47 = vrot.slane %v5731_v11, 5  ;;  %v2008_v0 = vrot.slane %v5758_v42, 5 }
 0x106   : > { %v4055_v52 = vcombine.low %v1738_v23, %v1748_v24  ;;  %v569_v8 = vor.u32 %v568_v32, %v564_v13  ;;  %2691 = vrot.lane.b32.xlu1 %v4056_v1, %s4629_s30  ;;  %v560_v6 = vrot.slane %v559_v36, 4  ;;  %v804_v46 = vrot.slane %v5780_v31, 5 }
 0x107   : > { %v2908_v29 = vsel %vm2896_vm9, %v2875_v48, %v5684_v41  ;;  %v577_v7 = vshrl.u32 %v239_v14, 16  ;;  %v2006_v11 = vsel %vm4739_vm2, %v3927_v56, %v2005_v47  ;;  %v2007_v10 = vrot.slane %v2005_v47, 4  ;;  %v3912_v41 = vld [vmem:[%s4715_s5 + $0x9c] sm:$0xe] }
 0x108   : > { %2689 = vrot.lane.b32.xlu0 %v4055_v52, %s4629_s30  ;;  %v570_v19 = vrot.slane %v569_v8, 4  ;;  %v580_v42 = vshll.u32 %v239_v14, 16  ;;  %v565_v45 = vsel %vm4789_vm5, %v560_v6, %v564_v13  ;;  %v586_v44 = vshll.u32 %v240_v39, 16  ;;  %v5846_v52 = vld [vmem:[%s4715_s5 + $0xa8] sm:$0xf] }
 0x109   : > { %v579_v33 = vrot.slane %v577_v7, 4  ;;  %v590_v15 = vshrl.u32 %v240_v39, 16  ;;  %v2009_v48 = vsel %vm4739_vm2, %v2007_v10, %v2008_v0  ;;  %v596_v35 = vshll.u32 %v258_v34, 16  ;;  %v5857_v6 = vld [vmem:[%s4715_s5 + $0xac] sm:$0xf] }
 0x10a   : > { %v5813_v20 = vpop.permute.xlu0 %2759  ;;  %v575_v12 = vsel %vm4789_vm5, %v570_v19, %v574_v30  ;;  %v582_v37 = vrot.slane %v580_v42, 5  ;;  %v4071_v54 = vcombine.low %v2006_v11, %v2009_v48  ;;  %v588_v59 = vrot.slane %v586_v44, 5  ;;  %v5869_v10 = vld [vmem:[%s4715_s5 + $0xa0] sm:$0xf] }
 0x10b   : > { %v5818_v26 = vpop.permute.xlu1 %2171  ;;  %v3961_v51 = vcombine.low %v565_v45, %v575_v12  ;;  %v592_v55 = vrot.slane %v590_v15, 4  ;;  %v2906_v60 = vsel %vm2896_vm9, %v2873_v43, %v5695_v63  ;;  %v598_v40 = vrot.slane %v596_v35, 5 }
 0x10c   : > { %v583_v4 = vor.u32 %v582_v37, %v579_v33  ;;  %v3928_v23 = vrot.slane %v3912_v41, 9  ;;  %2769 = vrot.lane.b32.xlu0 %v4071_v54, %s4630_s14  ;;  %v811_v38 = vrot.slane %v258_v34, 5  ;;  %v2012_v13 = vrot.slane %v5718_v53, 5 }
 0x10d   : > { %2181 = vrot.lane.b32.xlu1 %v3961_v51, %s4626_s13  ;;  %v593_v16 = vor.u32 %v592_v55, %v588_v59  ;;  %v2015_v62 = vrot.slane %v5748_v57, 5  ;;  %v2941_v43 = vsel %vm2929_vm10, %v2908_v29, %v5707_v27  ;;  %v3770_v32 = vrot.slane %v661_v2, 9  ;;  %v5884_v51 = vld [vmem:[%s4715_s5 + $0xb0] sm:$0x1] }
 0x10e   : > { %v5828_v49 = vpop.permute.xlu0 %2249  ;;  %v584_v63 = vrot.slane %v583_v4, 4  ;;  %v808_v56 = vrot.slane %v240_v39, 5  ;;  %v2013_v1 = vsel %vm4739_vm2, %v3928_v23, %v2012_v13  ;;  %v2014_v24 = vrot.slane %v2012_v13, 4  ;;  %v5891_v4 = vld [vmem:[%s4715_s5 + $0xa4] sm:$0x1] }
 0x10f   : > { %v5834_v28 = vpop.permute.xlu1 %2251  ;;  %v594_v14 = vrot.slane %v593_v16, 4  ;;  %v3769_v36 = vrot.slane %v660_v5, 9  ;;  %v2939_v57 = vsel %vm2929_vm10, %v2906_v60, %v5720_v61  ;;  %v801_v27 = vrot.slane %v5772_v50, 5  ;;  %v3797_v61 = vld [vmem:[%s4715_s5 + $0x9c] sm:$0xf] }
 0x110   : > { %v589_v53 = vsel %vm4789_vm5, %v584_v63, %v588_v59  ;;  %v810_v30 = vrot.slane %v808_v56, 4  ;;  %v2016_v47 = vsel %vm4739_vm2, %v2014_v24, %v2015_v62  ;;  %v809_v0 = vsel %vm4739_vm2, %v3770_v32, %v808_v56  ;;  %v3834_v56 = vld [vmem:[%s4715_s5 + $0xa8] sm:$0xe] }
 0x111   : > { %v599_v8 = vsel %vm4789_vm5, %v594_v14, %v598_v40  ;;  %v2974_v39 = vsel %vm2962_vm11, %v2941_v43, %v5738_v22  ;;  %v4072_v7 = vcombine.low %v2013_v1, %v2016_v47  ;;  %v2972_v11 = vsel %vm2962_vm11, %v2939_v57, %v5750_v3  ;;  %v3833_v57 = vld [vmem:[%s4715_s5 + $0x9c] sm:$0xe] }
 0x112   : > { %v5862_v50 = vpop.permute.xlu0 %2345  ;;  %v3962_v34 = vcombine.low %v589_v53, %v599_v8  ;;  %v812_v19 = vsel %vm4739_vm2, %v810_v30, %v811_v38  ;;  %v802_v22 = vsel %vm4739_vm2, %v3769_v36, %v801_v27  ;;  %v803_v42 = vrot.slane %v801_v27, 4  ;;  %v4484_v8 = vld [vmem:[%s4715_s5 + $0x4c] sm:$0xf] }
 0x113   : > { %v5860_v29 = vpop.permute.xlu1 %2347  ;;  %v1189_v45 = vshrl.u32 %v5846_v52, 16  ;;  %v1192_v33 = vshll.u32 %v5846_v52, 16  ;;  %2771 = vrot.lane.b32.xlu0 %v4072_v7, %s4630_s14  ;;  %v3978_v44 = vcombine.low %v809_v0, %v812_v19  ;;  %v1202_v15 = vshrl.u32 %v5857_v6, 16 }
 0x114   : > { %2183 = vrot.lane.b32.xlu1 %v3962_v34, %s4626_s13  ;;  %v1165_v3 = vshrl.u32 %v3797_v61, 16  ;;  %v1168_v41 = vshll.u32 %v3797_v61, 16  ;;  %v805_v12 = vsel %vm4739_vm2, %v803_v42, %v804_v46  ;;  %v1178_v35 = vshrl.u32 %v5869_v10, 16 }
 0x115   : > { %v1191_v48 = vrot.slane %v1189_v45, 4  ;;  %v1194_v37 = vrot.slane %v1192_v33, 5  ;;  %v3977_v59 = vcombine.low %v802_v22, %v805_v12  ;;  %v3994_v55 = vcombine.low %v5846_v52, %v5857_v6  ;;  %v4483_v52 = vld [vmem:[%s4715_s5 + $0x48] sm:$0xf] }
 0x116   : > { %v1167_v2 = vrot.slane %v1165_v3, 4  ;;  %v1170_v60 = vrot.slane %v1168_v41, 5  ;;  %v3993_v31 = vcombine.low %v3797_v61, %v5869_v10  ;;  %v3007_v46 = vsel %vm2995_vm12, %v2974_v39, %v5765_v25  ;;  %v3879_v41 = vld [vmem:[%s4715_s5 + $0xb4] sm:$0xf] }
 0x117   : > { %v5886_v54 = vpop.permute.xlu1 %2427  ;;  %v1195_v40 = vor.u32 %v1194_v37, %v1191_v48  ;;  %v1198_v23 = vshll.u32 %v5857_v6, 16  ;;  %2261 = vrot.lane.b32.xlu0 %v3977_v59, %s4625_s8  ;;  %v1204_v16 = vrot.slane %v1202_v15, 4  ;;  %v1208_v38 = vshll.u32 %v5884_v51, 16  ;;  %v4486_v15 = vld [vmem:[%s4715_s5 + $0x58] sm:$0xf] }
 0x118   : > { %2263 = vrot.lane.b32.xlu1 %v3978_v44, %s4625_s8  ;;  %v1171_v13 = vor.u32 %v1170_v60, %v1167_v2  ;;  %v1174_v62 = vshll.u32 %v5869_v10, 16  ;;  %v1180_v43 = vrot.slane %v1178_v35, 4  ;;  %v1184_v32 = vshll.u32 %v5891_v4, 16  ;;  %v4485_v44 = vld [vmem:[%s4715_s5 + $0x54] sm:$0xf] }
 0x119   : > { %v5897_v5 = vpop.permute.xlu0 %2425  ;;  %v1196_v63 = vrot.slane %v1195_v40, 4  ;;  %v1200_v25 = vrot.slane %v1198_v23, 5  ;;  %v3005_v1 = vsel %vm2995_vm12, %v2972_v11, %v5774_v58  ;;  %v1210_v24 = vrot.slane %v1208_v38, 5  ;;  %v5937_v35 = vld [vmem:[%s4715_s5 + $0xb8] sm:$0xf] }
 0x11a   : > { %v1172_v36 = vrot.slane %v1171_v13, 4  ;;  %v1176_v53 = vrot.slane %v1174_v62, 5  ;;  %v3939_v47 = vcombine.low %v4483_v52, %v4484_v8  ;;  %v3038_v0 = vsel %vm3028_vm13, %v3005_v1, %v5790_v9  ;;  %v5954_v23 = vld [vmem:[%s4715_s5 + $0xac] sm:$0xf] }
 0x11b   : > { %v5905_v14 = vpop.permute.xlu1 %2507  ;;  %v1201_v30 = vsel %vm4789_vm5, %v1196_v63, %v1200_v25  ;;  %v1205_v27 = vor.u32 %v1204_v16, %v1200_v25  ;;  %2357 = vrot.lane.b32.xlu0 %v3993_v31, %s4623_s6  ;;  %v1186_v34 = vrot.slane %v1184_v32, 5  ;;  %v3850_v7 = vrot.slane %v3834_v56, 9  ;;  %4316 = vmatprep.mubr.msk.bf16.mxu0 %vm3061_vm14, %v3038_v0  ;;  %v5964_v32 = vld [vmem:[%s4715_s5 + $0xbc] sm:$0x1] }
 0x11c   : > { %2359 = vrot.lane.b32.xlu1 %v3994_v55, %s4623_s6  ;;  %v1177_v58 = vsel %vm4789_vm5, %v1172_v36, %v1176_v53  ;;  %v1181_v61 = vor.u32 %v1180_v43, %v1176_v53  ;;  %v1417_v11 = vrot.slane %v5857_v6, 5  ;;  %v1420_v9 = vrot.slane %v5884_v51, 5  ;;  %v5969_v53 = vld [vmem:[%s4715_s5 + $0xb0] sm:$0x1] }
 0x11d   : > { %v5916_v39 = vpop.permute.xlu0 %2505  ;;  %v1206_v19 = vrot.slane %v1205_v27, 4  ;;  %v3849_v22 = vrot.slane %v3833_v57, 9  ;;  %v1410_v45 = vrot.slane %v5869_v10, 5  ;;  %v1413_v33 = vrot.slane %v5891_v4, 5  ;;  %v3877_v4 = vld [vmem:[%s4715_s5 + $0xa8] sm:$0xf] }
 0x11e   : > { %v1182_v42 = vrot.slane %v1181_v61, 4  ;;  %v3940_v3 = vcombine.low %v4485_v44, %v4486_v15  ;;  %v1418_v6 = vsel %vm4739_vm2, %v3850_v7, %v1417_v11  ;;  %v1419_v48 = vrot.slane %v1417_v11, 4  ;;  %v5985_v11 = vld [vmem:[%s4715_s5 + $0xa8] sm:$0xf] }
 0x11f   : > { %v1211_v12 = vsel %vm4789_vm5, %v1206_v19, %v1210_v24  ;;  %v3040_v37 = vsel %vm3028_vm13, %v3007_v46, %v5813_v20  ;;  %v5939_v10 = vpop.permute.xlu1 %2603  ;;  %v1411_v2 = vsel %vm4739_vm2, %v3849_v22, %v1410_v45  ;;  %v1412_v60 = vrot.slane %v1410_v45, 4 }
 0x120   : > { %v4010_v59 = vcombine.low %v1201_v30, %v1211_v12  ;;  %v1187_v55 = vsel %vm4789_vm5, %v1182_v42, %v1186_v34  ;;  %4317 = vmatmul.mubr.msk.bf16.gmra.mrb[8].mxu0 %vm3061_vm14, %v3040_v37  ;;  %v2802_v20 = vsel %vm2781_vm6, %v3939_v47, %v5793_v18  ;;  %v1421_v46 = vsel %vm4739_vm2, %v1419_v48, %v1420_v9  ;;  %v5995_v12 = vld [vmem:[%s4715_s5 + $0xb0] sm:$0x1] }
 0x121   : > { %v5941_v51 = vpop.permute.xlu0 %2601  ;;  %v4009_v31 = vcombine.low %v1177_v58, %v1187_v55  ;;  %v1798_v40 = vshrl.u32 %v3879_v41, 16  ;;  %v4026_v16 = vcombine.low %v1418_v6, %v1421_v46  ;;  %v1414_v38 = vsel %vm4739_vm2, %v1412_v60, %v1413_v33  ;;  %v5990_v33 = vld [vmem:[%s4715_s5 + $0xac] sm:$0xf] }
 0x122   : > { %2439 = vrot.lane.b32.xlu1 %v4010_v59, %s4627_s23  ;;  %v1801_v13 = vshll.u32 %v3879_v41, 16  ;;  %v1811_v62 = vshrl.u32 %v5937_v35, 16  ;;  %v4025_v63 = vcombine.low %v1411_v2, %v1414_v38  ;;  %v2805_v18 = vsel %vm2781_vm6, %v3940_v3, %v5818_v26 }
 0x123   : > { %2437 = vrot.lane.b32.xlu0 %v4009_v31, %s4627_s23  ;;  %v1800_v25 = vrot.slane %v1798_v40, 4  ;;  %v1774_v43 = vshrl.u32 %v3877_v4, 16  ;;  %v4042_v1 = vcombine.low %v3879_v41, %v5937_v35  ;;  %v1777_v24 = vshll.u32 %v3877_v4, 16 }
 0x124   : > { %v1803_v56 = vrot.slane %v1801_v13, 5  ;;  %v1787_v36 = vshrl.u32 %v5954_v23, 16  ;;  %v4041_v27 = vcombine.low %v3877_v4, %v5954_v23  ;;  %v2846_v26 = vsel %vm2830_vm7, %v2805_v18, %v5834_v28  ;;  %v5977_v8 = vpop.permute.xlu1 %2683  ;;  %v3913_v4 = vld [vmem:[%s4715_s5 + $0xa8] sm:$0xe] }
 0x125   : > { %v5971_v57 = vpop.permute.xlu0 %2681  ;;  %v1776_v30 = vrot.slane %v1774_v43, 4  ;;  %v1807_v52 = vshll.u32 %v5937_v35, 16  ;;  %v1779_v47 = vrot.slane %v1777_v24, 5  ;;  %v1813_v58 = vrot.slane %v1811_v62, 4 }
 0x126   : > { %2519 = vrot.lane.b32.xlu1 %v4026_v16, %s4624_s7  ;;  %v1804_v0 = vor.u32 %v1803_v56, %v1800_v25  ;;  %v1817_v61 = vshll.u32 %v5964_v32, 16  ;;  %v1783_v7 = vshll.u32 %v5954_v23, 16  ;;  %v1789_v19 = vrot.slane %v1787_v36, 4 }
 0x127   : > { %2517 = vrot.lane.b32.xlu0 %v4025_v63, %s4624_s7  ;;  %v1809_v34 = vrot.slane %v1807_v52, 5  ;;  %v1793_v28 = vshll.u32 %v5969_v53, 16  ;;  %v2844_v9 = vsel %vm2830_vm7, %v2802_v20, %v5828_v49  ;;  %v1780_v45 = vor.u32 %v1779_v47, %v1776_v30 }
 0x128   : > { %v1805_v22 = vrot.slane %v1804_v0, 4  ;;  %v1819_v42 = vrot.slane %v1817_v61, 5  ;;  %v1785_v15 = vrot.slane %v1783_v7, 5  ;;  %v2879_v41 = vsel %vm2863_vm8, %v2846_v26, %v5860_v29  ;;  %v6023_v26 = vld [vmem:[%s4715_s5 + $0xb8] sm:$0xf] }
 0x129   : > { %v1814_v44 = vor.u32 %v1813_v58, %v1809_v34  ;;  %v1795_v3 = vrot.slane %v1793_v28, 5  ;;  %v1781_v49 = vrot.slane %v1780_v45, 4  ;;  %v601_v48 = vshrl.u32 %v5985_v11, 16  ;;  %v6031_v61 = vld [vmem:[%s4715_s5 + $0xbc] sm:$0x1] }
 0x12a   : > { %2615 = vrot.lane.b32.xlu1 %v4042_v1, %s4628_s29  ;;  %v1810_v6 = vsel %vm4789_vm5, %v1805_v22, %v1809_v34  ;;  %v604_v37 = vshll.u32 %v5985_v11, 16  ;;  %v1790_v2 = vor.u32 %v1789_v19, %v1785_v15  ;;  %v610_v29 = vshll.u32 %v5990_v33, 16  ;;  %v6008_v31 = vpop.permute.xlu1 %2173  ;;  %v6016_v1 = vld [vmem:[%s4715_s5 + $0xb4] sm:$0xf] }
 0x12b   : > { %v6002_v59 = vpop.permute.xlu0 %2761  ;;  %2613 = vrot.lane.b32.xlu0 %v4041_v27, %s4628_s29  ;;  %v1815_v55 = vrot.slane %v1814_v44, 4  ;;  %v614_v60 = vshrl.u32 %v5990_v33, 16  ;;  %v1786_v20 = vsel %vm4789_vm5, %v1781_v49, %v1785_v15  ;;  %v603_v46 = vrot.slane %v601_v48, 4 }
 0x12c   : > { %v606_v40 = vrot.slane %v604_v37, 5  ;;  %v620_v16 = vshll.u32 %v5995_v12, 16  ;;  %v1791_v13 = vrot.slane %v1790_v2, 4  ;;  %v612_v62 = vrot.slane %v610_v29, 5  ;;  %v663_v37 = vld [vmem:[%s4715_s5 + $0xb4] sm:$0xe] }
 0x12d   : > { %v1820_v38 = vsel %vm4789_vm5, %v1815_v55, %v1819_v42  ;;  %v616_v63 = vrot.slane %v614_v60, 4  ;;  %v3929_v56 = vrot.slane %v3913_v4, 9  ;;  %v2019_v30 = vrot.slane %v5954_v23, 5  ;;  %v3914_v42 = vld [vmem:[%s4715_s5 + $0xb4] sm:$0xe] }
 0x12e   : > { %v4058_v18 = vcombine.low %v1810_v6, %v1820_v38  ;;  %v607_v25 = vor.u32 %v606_v40, %v603_v46  ;;  %v622_v43 = vrot.slane %v620_v16, 5  ;;  %v1796_v24 = vsel %vm4789_vm5, %v1791_v13, %v1795_v3  ;;  %v662_v4 = vld [vmem:[%s4715_s5 + $0xa8] sm:$0xe] }
 0x12f   : > { %v617_v36 = vor.u32 %v616_v63, %v612_v62  ;;  %v2022_v27 = vrot.slane %v5969_v53, 5  ;;  %v4057_v52 = vcombine.low %v1786_v20, %v1796_v24  ;;  %v2877_v47 = vsel %vm2863_vm8, %v2844_v9, %v5862_v50 }
 0x130   : > { %2695 = vrot.lane.b32.xlu1 %v4058_v18, %s4629_s30  ;;  %v608_v0 = vrot.slane %v607_v25, 4  ;;  %v2912_v58 = vsel %vm2896_vm9, %v2879_v41, %v5886_v54  ;;  %v6033_v34 = vpop.permute.xlu0 %2763  ;;  %v2020_v53 = vsel %vm4739_vm2, %v3929_v56, %v2019_v30  ;;  %v2021_v7 = vrot.slane %v2019_v30, 4  ;;  %v6075_v30 = vld [vmem:[%s4715_s5 + $0xc0] sm:$0xf] }
 0x131   : > { %v618_v23 = vrot.slane %v617_v36, 4  ;;  %v625_v19 = vshrl.u32 %v6016_v1, 16  ;;  %2693 = vrot.lane.b32.xlu0 %v4057_v52, %s4629_s30  ;;  %v628_v54 = vshll.u32 %v6016_v1, 16  ;;  %v634_v9 = vshll.u32 %v6023_v26, 16 }
 0x132   : > { %v613_v50 = vsel %vm4789_vm5, %v608_v0, %v612_v62  ;;  %v638_v22 = vshrl.u32 %v6023_v26, 16  ;;  %v2023_v44 = vsel %vm4739_vm2, %v2021_v7, %v2022_v27  ;;  %v644_v3 = vshll.u32 %v6031_v61, 16  ;;  %v3801_v7 = vld [vmem:[%s4715_s5 + $0xb4] sm:$0xf] }
 0x133   : > { %v6038_v28 = vpop.permute.xlu1 %2175  ;;  %v623_v45 = vsel %vm4789_vm5, %v618_v23, %v622_v43  ;;  %v627_v15 = vrot.slane %v625_v19, 4  ;;  %v4073_v6 = vcombine.low %v2020_v53, %v2023_v44  ;;  %v630_v49 = vrot.slane %v628_v54, 5 }
 0x134   : > { %v3963_v41 = vcombine.low %v613_v50, %v623_v45  ;;  %v636_v48 = vrot.slane %v634_v9, 5  ;;  %v2910_v55 = vsel %vm2896_vm9, %v2877_v47, %v5897_v5  ;;  %v640_v2 = vrot.slane %v638_v22, 4  ;;  %v6100_v22 = vld [vmem:[%s4715_s5 + $0xb8] sm:$0xf] }
 0x135   : > { %v3930_v29 = vrot.slane %v3914_v42, 9  ;;  %v2026_v60 = vrot.slane %v5937_v35, 5  ;;  %2773 = vrot.lane.b32.xlu0 %v4073_v6, %s4630_s14  ;;  %v631_v46 = vor.u32 %v630_v49, %v627_v15  ;;  %v646_v40 = vrot.slane %v644_v3, 5  ;;  %v6064_v5 = vpop.permute.xlu0 %2253 }
 0x136   : > { %2185 = vrot.lane.b32.xlu1 %v3963_v41, %s4626_s13  ;;  %v2029_v16 = vrot.slane %v5964_v32, 5  ;;  %v2945_v38 = vsel %vm2929_vm10, %v2912_v58, %v5905_v14  ;;  %v641_v13 = vor.u32 %v640_v2, %v636_v48  ;;  %v3772_v63 = vrot.slane %v663_v37, 9  ;;  %v6082_v58 = vld [vmem:[%s4715_s5 + $0xc4] sm:$0xf] }
 0x137   : > { %v6057_v20 = vpop.permute.xlu1 %2255  ;;  %v2027_v35 = vsel %vm4739_vm2, %v3930_v29, %v2026_v60  ;;  %v2028_v62 = vrot.slane %v2026_v60, 4  ;;  %v632_v18 = vrot.slane %v631_v46, 4  ;;  %v822_v25 = vrot.slane %v6023_v26, 5 }
 0x138   : > { %v825_v43 = vrot.slane %v6031_v61, 5  ;;  %v3771_v56 = vrot.slane %v662_v4, 9  ;;  %v642_v32 = vrot.slane %v641_v13, 4  ;;  %v815_v24 = vrot.slane %v5990_v33, 5 }
 0x139   : > { %v2030_v14 = vsel %vm4739_vm2, %v2028_v62, %v2029_v16  ;;  %v818_v36 = vrot.slane %v5995_v12, 5  ;;  %v637_v27 = vsel %vm4789_vm5, %v632_v18, %v636_v48  ;;  %v2943_v47 = vsel %vm2929_vm10, %v2910_v55, %v5916_v39  ;;  %v6102_v42 = vpop.permute.xlu0 %2349  ;;  %v6112_v48 = vld [vmem:[%s4715_s5 + $0xc8] sm:$0x1] }
 0x13a   : > { %v4074_v52 = vcombine.low %v2027_v35, %v2030_v14  ;;  %v824_v0 = vrot.slane %v822_v25, 4  ;;  %v647_v61 = vsel %vm4789_vm5, %v642_v32, %v646_v40  ;;  %v823_v23 = vsel %vm4739_vm2, %v3772_v63, %v822_v25 }
 0x13b   : > { %v816_v12 = vsel %vm4739_vm2, %v3771_v56, %v815_v24  ;;  %v817_v53 = vrot.slane %v815_v24, 4  ;;  %v6091_v19 = vpop.permute.xlu1 %2351  ;;  %v3964_v50 = vcombine.low %v637_v27, %v647_v61  ;;  %v2978_v54 = vsel %vm2962_vm11, %v2945_v38, %v5939_v10 }
 0x13c   : > { %2775 = vrot.lane.b32.xlu0 %v4074_v52, %s4630_s14  ;;  %v826_v39 = vsel %vm4739_vm2, %v824_v0, %v825_v43  ;;  %v1237_v9 = vshrl.u32 %v6075_v30, 16  ;;  %v2976_v44 = vsel %vm2962_vm11, %v2943_v47, %v5941_v51  ;;  %v1240_v15 = vshll.u32 %v6075_v30, 16  ;;  %v6118_v51 = vld [vmem:[%s4715_s5 + $0xbc] sm:$0x1]  ;;  %v3836_v43 = vld [vmem:[%s4715_s5 + $0xc0] sm:$0xe] }
 0x13d   : > { %v819_v45 = vsel %vm4739_vm2, %v817_v53, %v818_v36  ;;  %v1250_v3 = vshrl.u32 %v6082_v58, 16  ;;  %2187 = vrot.lane.b32.xlu1 %v3964_v50, %s4626_s13  ;;  %v3980_v10 = vcombine.low %v823_v23, %v826_v39  ;;  %v1213_v49 = vshrl.u32 %v3801_v7, 16  ;;  %v4487_v52 = vld [vmem:[%s4715_s5 + $0x60] sm:$0xf]  ;;  %v4488_v47 = vld [vmem:[%s4715_s5 + $0x64] sm:$0xf] }
 0x13e   : > { %v3979_v41 = vcombine.low %v816_v12, %v819_v45  ;;  %v1239_v6 = vrot.slane %v1237_v9, 4  ;;  %v1242_v37 = vrot.slane %v1240_v15, 5  ;;  %v3996_v55 = vcombine.low %v6075_v30, %v6082_v58  ;;  %v3835_v23 = vld [vmem:[%s4715_s5 + $0xb4] sm:$0xe] }
 0x13f   : > { %v1216_v2 = vshll.u32 %v3801_v7, 16  ;;  %v1226_v29 = vshrl.u32 %v6100_v22, 16  ;;  %v1215_v60 = vrot.slane %v1213_v49, 4  ;;  %v3995_v4 = vcombine.low %v3801_v7, %v6100_v22 }
 0x140   : > { %2265 = vrot.lane.b32.xlu0 %v3979_v41, %s4625_s8  ;;  %v3011_v46 = vsel %vm2995_vm12, %v2978_v54, %v5977_v8  ;;  %v1246_v40 = vshll.u32 %v6082_v58, 16  ;;  %v1243_v38 = vor.u32 %v1242_v37, %v1239_v6  ;;  %v1252_v13 = vrot.slane %v1250_v3, 4  ;;  %v6157_v41 = vld [vmem:[%s4715_s5 + $0xcc] sm:$0xf] }
 0x141   : > { %v1218_v16 = vrot.slane %v1216_v2, 5  ;;  %v1256_v35 = vshll.u32 %v6112_v48, 16  ;;  %v6126_v62 = vpop.permute.xlu1 %2431  ;;  %2267 = vrot.lane.b32.xlu1 %v3980_v10, %s4625_s8  ;;  %v1222_v18 = vshll.u32 %v6100_v22, 16  ;;  %v1228_v25 = vrot.slane %v1226_v29, 4  ;;  %v4490_v29 = vld [vmem:[%s4715_s5 + $0x70] sm:$0xf] }
 0x142   : > { %v1248_v63 = vrot.slane %v1246_v40, 5  ;;  %v1232_v8 = vshll.u32 %v6118_v51, 16  ;;  %v6132_v56 = vpop.permute.xlu0 %2429  ;;  %v3009_v32 = vsel %vm2995_vm12, %v2976_v44, %v5971_v57  ;;  %v1244_v14 = vrot.slane %v1243_v38, 4  ;;  %s4172_s8 = sshll.u32 %s4681_s19, 11 }
 0x143   : > { %v1258_v24 = vrot.slane %v1256_v35, 5  ;;  %v1219_v36 = vor.u32 %v1218_v16, %v1215_v60  ;;  %v1224_v27 = vrot.slane %v1222_v18, 5  ;;  %v3941_v0 = vcombine.low %v4487_v52, %v4488_v47  ;;  %v6168_v60 = vld [vmem:[%s4715_s5 + $0xd0] sm:$0xf]  ;;  %v6179_v35 = vld [vmem:[%s4715_s5 + $0xc4] sm:$0xf] }
 0x144   : > { %2361 = vrot.lane.b32.xlu0 %v3995_v4, %s4623_s6  ;;  %v1253_v30 = vor.u32 %v1252_v13, %v1248_v63  ;;  %v3042_v61 = vsel %vm3028_vm13, %v3009_v32, %v6002_v59  ;;  %v1249_v12 = vsel %vm4789_vm5, %v1244_v14, %v1248_v63  ;;  %v1234_v57 = vrot.slane %v1232_v8, 5  ;;  %v3881_v13 = vld [vmem:[%s4715_s5 + $0xc0] sm:$0xf]  ;;  %v3900_v52 = vld [vmem:[%s4715_s5 + $0xd4] sm:$0x1] }
 0x145   : > { %v1220_v53 = vrot.slane %v1219_v36, 4  ;;  %v3852_v7 = vrot.slane %v3836_v43, 9  ;;  %4320 = vmatprep.mubr.msk.bf16.mxu0 %vm3061_vm14, %v3042_v61  ;;  %v6145_v50 = vpop.permute.xlu1 %2511  ;;  %2363 = vrot.lane.b32.xlu1 %v3996_v55, %s4623_s6  ;;  %v1229_v54 = vor.u32 %v1228_v25, %v1224_v27  ;;  %v1431_v9 = vrot.slane %v6082_v58, 5  ;;  %s6287_s6 = sand.u32 1, %s4613_s16  }
 0x146   : > { %v1254_v39 = vrot.slane %v1253_v30, 4  ;;  %v1434_v59 = vrot.slane %v6112_v48, 5  ;;  %v6150_v45 = vpop.permute.xlu0 %2509  ;;  %v3851_v15 = vrot.slane %v3835_v23, 9  ;;  %v1424_v3 = vrot.slane %v6100_v22, 5  ;;  %v4489_v22 = vld [vmem:[%s4715_s5 + $0x6c] sm:$0xf] }
 0x147   : > { %v1225_v44 = vsel %vm4789_vm5, %v1220_v53, %v1224_v27  ;;  %v1427_v10 = vrot.slane %v6118_v51, 5  ;;  %v1230_v6 = vrot.slane %v1229_v54, 4  ;;  %v1432_v49 = vsel %vm4739_vm2, %v3852_v7, %v1431_v9  ;;  %v3899_v23 = vld [vmem:[%s4715_s5 + $0xc8] sm:$0x1]  ;;  %s3589_s10 = scalar_lea.sflag [#allocation3], %s6287_s6 }
 0x148   : > { %v1259_v58 = vsel %vm4789_vm5, %v1254_v39, %v1258_v24  ;;  %v1433_v48 = vrot.slane %v1431_v9, 4  ;;  %v1425_v55 = vsel %vm4739_vm2, %v3851_v15, %v1424_v3  ;;  %v1426_v2 = vrot.slane %v1424_v3, 4 }
 0x149   : > { %v4012_v37 = vcombine.low %v1249_v12, %v1259_v58  ;;  %v3942_v51 = vcombine.low %v4489_v22, %v4490_v29  ;;  %v1235_v4 = vsel %vm4789_vm5, %v1230_v6, %v1234_v57  ;;  %v3044_v16 = vsel %vm3028_vm13, %v3011_v46, %v6033_v34  ;;  %v6186_v43 = vpop.permute.xlu1 %2607 }
 0x14a   : > { %v1435_v40 = vsel %vm4739_vm2, %v1433_v48, %v1434_v59  ;;  %v1846_v38 = vshrl.u32 %v6157_v41, 16  ;;  %v4011_v63 = vcombine.low %v1225_v44, %v1235_v4  ;;  %v2808_v18 = vsel %vm2781_vm6, %v3941_v0, %v6008_v31  ;;  %v6188_v32 = vpop.permute.xlu0 %2605  ;;  %4321 = vmatmul.mubr.msk.bf16.gmra.mrb[12].mxu0 %vm3061_vm14, %v3044_v16  ;;  %v3916_v44 = vld [vmem:[%s4715_s5 + $0xcc] sm:$0xe] }
 0x14b   : > { %2443 = vrot.lane.b32.xlu1 %v4012_v37, %s4627_s23  ;;  %v4028_v25 = vcombine.low %v1432_v49, %v1435_v40  ;;  %v1428_v8 = vsel %vm4739_vm2, %v1426_v2, %v1427_v10  ;;  %v2811_v34 = vsel %vm2781_vm6, %v3942_v51, %v6038_v28  ;;  %v1849_v14 = vshll.u32 %v6157_v41, 16 }
 0x14c   : > { %v1848_v46 = vrot.slane %v1846_v38, 4  ;;  %v1859_v24 = vshrl.u32 %v6168_v60, 16  ;;  %2441 = vrot.lane.b32.xlu0 %v4011_v63, %s4627_s23  ;;  %v4027_v31 = vcombine.low %v1425_v55, %v1428_v8  ;;  %v1822_v36 = vshrl.u32 %v3881_v13, 16  ;;  %v3915_v55 = vld [vmem:[%s4715_s5 + $0xc0] sm:$0xe] }
 0x14d   : > { %v1825_v30 = vshll.u32 %v3881_v13, 16  ;;  %v1835_v27 = vshrl.u32 %v6179_v35, 16  ;;  %v1851_v47 = vrot.slane %v1849_v14, 5  ;;  %v4044_v28 = vcombine.low %v6157_v41, %v6168_v60 }
 0x14e   : > { %v4043_v0 = vcombine.low %v3881_v13, %v6179_v35  ;;  %v2850_v61 = vsel %vm2830_vm7, %v2811_v34, %v6057_v20  ;;  %v1824_v12 = vrot.slane %v1822_v36, 4  ;;  %v1855_v57 = vshll.u32 %v6168_v60, 16 }
 0x14f   : > { %2523 = vrot.lane.b32.xlu1 %v4028_v25, %s4624_s7  ;;  %v1827_v53 = vrot.slane %v1825_v30, 5  ;;  %v1861_v7 = vrot.slane %v1859_v24, 4  ;;  %v1852_v39 = vor.u32 %v1851_v47, %v1848_v46  ;;  %v1865_v54 = vshll.u32 %v3900_v52, 16  ;;  %v2688_v41 = vpop.permute.xlu1 %2687 }
 0x150   : > { %v1831_v9 = vshll.u32 %v6179_v35, 16  ;;  %v1837_v59 = vrot.slane %v1835_v27, 4  ;;  %2521 = vrot.lane.b32.xlu0 %v4027_v31, %s4624_s7  ;;  %v2848_v20 = vsel %vm2830_vm7, %v2808_v18, %v6064_v5  ;;  %v1857_v15 = vrot.slane %v1855_v57, 5  ;;  %v2686_v58 = vpop.permute.xlu0 %2685  ;;  %s3755_s7 = sshll.u32 %s6287_s6, 7 }
 0x151   : > { %v1828_v3 = vor.u32 %v1827_v53, %v1824_v12  ;;  %v1841_v10 = vshll.u32 %v3899_v23, 16  ;;  %v1853_v6 = vrot.slane %v1852_v39, 4  ;;  %v1867_v49 = vrot.slane %v1865_v54, 5 }
 0x152   : > { %v1833_v48 = vrot.slane %v1831_v9, 5  ;;  %v2883_v37 = vsel %vm2863_vm8, %v2850_v61, %v6091_v19  ;;  %v1862_v2 = vor.u32 %v1861_v7, %v1857_v15  ;;  %v2881_v29 = vsel %vm2863_vm8, %v2848_v20, %v6102_v42 }
 0x153   : > { %2619 = vrot.lane.b32.xlu1 %v4044_v28, %s4628_s29  ;;  %v1829_v22 = vrot.slane %v1828_v3, 4  ;;  %v3932_v5 = vrot.slane %v3916_v44, 9  ;;  %v1843_v4 = vrot.slane %v1841_v10, 5  ;;  %v2040_v40 = vrot.slane %v6168_v60, 5 }
 0x154   : > { %v1838_v51 = vor.u32 %v1837_v59, %v1833_v48  ;;  %v2043_v16 = vrot.slane %v3900_v52, 5  ;;  %2617 = vrot.lane.b32.xlu0 %v4043_v0, %s4628_s29  ;;  %v1858_v38 = vsel %vm4789_vm5, %v1853_v6, %v1857_v15  ;;  %v1863_v19 = vrot.slane %v1862_v2, 4  ;;  %v2766_v18 = vpop.permute.xlu0 %2765 }
 0x155   : > { %v3931_v13 = vrot.slane %v3915_v55, 9  ;;  %v2033_v63 = vrot.slane %v6179_v35, 5  ;;  %v1834_v25 = vsel %vm4789_vm5, %v1829_v22, %v1833_v48  ;;  %v2042_v8 = vrot.slane %v2040_v40, 4  ;;  %v2178_v31 = vpop.permute.xlu1 %2177  ;;  %v4493_v22 = vld [vmem:[%s4715_s5 + $0x84] sm:$0xf] }
 0x156   : > { %v1839_v42 = vrot.slane %v1838_v51, 4  ;;  %v2036_v34 = vrot.slane %v3899_v23, 5  ;;  %v1868_v60 = vsel %vm4789_vm5, %v1863_v19, %v1867_v49  ;;  %v2041_v46 = vsel %vm4739_vm2, %v3932_v5, %v2040_v40 }
 0x157   : > { %v2034_v14 = vsel %vm4739_vm2, %v3931_v13, %v2033_v63  ;;  %v2035_v24 = vrot.slane %v2033_v63, 4  ;;  %v4060_v36 = vcombine.low %v1858_v38, %v1868_v60  ;;  %v2044_v30 = vsel %vm4739_vm2, %v2042_v8, %v2043_v16 }
 0x158   : > { %v1844_v35 = vsel %vm4789_vm5, %v1839_v42, %v1843_v4  ;;  %v2916_v27 = vsel %vm2896_vm9, %v2883_v37, %v6126_v62  ;;  %v2914_v28 = vsel %vm2896_vm9, %v2881_v29, %v6132_v56  ;;  %v4076_v21 = vcombine.low %v2041_v46, %v2044_v30  ;;  %v4494_v29 = vld [vmem:[%s4715_s5 + $0x88] sm:$0xf] }
 0x159   : > { %v4059_v52 = vcombine.low %v1834_v25, %v1844_v35  ;;  %v2037_v47 = vsel %vm4739_vm2, %v2035_v24, %v2036_v34  ;;  %v2949_v0 = vsel %vm2929_vm10, %v2916_v27, %v6145_v50  ;;  %2699 = vrot.lane.b32.xlu1 %v4060_v36, %s4629_s30  ;;  %v2947_v61 = vsel %vm2929_vm10, %v2914_v28, %v6150_v45 }
 0x15a   : > { %v2982_v23 = vsel %vm2962_vm11, %v2949_v0, %v6186_v43  ;;  %v4075_v62 = vcombine.low %v2034_v14, %v2037_v47  ;;  %v2980_v17 = vsel %vm2962_vm11, %v2947_v61, %v6188_v32  ;;  %v3947_v45 = vcombine.low %v5985_v11, %v5990_v33  ;;  %v4495_v0 = vld [vmem:[%s4715_s5 + $0x90] sm:$0xf] }
 0x15b   : > { %2697 = vrot.lane.b32.xlu0 %v4059_v52, %s4629_s30  ;;  %v3015_v56 = vsel %vm2995_vm12, %v2982_v23, %v2688_v41  ;;  %v2768_v12 = vpop.permute.xlu0 %2767  ;;  %v3013_v50 = vsel %vm2995_vm12, %v2980_v17, %v2686_v58  ;;  %v3948_v43 = vcombine.low %v6016_v1, %v6023_v26  ;;  %v4491_v41 = vld [vmem:[%s4715_s5 + $0x78] sm:$0xf]  ;;  %v4492_v58 = vld [vmem:[%s4715_s5 + $0x7c] sm:$0xf]  ;;  %v3944_v5 = vcombine.low %v4493_v22, %v4494_v29  ;;  %s6355_s30 = scalar_lea.hbm %s6476_s2, %s4172_s8 }
 0x15c   : > { %v3048_v53 = vsel %vm3028_vm13, %v3015_v56, %v2768_v12  ;;  %v3046_v57 = vsel %vm3028_vm13, %v3013_v50, %v2766_v18  ;;  %v2180_v7 = vpop.permute.xlu1 %2179  ;;  %v3943_v6 = vcombine.low %v4491_v41, %v4492_v58  ;;  %v4497_v50 = vld [vmem:[%s4715_s5 + $0x9c] sm:$0xf] }
 0x15d   : > { %2779 = vrot.lane.b32.xlu1 %v4076_v21, %s4630_s14  ;;  %4324 = vmatprep.mubr.msk.bf16.mxu1 %vm3061_vm14, %v3046_v57  ;;  %v2817_v19 = vsel %vm2781_vm6, %v3944_v5, %v2180_v7  ;;  %v4496_v21 = vld [vmem:[%s4715_s5 + $0x94] sm:$0xf] }
 0x15e   : > { %4325 = vmatmul.mubr.msk.bf16.vlgmr.msra.gmra.mrb[0].mxu1 %vm3061_vm14, %v3048_v53  ;;  %v2814_v49 = vsel %vm2781_vm6, %v3943_v6, %v2178_v31  ;;  %v3945_v61 = vcombine.low %v4495_v0, %v4496_v21  ;;  %v4498_v53 = vld [vmem:[%s4715_s5 + $0xa0] sm:$0xf]  ;;  %s6299_s5 = scalar_lea.vmem [#allocation2], %s3755_s7 }
 0x15f   : > { %2777 = vrot.lane.b32.xlu0 %v4075_v62, %s4630_s14  ;;  %v2258_v32 = vpop.permute.xlu0 %2257  ;;  %v3946_v57 = vcombine.low %v4497_v50, %v4498_v53  ;;  %s3610_s13 = sshll.u32 %s6299_s5, 4  ;;  %s6357_s13 = int_to_ptr.vmem [resolvable:$true] %s3610_s13 }
 0x160   : > { %v2260_v39 = vpop.permute.xlu1 %2259  ;;  %v2852_v48 = vsel %vm2830_vm7, %v2814_v49, %v2258_v32  ;;  %s4499_s11 = scalar_lea.vmem %s6357_s13, 2048  ;;  %p4506_p0 = scmp.lt.s32.totalorder %s6357_s13, %s4504_s22 }
 0x161   : > { %v2854_v18 = vsel %vm2830_vm7, %v2817_v19, %v2260_v39  ;;  %p4500_p11 = scmp.ne.s32.totalorder %s6357_s13, %s4499_s11  ;;  %p4507_p1 = scmp.lt.s32.totalorder %s4505_s27, %s4499_s11 }
 0x163   : > { %v2354_v9 = vpop.permute.xlu0 %2353  ;;  %p4501_p12 = pnand %p4500_p11, %p4700_p5  ;;  %p4508_p2 = por %p4507_p1, %p4506_p0 }
 0x164   : > { %v2356_v54 = vpop.permute.xlu1 %2355  ;;  %v2885_v2 = vsel %vm2863_vm8, %v2852_v48, %v2354_v9 }
 0x165   : > { %v2887_v25 = vsel %vm2863_vm8, %v2854_v18, %v2356_v54  ;;  %p4502_p13 = pneg %p4501_p12 }
 0x167   : > { %p4509_p3 = pnand %p4508_p2, %p4502_p13 }
 0x16a   : > { %v2436_v59 = vpop.permute.xlu1 %2435 }
 0x16b   : > { %v2434_v44 = vpop.permute.xlu0 %2433  ;;  %v2920_v42 = vsel %vm2896_vm9, %v2887_v25, %v2436_v59 }
 0x16c   : > { %v2918_v51 = vsel %vm2896_vm9, %v2885_v2, %v2434_v44 }
 0x16e   : > { %v2516_v20 = vpop.permute.xlu1 %2515 }
 0x16f   : > { %v2514_v15 = vpop.permute.xlu0 %2513  ;;  %v2953_v8 = vsel %vm2929_vm10, %v2920_v42, %v2516_v20 }
 0x170   : > { %v2951_v4 = vsel %vm2929_vm10, %v2918_v51, %v2514_v15 }
 0x172   : > { %v2612_v3 = vpop.permute.xlu1 %2611 }
 0x173   : > { %v2610_v10 = vpop.permute.xlu0 %2609  ;;  %v2986_v34 = vsel %vm2962_vm11, %v2953_v8, %v2612_v3 }
 0x174   : > { %v2984_v40 = vsel %vm2962_vm11, %v2951_v4, %v2610_v10 }
 0x178   : > { %v2692_v37 = vpop.permute.xlu1 %2691 }
 0x179   : > { %v3019_v60 = vsel %vm2995_vm12, %v2986_v34, %v2692_v37 }
 0x17a   : > { %v2690_v55 = vpop.permute.xlu0 %2689 }
 0x17b   : > { %v3017_v16 = vsel %vm2995_vm12, %v2984_v40, %v2690_v55 }
 0x17e   : > { %v2770_v38 = vpop.permute.xlu0 %2769 }
 0x17f   : > { %v2182_v13 = vpop.permute.xlu1 %2181  ;;  %v3050_v63 = vsel %vm3028_vm13, %v3017_v16, %v2770_v38 }
 0x180   : > { %4328 = vmatprep.mubr.msk.bf16.mxu1 %vm3061_vm14, %v3050_v63  ;;  %v2820_v17 = vsel %vm2781_vm6, %v3945_v61, %v2182_v13 }
 0x185   : > { %v2772_v14 = vpop.permute.xlu0 %2771 }
 0x186   : > { %v2184_v46 = vpop.permute.xlu1 %2183  ;;  %v3052_v24 = vsel %vm3028_vm13, %v3019_v60, %v2772_v14 }
 0x187   : > { %4329 = vmatmul.mubr.msk.bf16.gmra.mrb[4].mxu1 %vm3061_vm14, %v3052_v24  ;;  %v2823_v6 = vsel %vm2781_vm6, %v3946_v57, %v2184_v46 }
 0x189   : > { %v2262_v36 = vpop.permute.xlu0 %2261 }
 0x18a   : > { %v2264_v31 = vpop.permute.xlu1 %2263  ;;  %v2856_v56 = vsel %vm2830_vm7, %v2820_v17, %v2262_v36 }
 0x18b   : > { %v2858_v29 = vsel %vm2830_vm7, %v2823_v6, %v2264_v31 }
 0x18d   : > { %v2358_v30 = vpop.permute.xlu0 %2357 }
 0x18e   : > { %v2360_v35 = vpop.permute.xlu1 %2359  ;;  %v2889_v7 = vsel %vm2863_vm8, %v2856_v56, %v2358_v30 }
 0x18f   : > { %v2891_v51 = vsel %vm2863_vm8, %v2858_v29, %v2360_v35 }
 0x194   : > { %v2440_v27 = vpop.permute.xlu1 %2439 }
 0x195   : > { %v2438_v52 = vpop.permute.xlu0 %2437  ;;  %v2924_v19 = vsel %vm2896_vm9, %v2891_v51, %v2440_v27 }
 0x196   : > { %v2922_v54 = vsel %vm2896_vm9, %v2889_v7, %v2438_v52 }
 0x198   : > { %v2520_v47 = vpop.permute.xlu1 %2519 }
 0x199   : > { %v2518_v28 = vpop.permute.xlu0 %2517  ;;  %v2957_v13 = vsel %vm2929_vm10, %v2924_v19, %v2520_v47 }
 0x19a   : > { %v2955_v44 = vsel %vm2929_vm10, %v2922_v54, %v2518_v28 }
 0x19c   : > { %v2616_v23 = vpop.permute.xlu1 %2615 }
 0x19d   : > { %v2614_v62 = vpop.permute.xlu0 %2613  ;;  %v2990_v18 = vsel %vm2962_vm11, %v2957_v13, %v2616_v23 }
 0x19e   : > { %v2988_v49 = vsel %vm2962_vm11, %v2955_v44, %v2614_v62 }
 0x1a1   : > { %v4310_v12 = vpop.f32.mrb[0].mxu0 }
 0x1a2   : > { %v2696_v32 = vpop.permute.xlu1 %2695  ;;  %v3193_v39 = vpop.f32.mrb[1].mxu0  ;;  %v3520_v55 = vmul.f32 %v4310_v12, %v4310_v12 }
 0x1a3   : > { %v2694_v9 = vpop.permute.xlu0 %2693  ;;  %v4311_v59 = vpop.f32.mrb[2].mxu0  ;;  %v3518_v3 = vmul.f32 %v3193_v39, %v3193_v39  ;;  %v3023_v25 = vsel %vm2995_vm12, %v2990_v18, %v2696_v32 }
 0x1a4   : > { %v4181_v20 = vpack.c.bf16 %v4311_v59, %v4310_v12  ;;  %v3196_v15 = vpop.f32.mrb[3].mxu0  ;;  %v3021_v48 = vsel %vm2995_vm12, %v2988_v49, %v2694_v9  ;;  %v3521_v40 = vmul.f32 %v4311_v59, %v4311_v59 }
 0x1a5   : > { %v4176_v10 = vpack.c.bf16 %v3196_v15, %v3193_v39  ;;  %v3480_v41 = vadd.f32 %v3196_v15, %v3193_v39  ;;  %v3519_v58 = vmul.f32 %v3196_v15, %v3196_v15 }
 0x1a6   : > { %4253 = vst [vmem:[%s6299_s5 + $0x8] sm:$0xff] %v4181_v20  }
 0x1a7   : > { %v2774_v37 = vpop.permute.xlu0 %2773  ;;  %4177 = vst [vmem:[%s6299_s5] sm:$0xff] %v4176_v10   ;;  %v3481_v2 = vadd.f32 %v4310_v12, %v3480_v41  ;;  %v3550_v22 = vadd.f32 %v3519_v58, %v3518_v3 }
 0x1a8   : > { %v3054_v5 = vsel %vm3028_vm13, %v3021_v48, %v2774_v37  ;;  %v2186_v4 = vpop.permute.xlu1 %2185 }
 0x1a9   : > { %4332 = vmatprep.mubr.msk.bf16.mxu1 %vm3061_vm14, %v3054_v5  ;;  %v3551_v16 = vadd.f32 %v3550_v22, %v3520_v55  ;;  %v3482_v38 = vadd.f32 %v4311_v59, %v3481_v2  ;;  %v2826_v28 = vsel %vm2781_vm6, %v3947_v45, %v2186_v4 }
 0x1ab   : > { %v3552_v63 = vadd.f32 %v3551_v16, %v3521_v40 }
 0x1ae   : > { %v2776_v42 = vpop.permute.xlu0 %2775 }
 0x1af   : > { %v3056_v8 = vsel %vm3028_vm13, %v3023_v25, %v2776_v42  ;;  %v2188_v34 = vpop.permute.xlu1 %2187 }
 0x1b0   : > { %4333 = vmatmul.mubr.msk.bf16.gmra.mrb[8].mxu1 %vm3061_vm14, %v3056_v8  ;;  %v2829_v47 = vsel %vm2781_vm6, %v3948_v43, %v2188_v34 }
 0x1b2   : > { %v2266_v60 = vpop.permute.xlu0 %2265 }
 0x1b3   : > { %v2268_v46 = vpop.permute.xlu1 %2267  ;;  %v2860_v21 = vsel %vm2830_vm7, %v2826_v28, %v2266_v60 }
 0x1b4   : > { %v2862_v0 = vsel %vm2830_vm7, %v2829_v47, %v2268_v46 }
 0x1b6   : > { %v2362_v24 = vpop.permute.xlu0 %2361 }
 0x1b7   : > { %v2364_v14 = vpop.permute.xlu1 %2363  ;;  %v2893_v23 = vsel %vm2863_vm8, %v2860_v21, %v2362_v24 }
 0x1b8   : > { %v2895_v61 = vsel %vm2863_vm8, %v2862_v0, %v2364_v14 }
 0x1bd   : > { %v2444_v31 = vpop.permute.xlu1 %2443 }
 0x1be   : > { %v2442_v36 = vpop.permute.xlu0 %2441  ;;  %v2928_v62 = vsel %vm2896_vm9, %v2895_v61, %v2444_v31 }
 0x1bf   : > { %v2926_v1 = vsel %vm2896_vm9, %v2893_v23, %v2442_v36 }
 0x1c1   : > { %v2524_v35 = vpop.permute.xlu1 %2523 }
 0x1c2   : > { %v2522_v30 = vpop.permute.xlu0 %2521  ;;  %v2961_v26 = vsel %vm2929_vm10, %v2928_v62, %v2524_v35 }
 0x1c3   : > { %v2959_v33 = vsel %vm2929_vm10, %v2926_v1, %v2522_v30 }
 0x1c5   : > { %v2620_v27 = vpop.permute.xlu1 %2619 }
 0x1c6   : > { %v2618_v52 = vpop.permute.xlu0 %2617  ;;  %v2994_v45 = vsel %vm2962_vm11, %v2961_v26, %v2620_v27 }
 0x1c7   : > { %v2992_v57 = vsel %vm2962_vm11, %v2959_v33, %v2618_v52 }
 0x1ca   : > { %v4314_v56 = vpop.f32.mrb[4].mxu0 }
 0x1cb   : > { %v2700_v17 = vpop.permute.xlu1 %2699  ;;  %v3209_v11 = vpop.f32.mrb[5].mxu0  ;;  %v3524_v58 = vmul.f32 %v4314_v56, %v4314_v56 }
 0x1cc   : > { %v3483_v12 = vadd.f32 %v3482_v38, %v3209_v11  ;;  %v3522_v50 = vmul.f32 %v3209_v11, %v3209_v11  ;;  %v4315_v53 = vpop.f32.mrb[6].mxu0  ;;  %v3027_v7 = vsel %vm2995_vm12, %v2994_v45, %v2700_v17 }
 0x1cd   : > { %v2698_v43 = vpop.permute.xlu0 %2697  ;;  %v4191_v32 = vpack.c.bf16 %v4315_v53, %v4314_v56  ;;  %v3212_v39 = vpop.f32.mrb[7].mxu0  ;;  %v3525_v48 = vmul.f32 %v4315_v53, %v4315_v53 }
 0x1ce   : > { %v3553_v9 = vadd.f32 %v3552_v63, %v3522_v50  ;;  %v4186_v59 = vpack.c.bf16 %v3212_v39, %v3209_v11  ;;  %v3484_v44 = vadd.f32 %v3483_v12, %v3212_v39  ;;  %v3523_v20 = vmul.f32 %v3212_v39, %v3212_v39 }
 0x1cf   : > { %v2780_v54 = vpop.permute.xlu1 %2779  ;;  %v3025_v15 = vsel %vm2995_vm12, %v2992_v57, %v2698_v43  ;;  %4255 = vst [vmem:[%s6299_s5 + $0x18] sm:$0xff] %v4191_v32  }
 0x1d0   : > { %v3060_v3 = vsel %vm3028_vm13, %v3027_v7, %v2780_v54  ;;  %4254 = vst [vmem:[%s6299_s5 + $0x10] sm:$0xff] %v4186_v59   ;;  %v3485_v6 = vadd.f32 %v4314_v56, %v3484_v44  ;;  %v3554_v49 = vadd.f32 %v3553_v9, %v3523_v20 }
 0x1d1   : > { %v2778_v10 = vpop.permute.xlu0 %2777 }
 0x1d2   : > { %v3058_v41 = vsel %vm3028_vm13, %v3025_v15, %v2778_v10  ;;  %v3555_v37 = vadd.f32 %v3554_v49, %v3524_v58  ;;  %v3486_v55 = vadd.f32 %v4315_v53, %v3485_v6 }
 0x1d3   : > { %4336 = vmatprep.mubr.msk.bf16.mxu1 %vm3061_vm14, %v3058_v41 }
 0x1d4   : > { %4337 = vmatmul.mubr.msk.bf16.gmra.mrb[12].mxu1 %vm3061_vm14, %v3060_v3  ;;  %v3556_v2 = vadd.f32 %v3555_v37, %v3525_v48 }
 0x1f3   : > { %v4318_v22 = vpop.f32.mrb[8].mxu0 }
 0x1f4   : > { %v3225_v29 = vpop.f32.mrb[9].mxu0  ;;  %v3528_v18 = vmul.f32 %v4318_v22, %v4318_v22 }
 0x1f5   : > { %v3487_v5 = vadd.f32 %v3486_v55, %v3225_v29  ;;  %v3526_v51 = vmul.f32 %v3225_v29, %v3225_v29  ;;  %v4319_v4 = vpop.f32.mrb[10].mxu0 }
 0x1f6   : > { %v4201_v40 = vpack.c.bf16 %v4319_v4, %v4318_v22  ;;  %v3228_v16 = vpop.f32.mrb[11].mxu0  ;;  %v3529_v8 = vmul.f32 %v4319_v4, %v4319_v4 }
 0x1f7   : > { %v3557_v38 = vadd.f32 %v3556_v2, %v3526_v51  ;;  %v4196_v19 = vpack.c.bf16 %v3228_v16, %v3225_v29  ;;  %v3488_v13 = vadd.f32 %v3487_v5, %v3228_v16  ;;  %v3527_v63 = vmul.f32 %v3228_v16, %v3228_v16 }
 0x1f8   : > { %4257 = vst [vmem:[%s6299_s5 + $0x28] sm:$0xff] %v4201_v40  }
 0x1f9   : > { %4256 = vst [vmem:[%s6299_s5 + $0x20] sm:$0xff] %v4196_v19   ;;  %v3489_v25 = vadd.f32 %v4318_v22, %v3488_v13  ;;  %v3558_v42 = vadd.f32 %v3557_v38, %v3527_v63 }
 0x1fb   : > { %v3559_v34 = vadd.f32 %v3558_v42, %v3528_v18  ;;  %v3490_v60 = vadd.f32 %v4319_v4, %v3489_v25 }
 0x1fd   : > { %v3560_v46 = vadd.f32 %v3559_v34, %v3529_v8 }
 0x21d   : > { %v4322_v14 = vpop.f32.mrb[12].mxu0 }
 0x21e   : > { %v3241_v24 = vpop.f32.mrb[13].mxu0  ;;  %v3532_v21 = vmul.f32 %v4322_v14, %v4322_v14 }
 0x21f   : > { %v3491_v31 = vadd.f32 %v3490_v60, %v3241_v24  ;;  %v3530_v36 = vmul.f32 %v3241_v24, %v3241_v24  ;;  %v4323_v35 = vpop.f32.mrb[14].mxu0 }
 0x220   : > { %v4211_v30 = vpack.c.bf16 %v4323_v35, %v4322_v14  ;;  %v3244_v27 = vpop.f32.mrb[15].mxu0  ;;  %v3533_v62 = vmul.f32 %v4323_v35, %v4323_v35 }
 0x221   : > { %v3561_v52 = vadd.f32 %v3560_v46, %v3530_v36  ;;  %v4206_v47 = vpack.c.bf16 %v3244_v27, %v3241_v24  ;;  %v3492_v28 = vadd.f32 %v3491_v31, %v3244_v27  ;;  %v3531_v0 = vmul.f32 %v3244_v27, %v3244_v27 }
 0x222   : > { %4259 = vst [vmem:[%s6299_s5 + $0x38] sm:$0xff] %v4211_v30  }
 0x223   : > { %4258 = vst [vmem:[%s6299_s5 + $0x30] sm:$0xff] %v4206_v47   ;;  %v3493_v61 = vadd.f32 %v4322_v14, %v3492_v28  ;;  %v3562_v23 = vadd.f32 %v3561_v52, %v3531_v0 }
 0x225   : > { %v3563_v17 = vadd.f32 %v3562_v23, %v3532_v21  ;;  %v3494_v56 = vadd.f32 %v4323_v35, %v3493_v61 }
 0x227   : > { %v3564_v1 = vadd.f32 %v3563_v17, %v3533_v62 }
 0x231   : > { %v4326_v26 = vpop.f32.mrb[0].mxu1 }
 0x232   : > { %v3257_v43 = vpop.f32.mrb[1].mxu1  ;;  %v3536_v39 = vmul.f32 %v4326_v26, %v4326_v26 }
 0x233   : > { %v3495_v11 = vadd.f32 %v3494_v56, %v3257_v43  ;;  %v3534_v33 = vmul.f32 %v3257_v43, %v3257_v43  ;;  %v4327_v45 = vpop.f32.mrb[2].mxu1 }
 0x234   : > { %v4221_v12 = vpack.c.bf16 %v4327_v45, %v4326_v26  ;;  %v3260_v50 = vpop.f32.mrb[3].mxu1  ;;  %v3537_v59 = vmul.f32 %v4327_v45, %v4327_v45 }
 0x235   : > { %v3565_v53 = vadd.f32 %v3564_v1, %v3534_v33  ;;  %v4216_v57 = vpack.c.bf16 %v3260_v50, %v3257_v43  ;;  %v3496_v7 = vadd.f32 %v3495_v11, %v3260_v50  ;;  %v3535_v32 = vmul.f32 %v3260_v50, %v3260_v50 }
 0x236   : > { %4261 = vst [vmem:[%s6299_s5 + $0x48] sm:$0xff] %v4221_v12  }
 0x237   : > { %4260 = vst [vmem:[%s6299_s5 + $0x40] sm:$0xff] %v4216_v57   ;;  %v3497_v54 = vadd.f32 %v4326_v26, %v3496_v7  ;;  %v3566_v9 = vadd.f32 %v3565_v53, %v3535_v32 }
 0x239   : > { %v3567_v44 = vadd.f32 %v3566_v9, %v3536_v39  ;;  %v3498_v20 = vadd.f32 %v4327_v45, %v3497_v54 }
 0x23b   : > { %v3568_v15 = vadd.f32 %v3567_v44, %v3537_v59 }
 0x25a   : > { %v4330_v3 = vpop.f32.mrb[4].mxu1 }
 0x25b   : > { %v3273_v10 = vpop.f32.mrb[5].mxu1  ;;  %v3540_v29 = vmul.f32 %v4330_v3, %v4330_v3 }
 0x25c   : > { %v3499_v41 = vadd.f32 %v3498_v20, %v3273_v10  ;;  %v3538_v58 = vmul.f32 %v3273_v10, %v3273_v10  ;;  %v4331_v6 = vpop.f32.mrb[6].mxu1 }
 0x25d   : > { %v4231_v49 = vpack.c.bf16 %v4331_v6, %v4330_v3  ;;  %v3276_v48 = vpop.f32.mrb[7].mxu1  ;;  %v3541_v4 = vmul.f32 %v4331_v6, %v4331_v6 }
 0x25e   : > { %v3569_v37 = vadd.f32 %v3568_v15, %v3538_v58  ;;  %v4226_v55 = vpack.c.bf16 %v3276_v48, %v3273_v10  ;;  %v3500_v2 = vadd.f32 %v3499_v41, %v3276_v48  ;;  %v3539_v22 = vmul.f32 %v3276_v48, %v3276_v48 }
 0x25f   : > { %4263 = vst [vmem:[%s6299_s5 + $0x58] sm:$0xff] %v4231_v49  }
 0x260   : > { %4262 = vst [vmem:[%s6299_s5 + $0x50] sm:$0xff] %v4226_v55   ;;  %v3501_v5 = vadd.f32 %v4330_v3, %v3500_v2  ;;  %v3570_v51 = vadd.f32 %v3569_v37, %v3539_v22 }
 0x262   : > { %v3571_v40 = vadd.f32 %v3570_v51, %v3540_v29  ;;  %v3502_v16 = vadd.f32 %v4331_v6, %v3501_v5 }
 0x264   : > { %v3572_v38 = vadd.f32 %v3571_v40, %v3541_v4 }
 0x283   : > { %v4334_v19 = vpop.f32.mrb[8].mxu1 }
 0x284   : > { %v3289_v13 = vpop.f32.mrb[9].mxu1  ;;  %v3544_v24 = vmul.f32 %v4334_v19, %v4334_v19 }
 0x285   : > { %v3503_v63 = vadd.f32 %v3502_v16, %v3289_v13  ;;  %v3542_v18 = vmul.f32 %v3289_v13, %v3289_v13  ;;  %v4335_v25 = vpop.f32.mrb[10].mxu1 }
 0x286   : > { %v4241_v42 = vpack.c.bf16 %v4335_v25, %v4334_v19  ;;  %v3292_v8 = vpop.f32.mrb[11].mxu1  ;;  %v3545_v35 = vmul.f32 %v4335_v25, %v4335_v25 }
 0x287   : > { %v3573_v34 = vadd.f32 %v3572_v38, %v3542_v18  ;;  %v4236_v60 = vpack.c.bf16 %v3292_v8, %v3289_v13  ;;  %v3504_v46 = vadd.f32 %v3503_v63, %v3292_v8  ;;  %v3543_v14 = vmul.f32 %v3292_v8, %v3292_v8 }
 0x288   : > { %4265 = vst [vmem:[%s6299_s5 + $0x68] sm:$0xff] %v4241_v42  }
 0x289   : > { %4264 = vst [vmem:[%s6299_s5 + $0x60] sm:$0xff] %v4236_v60   ;;  %v3505_v31 = vadd.f32 %v4334_v19, %v3504_v46  ;;  %v3574_v36 = vadd.f32 %v3573_v34, %v3543_v14 }
 0x28b   : > { %v3575_v30 = vadd.f32 %v3574_v36, %v3544_v24  ;;  %v3506_v27 = vadd.f32 %v4335_v25, %v3505_v31 }
 0x28d   : > { %v3576_v52 = vadd.f32 %v3575_v30, %v3545_v35 }
 0x2a7   : > { %v4338_v47 = vpop.f32.mrb[12].mxu1 }
 0x2a8   : > { %v3305_v28 = vpop.f32.mrb[13].mxu1  ;;  %v3548_v43 = vmul.f32 %v4338_v47, %v4338_v47 }
 0x2a9   : > { %v3507_v0 = vadd.f32 %v3506_v27, %v3305_v28  ;;  %v3546_v21 = vmul.f32 %v3305_v28, %v3305_v28  ;;  %v4339_v61 = vpop.f32.mrb[14].mxu1 }
 0x2aa   : > { %v4251_v23 = vpack.c.bf16 %v4339_v61, %v4338_v47  ;;  %v3308_v62 = vpop.f32.mrb[15].mxu1 }
 0x2ab   : > { %v3577_v17 = vadd.f32 %v3576_v52, %v3546_v21  ;;  %v4246_v56 = vpack.c.bf16 %v3308_v62, %v3305_v28  ;;  %v3508_v1 = vadd.f32 %v3507_v0, %v3308_v62  ;;  %v3547_v26 = vmul.f32 %v3308_v62, %v3308_v62 }
 0x2ac   : > { %4267 = vst [vmem:[%s6299_s5 + $0x78] sm:$0xff] %v4251_v23  }
 0x2ad   : > { %4266 = vst [vmem:[%s6299_s5 + $0x70] sm:$0xff] %v4246_v56   ;;  %v3509_v11 = vadd.f32 %v4338_v47, %v3508_v1  ;;  %v3578_v33 = vadd.f32 %v3577_v17, %v3547_v26 }
 0x2ae   : > { %4512 = shalt.err (!%p4509_p3)
}
 0x2af   : > { %s4513_s28 = scalar_lea.hbm %s6355_s30, 2048  ;;  %s4517_s5 = scalar_lea.hbm %s6476_s2, 4096 }
 0x2b0   : > { %p4514_p4 = scmp.ne.s32.totalorder %s6355_s30, %s4513_s28  ;;  %p4518_p9 = scmp.lt.u32.totalorder %s6355_s30, %s6476_s2 }
 0x2b1   : > { %p4519_p10 = scmp.lt.u32.totalorder %s4517_s5, %s4513_s28  ;;  %p4521_p12 = scmp.lt.u32.totalorder %s4513_s28, %s6355_s30 }
 0x2b2   : > { %p4515_p7 = pnand %p4514_p4, %p4700_p5 }
 0x2b3   : > { %p4520_p11 = por %p4519_p10, %p4518_p9 }
 0x2b4   : > { %p4516_p8 = pneg %p4515_p7 }
 0x2b5   : > { %p4522_p13 = por %p4521_p12, %p4520_p11 }
 0x2b7   : > { %p4523_p0 = pnand %p4522_p13, %p4516_p8 }
 0x2b9   : > { %4526 = shalt.err (!%p4523_p0)
}
 0x2ba   : > { %s4632_s29 = smov 4   ;;  %v3549_v45 = vmul.f32 %v4339_v61, %v4339_v61  ;;  %v3510_v12 = vadd.f32 %v4339_v61, %v3509_v11  ;;  %v3579_v50 = vadd.f32 %v3578_v33, %v3548_v43  ;;  %s3593_s11 = sand.u32 1, %s4681_s19  }
 0x2bb   : > { %4357 = dma.vmem_to_hbm [thread:$0]  (%p4700_p5), %s6357_s13, 2048, %s6355_s30, %s3589_s10, %s4630_s14, %s4630_s14, %s4632_s29  }
 0x2bc   : > { %v3511_v53 = vrot.slane %v3510_v12, 4  ;;  %v3580_v57 = vadd.f32 %v3579_v50, %v3549_v45  ;;  %s4136_s12 = sshll.u32 %s4681_s19, 4  ;;  %s200_s22 = scalar_lea.vmem [#allocation4], %s6287_s6 }
 0x2bd   : > { %s3626_s27 = sshll.u32 %s200_s22, 4  ;;  %s206_s14 = scalar_lea.vmem [#allocation6], %s6287_s6  ;;  %s6398_s27 = int_to_ptr.vmem [resolvable:$true] %s3626_s27 }
 0x2be   : > { %v3512_v7 = vadd.f32 %v3511_v53, %v3510_v12  ;;  %v3581_v32 = vrot.slane %v3580_v57, 4  ;;  %s3639_s13 = sshll.u32 %s206_s14, 4  ;;  %s6396_s28 = scalar_lea.hbm %s6477_s3, %s4136_s12  ;;  %s6405_s13 = int_to_ptr.vmem [resolvable:$true] %s3639_s13 }
 0x2bf   : > { %s6403_s7 = scalar_lea.hbm %s6478_s4, %s4136_s12  ;;  %s6407_s5 = scalar_lea.sflag [#allocation5], %s3593_s11 }
 0x2c0   : > { %v3582_v39 = vadd.f32 %v3581_v32, %v3580_v57  ;;  %v3513_v54 = vrot.slane %v3512_v7, 2  ;;  %s4527_s8 = scalar_lea.vmem %s6398_s27, 16  ;;  %s4633_s23 = smov [#allocation4]  }
 0x2c1   : > { %p4528_p1 = scmp.ne.s32.totalorder %s6398_s27, %s4527_s8  ;;  %s4531_s29 = sshll.u32 %s4633_s23, 4  ;;  %s4532_s29 = int_to_ptr.vmem [resolvable:$false] %s4531_s29 }
 0x2c2   : > { %v3514_v9 = vadd.f32 %v3513_v54, %v3512_v7  ;;  %v3583_v59 = vrot.slane %v3582_v39, 2  ;;  %s4533_s30 = scalar_lea.vmem %s4532_s29, 32  ;;  %p4534_p4 = scmp.lt.s32.totalorder %s6398_s27, %s4532_s29 }
 0x2c3   : > { %p4529_p2 = pnand %p4528_p1, %p4700_p5  ;;  %p4535_p7 = scmp.lt.s32.totalorder %s4533_s30, %s4527_s8 }
 0x2c4   : > { %v3515_v44 = vrot.slane %v3514_v9, 1  ;;  %v3584_v20 = vadd.f32 %v3583_v59, %v3582_v39 }
 0x2c5   : > { %p4530_p3 = pneg %p4529_p2  ;;  %p4536_p8 = por %p4535_p7, %p4534_p4 }
 0x2c6   : > { %v3516_v15 = vadd.f32 %v3515_v44, %v3514_v9  ;;  %v3585_v3 = vrot.slane %v3584_v20, 1 }
 0x2c7   : > { %p4537_p9 = pnand %p4536_p8, %p4530_p3 }
 0x2c8   : > { %3517 = vst [vmem:[%s200_s22] sm:$0x1] %v3516_v15  ;;  %v3586_v10 = vadd.f32 %v3585_v3, %v3584_v20 }
 0x2c9   : > { %4540 = shalt.err (!%p4537_p9)
}
 0x2ca   : > { %s4541_s11 = scalar_lea.hbm %s6396_s28, 16  ;;  %s4545_s10 = scalar_lea.hbm %s6477_s3, 32 }
 0x2cb   : > { %p4542_p10 = scmp.ne.s32.totalorder %s6396_s28, %s4541_s11  ;;  %p4546_p13 = scmp.lt.u32.totalorder %s6396_s28, %s6477_s3 }
 0x2cc   : > { %p4547_p0 = scmp.lt.u32.totalorder %s4545_s10, %s4541_s11  ;;  %p4549_p2 = scmp.lt.u32.totalorder %s4541_s11, %s6396_s28 }
 0x2cd   : > { %p4543_p11 = pnand %p4542_p10, %p4700_p5 }
 0x2ce   : > { %p4548_p1 = por %p4547_p0, %p4546_p13 }
 0x2cf   : > { %p4544_p12 = pneg %p4543_p11 }
 0x2d0   : > { %p4550_p3 = por %p4549_p2, %p4548_p1 }
 0x2d2   : > { %p4551_p4 = pnand %p4550_p3, %p4544_p12 }
 0x2d4   : > { %4554 = shalt.err (!%p4551_p4)
}
 0x2d5   : > { %4358 = dma.vmem_to_hbm [thread:$0]  (%p4700_p5), %s6398_s27, 16, %s6396_s28, %s6407_s5   ;;  %3587 = vst [vmem:[%s206_s14] sm:$0x1] %v3586_v10 }
 0x2d6   : > { %s4555_s8 = scalar_lea.vmem %s6405_s13, 16  ;;  %s4634_s23 = smov [#allocation6]  }
 0x2d7   : > { %p4556_p7 = scmp.ne.s32.totalorder %s6405_s13, %s4555_s8  ;;  %s4559_s29 = sshll.u32 %s4634_s23, 4  ;;  %s4560_s29 = int_to_ptr.vmem [resolvable:$false] %s4559_s29 }
 0x2d8   : > { %s4561_s30 = scalar_lea.vmem %s4560_s29, 32  ;;  %p4562_p10 = scmp.lt.s32.totalorder %s6405_s13, %s4560_s29 }
 0x2d9   : > { %p4557_p8 = pnand %p4556_p7, %p4700_p5  ;;  %p4563_p11 = scmp.lt.s32.totalorder %s4561_s30, %s4555_s8 }
 0x2db   : > { %p4558_p9 = pneg %p4557_p8  ;;  %p4564_p12 = por %p4563_p11, %p4562_p10 }
 0x2dd   : > { %p4565_p13 = pnand %p4564_p12, %p4558_p9 }
 0x2df   : > { %4568 = shalt.err (!%p4565_p13)
}
 0x2e0   : > { %s4569_s6 = scalar_lea.hbm %s6403_s7, 16  ;;  %s4573_s28 = scalar_lea.hbm %s6478_s4, 32 }
 0x2e1   : > { %p4570_p0 = scmp.ne.s32.totalorder %s6403_s7, %s4569_s6  ;;  %p4574_p3 = scmp.lt.u32.totalorder %s6403_s7, %s6478_s4 }
 0x2e2   : > { %p4575_p4 = scmp.lt.u32.totalorder %s4573_s28, %s4569_s6  ;;  %p4577_p8 = scmp.lt.u32.totalorder %s4569_s6, %s6403_s7 }
 0x2e3   : > { %p4571_p1 = pnand %p4570_p0, %p4700_p5 }
 0x2e4   : > { %p4576_p7 = por %p4575_p4, %p4574_p3 }
 0x2e5   : > { %p4572_p2 = pneg %p4571_p1 }
 0x2e6   : > { %p4578_p9 = por %p4577_p8, %p4576_p7 }
 0x2e8   : > { %p4579_p10 = pnand %p4578_p9, %p4572_p2 }
 0x2ea   : > { %4582 = shalt.err (!%p4579_p10)
}
 0x2eb   : > { %4359 = dma.vmem_to_hbm [thread:$0]  (%p4700_p5), %s6405_s13, 16, %s6403_s7, %s6407_s5  }
 0x2ec PF: > { %p4373_p11 = scmp.ge.s32.totalorder %s4621_s18, 2  ;;  %s3651_s22 = sand.u32 1, %s4609_s15  }
 0x2ed   : > { %s3652_s10 = scalar_lea.sflag [#allocation3], %s3651_s22 }
 0x2ee   : > { %p4364_p12 = pnand %p4373_p11, %p4704_p6 }
 0x2f0   : > { %4600 = dma.done.wait (!%p4364_p12), %s3652_s10, 2048  }
 0x2f1   : > { %4602 = vsyncadd (!%p4364_p12), %s3652_s10, 4294965248  ;;  %s3660_s19 = sand.u32 1, %s3751_s20  }
 0x2f2   : > { %s3661_s9 = scalar_lea.sflag [#allocation5], %s3660_s19 }
 0x2f3   : > { %4604 = dma.done.wait (!%p4364_p12), %s3661_s9, 32  }
 0x2f4   : > { %4606 = vsyncadd (!%p4364_p12), %s3661_s9, 4294967264  ;;  %p18_p5 = scmp.ge.s32.totalorder %s4685_s21, 4   ;;  %s6485_s15 = smov %s4613_s16 }
 0x2f5   : > { %s6486_s16 = smov %s4617_s17  ;;  %s6487_s17 = smov %s4698_s24 }
 0x2f6   : > { %s6488_s18 = smov %s4685_s21  ;;  %20 = sbr.rel (!%p18_p5) target bundleno = 5 (0x5), region = 97 }
 0x2fd   :  { %3673 = vsyncpa [#allocation3], 1 }
 0x2fe   :  { %3675 = vsyncpa [#allocation3 + $0x1], 1 }
 0x2ff   :  { %3676 = vsyncpa [#allocation5], 1 }
 0x300   :  { %3678 = vsyncpa [#allocation5 + $0x1], 1 }

</bundles_post_ra>
